<compile_context>
chip_gen: v6e
topology: v6e:2x2x1
jax: 0.10.0
libtpu: 0.0.40
codegen_flags: <defaults>
</compile_context>

<pallas_src>
import functools
import math

import jax
import jax.numpy as jnp
from jax import lax
from jax.experimental import pallas as pl
from jax.experimental.pallas import tpu as pltpu

# ---------------- small config (module defaults scaled down) ----------------
TARGET_VOCAB = 16
NUM_M = 2          # num_M
PRE_C = 8          # c (conv channels)
D_MODEL = 32
NUM_HEADS = 4
DH = D_MODEL // NUM_HEADS
DFF = 64
N_ENC = 2          # num_layers_enc
N_DEC = 2          # num_layers_dec

BATCH = 2
TIME = 16
FREQ = 16
LT = 6             # target sequence length

LN_EPS = 1e-5      # PyTorch nn.LayerNorm default


# ============================ Pallas kernels =================================
def _conv3x3_kernel(x_ref, w_ref, b_ref, o_ref, *, stride, Ho, Wo, Hph):
    """3x3 conv (+bias+ReLU) over one batch element.

    x_ref: (1, S*S*Hph, Wph, Cin) -- phase-decomposed padded NHWC input
           (phase (ph,pw) occupies rows [(ph*S+pw)*Hph, +Hph)).
    w_ref: (9, Cin, Cout) tap-major weights; b_ref: (1, Cout)
    o_ref: (1, Ho*Wo, Cout)
    """
    S = stride
    cout = w_ref.shape[2]
    acc = jnp.zeros((Ho * Wo, cout), jnp.float32)
    for ki in range(3):
        for kj in range(3):
            ph, oh = ki % S, ki // S
            pw, ow = kj % S, kj // S
            r0 = (ph * S + pw) * Hph + oh
            tap = x_ref[0, r0:r0 + Ho, ow:ow + Wo, :]          # (Ho, Wo, Cin)
            tap2 = tap.reshape(Ho * Wo, tap.shape[-1])
            acc = acc + jnp.dot(tap2, w_ref[ki * 3 + kj],
                                preferred_element_type=jnp.float32)
    o_ref[0] = jnp.maximum(acc + b_ref[...], 0.0)


def _proj_pos_kernel(x_ref, w_ref, b_ref, pos_ref, o_ref, *, scale):
    """Pre_Net output projection fused with sqrt(d)*x + positional encoding."""
    x = x_ref[0]                                               # (T, CF)
    y = jnp.dot(x, w_ref[...], preferred_element_type=jnp.float32) + b_ref[...]
    o_ref[0] = y * scale + pos_ref[...]


def _embed_pos_kernel(t_ref, emb_ref, pos_ref, o_ref, *, scale):
    """Token embedding (one-hot matmul) fused with sqrt(d) scale + pos enc."""
    tar = t_ref[0]                                             # (Lt, 1) int32
    L, V = tar.shape[0], emb_ref.shape[0]
    iota = lax.broadcasted_iota(jnp.int32, (L, V), 1)
    onehot = (iota == tar).astype(jnp.float32)                 # (Lt, V)
    e = jnp.dot(onehot, emb_ref[...], preferred_element_type=jnp.float32)
    o_ref[0] = e * scale + pos_ref[...]


def _attn_block_kernel(xq_ref, xkv_ref, wqkv_ref, bqkv_ref, wo_ref, bo_ref,
                       mb_ref, g_ref, beta_ref, o_ref, *, num_heads, self_attn):
    """Fused MHA sub-layer: QKV proj + attention + out proj + residual + LN.

    All intermediates stay in VMEM/vregs; one launch per sub-layer per batch.
    Heads are processed with a small static loop (H=4); output projection is
    accumulated per head so no concat is needed.
    """
    D = xq_ref.shape[-1]
    Dh = D // num_heads
    scale = 1.0 / math.sqrt(Dh)

    xq = xq_ref[0]                                             # (Lq, D)
    wqkv = wqkv_ref[...]                                       # (D, 3D)
    bqkv = bqkv_ref[...]                                       # (1, 3D)
    if self_attn:
        qkv = jnp.dot(xq, wqkv, preferred_element_type=jnp.float32) + bqkv
        q, k, v = qkv[:, :D], qkv[:, D:2 * D], qkv[:, 2 * D:]
    else:
        xkv = xkv_ref[0]                                       # (Lk, D)
        q = jnp.dot(xq, wqkv[:, :D],
                    preferred_element_type=jnp.float32) + bqkv[:, :D]
        kv = jnp.dot(xkv, wqkv[:, D:],
                     preferred_element_type=jnp.float32) + bqkv[:, D:]
        k, v = kv[:, :D], kv[:, D:]

    mb = mb_ref[0]                                             # (Lq, Lk) bias
    wo = wo_ref[...]                                           # (D, D)
    acc = jnp.zeros((xq.shape[0], D), jnp.float32)
    for h in range(num_heads):
        sl = slice(h * Dh, (h + 1) * Dh)
        s = lax.dot_general(q[:, sl], k[:, sl], (((1,), (1,)), ((), ())),
                            preferred_element_type=jnp.float32) * scale + mb
        s = s - jnp.max(s, axis=-1, keepdims=True)
        e = jnp.exp(s)
        p = e / jnp.sum(e, axis=-1, keepdims=True)
        ctx = jnp.dot(p, v[:, sl], preferred_element_type=jnp.float32)
        acc = acc + jnp.dot(ctx, wo[sl, :], preferred_element_type=jnp.float32)

    y = xq + acc + bo_ref[...]
    mean = jnp.mean(y, axis=-1, keepdims=True)
    var = jnp.mean((y - mean) ** 2, axis=-1, keepdims=True)
    o_ref[0] = (y - mean) * lax.rsqrt(var + LN_EPS) * g_ref[...] + beta_ref[...]


def _ffn_block_kernel(x_ref, w1_ref, b1_ref, w2_ref, b2_ref, g_ref, beta_ref,
                      o_ref):
    """Fused FFN sub-layer: FFN1 + ReLU + FFN2 + residual + LayerNorm."""
    x = x_ref[0]                                               # (L, D)
    h = jnp.maximum(jnp.dot(x, w1_ref[...],
                            preferred_element_type=jnp.float32) + b1_ref[...],
                    0.0)
    f = jnp.dot(h, w2_ref[...], preferred_element_type=jnp.float32) + b2_ref[...]
    y = x + f
    mean = jnp.mean(y, axis=-1, keepdims=True)
    var = jnp.mean((y - mean) ** 2, axis=-1, keepdims=True)
    o_ref[0] = (y - mean) * lax.rsqrt(var + LN_EPS) * g_ref[...] + beta_ref[...]


def _final_proj_kernel(x_ref, w_ref, b_ref, o_ref):
    o_ref[0] = jnp.dot(x_ref[0], w_ref[...],
                       preferred_element_type=jnp.float32) + b_ref[...]


# ============================ Pallas wrappers ================================
_PAR = pltpu.CompilerParams(dimension_semantics=("parallel",))


def conv3x3_pallas(x_nhwc, w, b, stride):
    """3x3 conv, pad=1, stride 1 or 2, fused bias+ReLU.  x: NHWC, w: (Cout,Cin,3,3)."""
    B, H, W, Cin = x_nhwc.shape
    Cout = w.shape[0]
    if Cin < 8:  # avoid degenerate contraction dims on the MXU
        x_nhwc = jnp.pad(x_nhwc, ((0, 0), (0, 0), (0, 0), (0, 8 - Cin)))
        w = jnp.pad(w, ((0, 0), (0, 8 - Cin), (0, 0), (0, 0)))
        Cin = 8
    S = stride
    xp = jnp.pad(x_nhwc, ((0, 0), (1, 1), (1, 1), (0, 0)))
    Ho = (H - 1) // S + 1
    Wo = (W - 1) // S + 1
    if S == 1:
        xph = xp
        Hph, Wph = H + 2, W + 2
    else:
        phases = [xp[:, i::S, j::S, :] for i in range(S) for j in range(S)]
        assert all(p.shape == phases[0].shape for p in phases)
        Hph, Wph = phases[0].shape[1], phases[0].shape[2]
        xph = jnp.concatenate(phases, axis=1)                  # (B, S*S*Hph, Wph, Cin)
    w9 = w.transpose(2, 3, 1, 0).reshape(9, Cin, Cout)         # (tap, Cin, Cout)

    kernel = functools.partial(_conv3x3_kernel, stride=S, Ho=Ho, Wo=Wo, Hph=Hph)
    out = pl.pallas_call(
        kernel,
        out_shape=jax.ShapeDtypeStruct((B, Ho * Wo, Cout), jnp.float32),
        grid=(B,),
        in_specs=[
            pl.BlockSpec((1, S * S * Hph, Wph, Cin), lambda i: (i, 0, 0, 0)),
            pl.BlockSpec((9, Cin, Cout), lambda i: (0, 0, 0)),
            pl.BlockSpec((1, Cout), lambda i: (0, 0)),
        ],
        out_specs=pl.BlockSpec((1, Ho * Wo, Cout), lambda i: (i, 0, 0)),
        compiler_params=_PAR,
    )(xph, w9, b.reshape(1, Cout))
    return out.reshape(B, Ho, Wo, Cout)


def proj_pos_pallas(x, w, b, pos, scale):
    B, T, CF = x.shape
    D = w.shape[1]
    kernel = functools.partial(_proj_pos_kernel, scale=scale)
    return pl.pallas_call(
        kernel,
        out_shape=jax.ShapeDtypeStruct((B, T, D), jnp.float32),
        grid=(B,),
        in_specs=[
            pl.BlockSpec((1, T, CF), lambda i: (i, 0, 0)),
            pl.BlockSpec((CF, D), lambda i: (0, 0)),
            pl.BlockSpec((1, D), lambda i: (0, 0)),
            pl.BlockSpec((T, D), lambda i: (0, 0)),
        ],
        out_specs=pl.BlockSpec((1, T, D), lambda i: (i, 0, 0)),
        compiler_params=_PAR,
    )(x, w, b.reshape(1, D), pos)


def embed_pos_pallas(targets, emb, pos, scale):
    B, Lt = targets.shape
    V, D = emb.shape
    t3 = targets.astype(jnp.int32).reshape(B, Lt, 1)
    kernel = functools.partial(_embed_pos_kernel, scale=scale)
    return pl.pallas_call(
        kernel,
        out_shape=jax.ShapeDtypeStruct((B, Lt, D), jnp.float32),
        grid=(B,),
        in_specs=[
            pl.BlockSpec((1, Lt, 1), lambda i: (i, 0, 0)),
            pl.BlockSpec((V, D), lambda i: (0, 0)),
            pl.BlockSpec((Lt, D), lambda i: (0, 0)),
        ],
        out_specs=pl.BlockSpec((1, Lt, D), lambda i: (i, 0, 0)),
        compiler_params=_PAR,
    )(t3, emb, pos)


def attn_block_pallas(xq, xkv, mp, lnp, mask_bias, self_attn):
    B, Lq, D = xq.shape
    Lk = xkv.shape[1]
    kernel = functools.partial(_attn_block_kernel, num_heads=NUM_HEADS,
                               self_attn=self_attn)
    return pl.pallas_call(
        kernel,
        out_shape=jax.ShapeDtypeStruct((B, Lq, D), jnp.float32),
        grid=(B,),
        in_specs=[
            pl.BlockSpec((1, Lq, D), lambda b: (b, 0, 0)),
            pl.BlockSpec((1, Lk, D), lambda b: (b, 0, 0)),
            pl.BlockSpec((D, 3 * D), lambda b: (0, 0)),
            pl.BlockSpec((1, 3 * D), lambda b: (0, 0)),
            pl.BlockSpec((D, D), lambda b: (0, 0)),
            pl.BlockSpec((1, D), lambda b: (0, 0)),
            pl.BlockSpec((1, Lq, Lk), lambda b: (b, 0, 0)),
            pl.BlockSpec((1, D), lambda b: (0, 0)),
            pl.BlockSpec((1, D), lambda b: (0, 0)),
        ],
        out_specs=pl.BlockSpec((1, Lq, D), lambda b: (b, 0, 0)),
        compiler_params=_PAR,
    )(xq, xkv, mp["wqkv"], mp["bqkv"].reshape(1, 3 * D), mp["wo"]["w"],
      mp["wo"]["b"].reshape(1, D), mask_bias, lnp["g"].reshape(1, D),
      lnp["b"].reshape(1, D))


def ffn_block_pallas(x, f1, f2, lnp):
    B, L, D = x.shape
    DFFl = f1["w"].shape[1]
    return pl.pallas_call(
        _ffn_block_kernel,
        out_shape=jax.ShapeDtypeStruct((B, L, D), jnp.float32),
        grid=(B,),
        in_specs=[
            pl.BlockSpec((1, L, D), lambda b: (b, 0, 0)),
            pl.BlockSpec((D, DFFl), lambda b: (0, 0)),
            pl.BlockSpec((1, DFFl), lambda b: (0, 0)),
            pl.BlockSpec((DFFl, D), lambda b: (0, 0)),
            pl.BlockSpec((1, D), lambda b: (0, 0)),
            pl.BlockSpec((1, D), lambda b: (0, 0)),
            pl.BlockSpec((1, D), lambda b: (0, 0)),
        ],
        out_specs=pl.BlockSpec((1, L, D), lambda b: (b, 0, 0)),
        compiler_params=_PAR,
    )(x, f1["w"], f1["b"].reshape(1, DFFl), f2["w"], f2["b"].reshape(1, D),
      lnp["g"].reshape(1, D), lnp["b"].reshape(1, D))


def final_proj_pallas(x, w, b):
    B, L, D = x.shape
    V = w.shape[1]
    return pl.pallas_call(
        _final_proj_kernel,
        out_shape=jax.ShapeDtypeStruct((B, L, V), jnp.float32),
        grid=(B,),
        in_specs=[
            pl.BlockSpec((1, L, D), lambda b: (b, 0, 0)),
            pl.BlockSpec((D, V), lambda b: (0, 0)),
            pl.BlockSpec((1, V), lambda b: (0, 0)),
        ],
        out_specs=pl.BlockSpec((1, L, V), lambda b: (b, 0, 0)),
        compiler_params=_PAR,
    )(x, w, b.reshape(1, V))


# ============================ model glue =====================================
def positional_encoding(length, d_model):
    pos = jnp.arange(length, dtype=jnp.float32)[:, None]
    i = jnp.arange(d_model)[None, :]
    rates = 1.0 / jnp.power(10000.0, (2 * (i // 2)).astype(jnp.float32) / d_model)
    ang = pos * rates
    return jnp.where(i % 2 == 0, jnp.sin(ang), jnp.cos(ang)).astype(jnp.float32)


def _mask_bias(mask, B, Lq, Lk):
    """PyTorch convention: mask==1 -> add -1e9 to logits.  Computed once."""
    m = jnp.broadcast_to(mask.astype(jnp.float32), (B, 1, Lq, Lk))
    return m.reshape(B, Lq, Lk) * (-1e9)


def pre_net_apply(pre, inputs_nchw):
    x = inputs_nchw.transpose(0, 2, 3, 1)                       # NHWC (B,T,F,1)
    x = conv3x3_pallas(x, pre["conv1"]["w"], pre["conv1"]["b"], stride=2)
    x = conv3x3_pallas(x, pre["conv2"]["w"], pre["conv2"]["b"], stride=2)
    for cp in pre["convM"]:
        x = conv3x3_pallas(x, cp["w"], cp["b"], stride=1)
    B, Tp, Fp, C = x.shape
    # channel-major (C, F') feature ordering, as in the NCHW reference
    return x.transpose(0, 1, 3, 2).reshape(B, Tp, C * Fp)


def forward(params, inputs, targets, enc_padding_mask, look_ahead_mask,
            dec_padding_mask):
    # ---- Pre_Net ----
    x = pre_net_apply(params["pre"], inputs)                    # (B, T', C*F')
    B, Tp, _ = x.shape
    sqd = math.sqrt(D_MODEL)

    # ---- Encoder ----
    h = proj_pos_pallas(x, params["pre"]["proj"]["w"], params["pre"]["proj"]["b"],
                        positional_encoding(Tp, D_MODEL), sqd)
    enc_bias = _mask_bias(enc_padding_mask, B, Tp, Tp)
    for lp in params["enc"]:
        h = attn_block_pallas(h, h, lp["mha"], lp["ln1"], enc_bias, True)
        h = ffn_block_pallas(h, lp["ffn1"], lp["ffn2"], lp["ln2"])
    enc_out = h

    # ---- Decoder ----
    Lt = targets.shape[1]
    d = embed_pos_pallas(targets, params["emb"],
                         positional_encoding(Lt, D_MODEL), sqd)
    la_bias = _mask_bias(look_ahead_mask, B, Lt, Lt)
    xa_bias = _mask_bias(dec_padding_mask, B, Lt, Tp)
    for lp in params["dec"]:
        d = attn_block_pallas(d, d, lp["mha1"], lp["ln1"], la_bias, True)
        d = attn_block_pallas(d, enc_out, lp["mha2"], lp["ln2"], xa_bias, False)
        d = ffn_block_pallas(d, lp["ffn1"], lp["ffn2"], lp["ln3"])

    return final_proj_pallas(d, params["final"]["w"], params["final"]["b"])


# ============================ parameter init =================================
def init_params(key):
    ks = jax.random.split(key, 256)
    idx = [0]

    def nk():
        k = ks[idx[0]]
        idx[0] += 1
        return k

    def dense(din, dout):
        return {"w": 0.02 * jax.random.normal(nk(), (din, dout), jnp.float32),
                "b": jnp.zeros((dout,), jnp.float32)}

    def conv(cin, cout):
        return {"w": 0.05 * jax.random.normal(nk(), (cout, cin, 3, 3), jnp.float32),
                "b": jnp.zeros((cout,), jnp.float32)}

    def ln():
        return {"g": jnp.ones((D_MODEL,), jnp.float32),
                "b": jnp.zeros((D_MODEL,), jnp.float32)}

    def mha_p():
        # Q, K, V projections stored as one fused (D, 3D) weight.
        return {"wqkv": 0.02 * jax.random.normal(nk(), (D_MODEL, 3 * D_MODEL),
                                                 jnp.float32),
                "bqkv": jnp.zeros((3 * D_MODEL,), jnp.float32),
                "wo": dense(D_MODEL, D_MODEL)}

    def enc_layer_p():
        return {"mha": mha_p(), "ln1": ln(), "ffn1": dense(D_MODEL, DFF),
                "ffn2": dense(DFF, D_MODEL), "ln2": ln()}

    def dec_layer_p():
        return {"mha1": mha_p(), "ln1": ln(), "mha2": mha_p(), "ln2": ln(),
                "ffn1": dense(D_MODEL, DFF), "ffn2": dense(DFF, D_MODEL),
                "ln3": ln()}

    return {
        "pre": {"conv1": conv(1, PRE_C), "conv2": conv(PRE_C, PRE_C),
                "convM": [conv(PRE_C, PRE_C) for _ in range(NUM_M)],
                "proj": dense(PRE_C * (FREQ // 4), D_MODEL)},
        "enc": [enc_layer_p() for _ in range(N_ENC)],
        "dec": [dec_layer_p() for _ in range(N_DEC)],
        "emb": 0.02 * jax.random.normal(nk(), (TARGET_VOCAB, D_MODEL), jnp.float32),
        "final": dense(D_MODEL, TARGET_VOCAB),
    }


# ================================ main =======================================
if __name__ == "__main__":
    key = jax.random.PRNGKey(0)
    kp, kx, kt = jax.random.split(key, 3)
    params = init_params(kp)

    inputs = jax.random.normal(kx, (BATCH, 1, TIME, FREQ), jnp.float32)   # NCHW
    targets = jax.random.randint(kt, (BATCH, LT), 0, TARGET_VOCAB)

    L_enc = TIME // 4  # after two stride-2 convs
    enc_padding_mask = jnp.zeros((BATCH, 1, 1, L_enc), jnp.float32)
    dec_padding_mask = jnp.zeros((BATCH, 1, 1, L_enc), jnp.float32)
    look_ahead = 1.0 - jnp.tril(jnp.ones((LT, LT), jnp.float32))
    look_ahead_mask = jnp.broadcast_to(look_ahead, (BATCH, 1, LT, LT))

    out = jax.jit(forward)(params, inputs, targets, enc_padding_mask,
                           look_ahead_mask, dec_padding_mask)
    out = jax.block_until_ready(out)
    assert out.shape == (BATCH, LT, TARGET_VOCAB), out.shape
    assert bool(jnp.all(jnp.isfinite(out)))
    print("KERNEL_OK")
</pallas_src>

<mosaic_0001>
module attributes {stable_mosaic.version = 11 : i64} {
  func.func @_conv3x3_kernel(%arg0: i32, %arg1: memref<1x36x9x8xf32, #tpu.memory_space<vmem>>, %arg2: memref<9x8x8xf32, #tpu.memory_space<vmem>>, %arg3: memref<1x8xf32, #tpu.memory_space<vmem>>, %arg4: memref<1x64x8xf32, #tpu.memory_space<vmem>>) attributes {dimension_semantics = [#tpu.dimension_semantics<parallel>], iteration_bounds = array<i64: 2>, scalar_prefetch = 0 : i64, scratch_operands = 0 : i64, tpu.core_type = #tpu.core_type<tc>, window_params = [{transform_indices = @transform_0, window_bounds = array<i64: 1, 36, 9, 8>}, {pipeline_mode = #tpu.pipeline_mode<synchronous>, transform_indices = @transform_1, window_bounds = array<i64: 9, 8, 8>}, {pipeline_mode = #tpu.pipeline_mode<synchronous>, transform_indices = @transform_2, window_bounds = array<i64: 1, 8>}, {transform_indices = @transform_3, window_bounds = array<i64: 1, 64, 8>}]} {
    %cst = arith.constant 0.000000e+00 : f32
    %0 = vector.broadcast %cst : f32 to vector<64x8xf32>
    %c0 = arith.constant 0 : index
    %c0_0 = arith.constant 0 : index
    %c0_1 = arith.constant 0 : index
    %c0_2 = arith.constant 0 : index
    %1 = vector.load %arg1[%c0, %c0_0, %c0_1, %c0_2] : memref<1x36x9x8xf32, #tpu.memory_space<vmem>>, vector<1x8x8x8xf32>
    %2 = vector.shape_cast %1 : vector<1x8x8x8xf32> to vector<8x8x8xf32>
    %3 = vector.shape_cast %2 : vector<8x8x8xf32> to vector<64x8xf32>
    %c0_3 = arith.constant 0 : index
    %c0_4 = arith.constant 0 : index
    %c0_5 = arith.constant 0 : index
    %4 = vector.load %arg2[%c0_3, %c0_4, %c0_5] : memref<9x8x8xf32, #tpu.memory_space<vmem>>, vector<1x8x8xf32>
    %5 = vector.shape_cast %4 : vector<1x8x8xf32> to vector<8x8xf32>
    %cst_6 = arith.constant dense<0.000000e+00> : vector<64x8xf32>
    %6 = tpu.matmul %3, %5, %cst_6 {dimension_numbers = #tpu.dot_dimension_numbers<[1], [0], [0], [1], [0, 0, 1, 1], [], []>} : vector<64x8xf32>, vector<8x8xf32>, vector<64x8xf32> -> vector<64x8xf32>
    %7 = arith.addf %0, %6 : vector<64x8xf32>
    %c0_7 = arith.constant 0 : index
    %c9 = arith.constant 9 : index
    %c0_8 = arith.constant 0 : index
    %c0_9 = arith.constant 0 : index
    %8 = vector.load %arg1[%c0_7, %c9, %c0_8, %c0_9] : memref<1x36x9x8xf32, #tpu.memory_space<vmem>>, vector<1x8x8x8xf32>
    %9 = vector.shape_cast %8 : vector<1x8x8x8xf32> to vector<8x8x8xf32>
    %10 = vector.shape_cast %9 : vector<8x8x8xf32> to vector<64x8xf32>
    %c1 = arith.constant 1 : index
    %c0_10 = arith.constant 0 : index
    %c0_11 = arith.constant 0 : index
    %11 = vector.load %arg2[%c1, %c0_10, %c0_11] : memref<9x8x8xf32, #tpu.memory_space<vmem>>, vector<1x8x8xf32>
    %12 = vector.shape_cast %11 : vector<1x8x8xf32> to vector<8x8xf32>
    %cst_12 = arith.constant dense<0.000000e+00> : vector<64x8xf32>
    %13 = tpu.matmul %10, %12, %cst_12 {dimension_numbers = #tpu.dot_dimension_numbers<[1], [0], [0], [1], [0, 0, 1, 1], [], []>} : vector<64x8xf32>, vector<8x8xf32>, vector<64x8xf32> -> vector<64x8xf32>
    %14 = arith.addf %7, %13 : vector<64x8xf32>
    %c0_13 = arith.constant 0 : index
    %c0_14 = arith.constant 0 : index
    %c1_15 = arith.constant 1 : index
    %c0_16 = arith.constant 0 : index
    %15 = vector.load %arg1[%c0_13, %c0_14, %c1_15, %c0_16] : memref<1x36x9x8xf32, #tpu.memory_space<vmem>>, vector<1x8x8x8xf32>
    %16 = vector.shape_cast %15 : vector<1x8x8x8xf32> to vector<8x8x8xf32>
    %17 = vector.shape_cast %16 : vector<8x8x8xf32> to vector<64x8xf32>
    %c2 = arith.constant 2 : index
    %c0_17 = arith.constant 0 : index
    %c0_18 = arith.constant 0 : index
    %18 = vector.load %arg2[%c2, %c0_17, %c0_18] : memref<9x8x8xf32, #tpu.memory_space<vmem>>, vector<1x8x8xf32>
    %19 = vector.shape_cast %18 : vector<1x8x8xf32> to vector<8x8xf32>
    %cst_19 = arith.constant dense<0.000000e+00> : vector<64x8xf32>
    %20 = tpu.matmul %17, %19, %cst_19 {dimension_numbers = #tpu.dot_dimension_numbers<[1], [0], [0], [1], [0, 0, 1, 1], [], []>} : vector<64x8xf32>, vector<8x8xf32>, vector<64x8xf32> -> vector<64x8xf32>
    %21 = arith.addf %14, %20 : vector<64x8xf32>
    %c0_20 = arith.constant 0 : index
    %c18 = arith.constant 18 : index
    %c0_21 = arith.constant 0 : index
    %c0_22 = arith.constant 0 : index
    %22 = vector.load %arg1[%c0_20, %c18, %c0_21, %c0_22] : memref<1x36x9x8xf32, #tpu.memory_space<vmem>>, vector<1x8x8x8xf32>
    %23 = vector.shape_cast %22 : vector<1x8x8x8xf32> to vector<8x8x8xf32>
    %24 = vector.shape_cast %23 : vector<8x8x8xf32> to vector<64x8xf32>
    %c3 = arith.constant 3 : index
    %c0_23 = arith.constant 0 : index
    %c0_24 = arith.constant 0 : index
    %25 = vector.load %arg2[%c3, %c0_23, %c0_24] : memref<9x8x8xf32, #tpu.memory_space<vmem>>, vector<1x8x8xf32>
    %26 = vector.shape_cast %25 : vector<1x8x8xf32> to vector<8x8xf32>
    %cst_25 = arith.constant dense<0.000000e+00> : vector<64x8xf32>
    %27 = tpu.matmul %24, %26, %cst_25 {dimension_numbers = #tpu.dot_dimension_numbers<[1], [0], [0], [1], [0, 0, 1, 1], [], []>} : vector<64x8xf32>, vector<8x8xf32>, vector<64x8xf32> -> vector<64x8xf32>
    %28 = arith.addf %21, %27 : vector<64x8xf32>
    %c0_26 = arith.constant 0 : index
    %c27 = arith.constant 27 : index
    %c0_27 = arith.constant 0 : index
    %c0_28 = arith.constant 0 : index
    %29 = vector.load %arg1[%c0_26, %c27, %c0_27, %c0_28] : memref<1x36x9x8xf32, #tpu.memory_space<vmem>>, vector<1x8x8x8xf32>
    %30 = vector.shape_cast %29 : vector<1x8x8x8xf32> to vector<8x8x8xf32>
    %31 = vector.shape_cast %30 : vector<8x8x8xf32> to vector<64x8xf32>
    %c4 = arith.constant 4 : index
    %c0_29 = arith.constant 0 : index
    %c0_30 = arith.constant 0 : index
    %32 = vector.load %arg2[%c4, %c0_29, %c0_30] : memref<9x8x8xf32, #tpu.memory_space<vmem>>, vector<1x8x8xf32>
    %33 = vector.shape_cast %32 : vector<1x8x8xf32> to vector<8x8xf32>
    %cst_31 = arith.constant dense<0.000000e+00> : vector<64x8xf32>
    %34 = tpu.matmul %31, %33, %cst_31 {dimension_numbers = #tpu.dot_dimension_numbers<[1], [0], [0], [1], [0, 0, 1, 1], [], []>} : vector<64x8xf32>, vector<8x8xf32>, vector<64x8xf32> -> vector<64x8xf32>
    %35 = arith.addf %28, %34 : vector<64x8xf32>
    %c0_32 = arith.constant 0 : index
    %c18_33 = arith.constant 18 : index
    %c1_34 = arith.constant 1 : index
    %c0_35 = arith.constant 0 : index
    %36 = vector.load %arg1[%c0_32, %c18_33, %c1_34, %c0_35] : memref<1x36x9x8xf32, #tpu.memory_space<vmem>>, vector<1x8x8x8xf32>
    %37 = vector.shape_cast %36 : vector<1x8x8x8xf32> to vector<8x8x8xf32>
    %38 = vector.shape_cast %37 : vector<8x8x8xf32> to vector<64x8xf32>
    %c5 = arith.constant 5 : index
    %c0_36 = arith.constant 0 : index
    %c0_37 = arith.constant 0 : index
    %39 = vector.load %arg2[%c5, %c0_36, %c0_37] : memref<9x8x8xf32, #tpu.memory_space<vmem>>, vector<1x8x8xf32>
    %40 = vector.shape_cast %39 : vector<1x8x8xf32> to vector<8x8xf32>
    %cst_38 = arith.constant dense<0.000000e+00> : vector<64x8xf32>
    %41 = tpu.matmul %38, %40, %cst_38 {dimension_numbers = #tpu.dot_dimension_numbers<[1], [0], [0], [1], [0, 0, 1, 1], [], []>} : vector<64x8xf32>, vector<8x8xf32>, vector<64x8xf32> -> vector<64x8xf32>
    %42 = arith.addf %35, %41 : vector<64x8xf32>
    %c0_39 = arith.constant 0 : index
    %c1_40 = arith.constant 1 : index
    %c0_41 = arith.constant 0 : index
    %c0_42 = arith.constant 0 : index
    %43 = vector.load %arg1[%c0_39, %c1_40, %c0_41, %c0_42] : memref<1x36x9x8xf32, #tpu.memory_space<vmem>>, vector<1x8x8x8xf32>
    %44 = vector.shape_cast %43 : vector<1x8x8x8xf32> to vector<8x8x8xf32>
    %45 = vector.shape_cast %44 : vector<8x8x8xf32> to vector<64x8xf32>
    %c6 = arith.constant 6 : index
    %c0_43 = arith.constant 0 : index
    %c0_44 = arith.constant 0 : index
    %46 = vector.load %arg2[%c6, %c0_43, %c0_44] : memref<9x8x8xf32, #tpu.memory_space<vmem>>, vector<1x8x8xf32>
    %47 = vector.shape_cast %46 : vector<1x8x8xf32> to vector<8x8xf32>
    %cst_45 = arith.constant dense<0.000000e+00> : vector<64x8xf32>
    %48 = tpu.matmul %45, %47, %cst_45 {dimension_numbers = #tpu.dot_dimension_numbers<[1], [0], [0], [1], [0, 0, 1, 1], [], []>} : vector<64x8xf32>, vector<8x8xf32>, vector<64x8xf32> -> vector<64x8xf32>
    %49 = arith.addf %42, %48 : vector<64x8xf32>
    %c0_46 = arith.constant 0 : index
    %c10 = arith.constant 10 : index
    %c0_47 = arith.constant 0 : index
    %c0_48 = arith.constant 0 : index
    %50 = vector.load %arg1[%c0_46, %c10, %c0_47, %c0_48] : memref<1x36x9x8xf32, #tpu.memory_space<vmem>>, vector<1x8x8x8xf32>
    %51 = vector.shape_cast %50 : vector<1x8x8x8xf32> to vector<8x8x8xf32>
    %52 = vector.shape_cast %51 : vector<8x8x8xf32> to vector<64x8xf32>
    %c7 = arith.constant 7 : index
    %c0_49 = arith.constant 0 : index
    %c0_50 = arith.constant 0 : index
    %53 = vector.load %arg2[%c7, %c0_49, %c0_50] : memref<9x8x8xf32, #tpu.memory_space<vmem>>, vector<1x8x8xf32>
    %54 = vector.shape_cast %53 : vector<1x8x8xf32> to vector<8x8xf32>
    %cst_51 = arith.constant dense<0.000000e+00> : vector<64x8xf32>
    %55 = tpu.matmul %52, %54, %cst_51 {dimension_numbers = #tpu.dot_dimension_numbers<[1], [0], [0], [1], [0, 0, 1, 1], [], []>} : vector<64x8xf32>, vector<8x8xf32>, vector<64x8xf32> -> vector<64x8xf32>
    %56 = arith.addf %49, %55 : vector<64x8xf32>
    %c0_52 = arith.constant 0 : index
    %c1_53 = arith.constant 1 : index
    %c1_54 = arith.constant 1 : index
    %c0_55 = arith.constant 0 : index
    %57 = vector.load %arg1[%c0_52, %c1_53, %c1_54, %c0_55] : memref<1x36x9x8xf32, #tpu.memory_space<vmem>>, vector<1x8x8x8xf32>
    %58 = vector.shape_cast %57 : vector<1x8x8x8xf32> to vector<8x8x8xf32>
    %59 = vector.shape_cast %58 : vector<8x8x8xf32> to vector<64x8xf32>
    %c8 = arith.constant 8 : index
    %c0_56 = arith.constant 0 : index
    %c0_57 = arith.constant 0 : index
    %60 = vector.load %arg2[%c8, %c0_56, %c0_57] : memref<9x8x8xf32, #tpu.memory_space<vmem>>, vector<1x8x8xf32>
    %61 = vector.shape_cast %60 : vector<1x8x8xf32> to vector<8x8xf32>
    %cst_58 = arith.constant dense<0.000000e+00> : vector<64x8xf32>
    %62 = tpu.matmul %59, %61, %cst_58 {dimension_numbers = #tpu.dot_dimension_numbers<[1], [0], [0], [1], [0, 0, 1, 1], [], []>} : vector<64x8xf32>, vector<8x8xf32>, vector<64x8xf32> -> vector<64x8xf32>
    %63 = arith.addf %56, %62 : vector<64x8xf32>
    %c0_59 = arith.constant 0 : index
    %c0_60 = arith.constant 0 : index
    %64 = vector.load %arg3[%c0_59, %c0_60] : memref<1x8xf32, #tpu.memory_space<vmem>>, vector<1x8xf32>
    %65 = vector.broadcast %64 : vector<1x8xf32> to vector<64x8xf32>
    %66 = arith.addf %63, %65 : vector<64x8xf32>
    %cst_61 = arith.constant 0.000000e+00 : f32
    %67 = vector.broadcast %cst_61 : f32 to vector<64x8xf32>
    %68 = arith.maximumf %66, %67 : vector<64x8xf32>
    %c0_62 = arith.constant 0 : index
    %c0_63 = arith.constant 0 : index
    %c0_64 = arith.constant 0 : index
    %69 = vector.load %arg4[%c0_62, %c0_63, %c0_64] : memref<1x64x8xf32, #tpu.memory_space<vmem>>, vector<1x64x8xf32>
    %70 = vector.shape_cast %69 : vector<1x64x8xf32> to vector<64x8xf32>
    %71 = vector.shape_cast %68 : vector<64x8xf32> to vector<1x64x8xf32>
    tpu.vector_store %arg4[%c0_62, %c0_63, %c0_64], %71 {strides = array<i32>} : memref<1x64x8xf32, #tpu.memory_space<vmem>>, vector<1x64x8xf32>,
    return
  }
  func.func @transform_0(%arg0: i32) -> (i32, i32, i32, i32) {
    %c0_i32 = arith.constant 0 : i32
    %c0_i32_0 = arith.constant 0 : i32
    %c0_i32_1 = arith.constant 0 : i32
    %c0_i32_2 = arith.constant 0 : i32
    return %arg0, %c0_i32, %c0_i32_0, %c0_i32_1 : i32, i32, i32, i32
  }
  func.func @transform_1(%arg0: i32) -> (i32, i32, i32) {
    %c0_i32 = arith.constant 0 : i32
    %c0_i32_0 = arith.constant 0 : i32
    %c0_i32_1 = arith.constant 0 : i32
    %c0_i32_2 = arith.constant 0 : i32
    return %c0_i32, %c0_i32_0, %c0_i32_1 : i32, i32, i32
  }
  func.func @transform_2(%arg0: i32) -> (i32, i32) {
    %c0_i32 = arith.constant 0 : i32
    %c0_i32_0 = arith.constant 0 : i32
    %c0_i32_1 = arith.constant 0 : i32
    return %c0_i32, %c0_i32_0 : i32, i32
  }
  func.func @transform_3(%arg0: i32) -> (i32, i32, i32) {
    %c0_i32 = arith.constant 0 : i32
    %c0_i32_0 = arith.constant 0 : i32
    %c0_i32_1 = arith.constant 0 : i32
    return %arg0, %c0_i32, %c0_i32_0 : i32, i32, i32
  }
}

module attributes {stable_mosaic.version = 11 : i64} {
  func.func @_conv3x3_kernel(%arg0: i32, %arg1: memref<1x6x6x8xf32, #tpu.memory_space<vmem>>, %arg2: memref<9x8x8xf32, #tpu.memory_space<vmem>>, %arg3: memref<1x8xf32, #tpu.memory_space<vmem>>, %arg4: memref<1x16x8xf32, #tpu.memory_space<vmem>>) attributes {dimension_semantics = [#tpu.dimension_semantics<parallel>], iteration_bounds = array<i64: 2>, scalar_prefetch = 0 : i64, scratch_operands = 0 : i64, tpu.core_type = #tpu.core_type<tc>, window_params = [{transform_indices = @transform_0, window_bounds = array<i64: 1, 6, 6, 8>}, {pipeline_mode = #tpu.pipeline_mode<synchronous>, transform_indices = @transform_1, window_bounds = array<i64: 9, 8, 8>}, {pipeline_mode = #tpu.pipeline_mode<synchronous>, transform_indices = @transform_2, window_bounds = array<i64: 1, 8>}, {transform_indices = @transform_3, window_bounds = array<i64: 1, 16, 8>}]} {
    %cst = arith.constant 0.000000e+00 : f32
    %0 = vector.broadcast %cst : f32 to vector<16x8xf32>
    %c0 = arith.constant 0 : index
    %c0_0 = arith.constant 0 : index
    %c0_1 = arith.constant 0 : index
    %c0_2 = arith.constant 0 : index
    %1 = vector.load %arg1[%c0, %c0_0, %c0_1, %c0_2] : memref<1x6x6x8xf32, #tpu.memory_space<vmem>>, vector<1x4x4x8xf32>
    %2 = vector.shape_cast %1 : vector<1x4x4x8xf32> to vector<4x4x8xf32>
    %3 = vector.shape_cast %2 : vector<4x4x8xf32> to vector<16x8xf32>
    %c0_3 = arith.constant 0 : index
    %c0_4 = arith.constant 0 : index
    %c0_5 = arith.constant 0 : index
    %4 = vector.load %arg2[%c0_3, %c0_4, %c0_5] : memref<9x8x8xf32, #tpu.memory_space<vmem>>, vector<1x8x8xf32>
    %5 = vector.shape_cast %4 : vector<1x8x8xf32> to vector<8x8xf32>
    %cst_6 = arith.constant dense<0.000000e+00> : vector<16x8xf32>
    %6 = tpu.matmul %3, %5, %cst_6 {dimension_numbers = #tpu.dot_dimension_numbers<[1], [0], [0], [1], [0, 0, 1, 1], [], []>} : vector<16x8xf32>, vector<8x8xf32>, vector<16x8xf32> -> vector<16x8xf32>
    %7 = arith.addf %0, %6 : vector<16x8xf32>
    %c0_7 = arith.constant 0 : index
    %c0_8 = arith.constant 0 : index
    %c1 = arith.constant 1 : index
    %c0_9 = arith.constant 0 : index
    %8 = vector.load %arg1[%c0_7, %c0_8, %c1, %c0_9] : memref<1x6x6x8xf32, #tpu.memory_space<vmem>>, vector<1x4x4x8xf32>
    %9 = vector.shape_cast %8 : vector<1x4x4x8xf32> to vector<4x4x8xf32>
    %10 = vector.shape_cast %9 : vector<4x4x8xf32> to vector<16x8xf32>
    %c1_10 = arith.constant 1 : index
    %c0_11 = arith.constant 0 : index
    %c0_12 = arith.constant 0 : index
    %11 = vector.load %arg2[%c1_10, %c0_11, %c0_12] : memref<9x8x8xf32, #tpu.memory_space<vmem>>, vector<1x8x8xf32>
    %12 = vector.shape_cast %11 : vector<1x8x8xf32> to vector<8x8xf32>
    %cst_13 = arith.constant dense<0.000000e+00> : vector<16x8xf32>
    %13 = tpu.matmul %10, %12, %cst_13 {dimension_numbers = #tpu.dot_dimension_numbers<[1], [0], [0], [1], [0, 0, 1, 1], [], []>} : vector<16x8xf32>, vector<8x8xf32>, vector<16x8xf32> -> vector<16x8xf32>
    %14 = arith.addf %7, %13 : vector<16x8xf32>
    %c0_14 = arith.constant 0 : index
    %c0_15 = arith.constant 0 : index
    %c2 = arith.constant 2 : index
    %c0_16 = arith.constant 0 : index
    %15 = vector.load %arg1[%c0_14, %c0_15, %c2, %c0_16] : memref<1x6x6x8xf32, #tpu.memory_space<vmem>>, vector<1x4x4x8xf32>
    %16 = vector.shape_cast %15 : vector<1x4x4x8xf32> to vector<4x4x8xf32>
    %17 = vector.shape_cast %16 : vector<4x4x8xf32> to vector<16x8xf32>
    %c2_17 = arith.constant 2 : index
    %c0_18 = arith.constant 0 : index
    %c0_19 = arith.constant 0 : index
    %18 = vector.load %arg2[%c2_17, %c0_18, %c0_19] : memref<9x8x8xf32, #tpu.memory_space<vmem>>, vector<1x8x8xf32>
    %19 = vector.shape_cast %18 : vector<1x8x8xf32> to vector<8x8xf32>
    %cst_20 = arith.constant dense<0.000000e+00> : vector<16x8xf32>
    %20 = tpu.matmul %17, %19, %cst_20 {dimension_numbers = #tpu.dot_dimension_numbers<[1], [0], [0], [1], [0, 0, 1, 1], [], []>} : vector<16x8xf32>, vector<8x8xf32>, vector<16x8xf32> -> vector<16x8xf32>
    %21 = arith.addf %14, %20 : vector<16x8xf32>
    %c0_21 = arith.constant 0 : index
    %c1_22 = arith.constant 1 : index
    %c0_23 = arith.constant 0 : index
    %c0_24 = arith.constant 0 : index
    %22 = vector.load %arg1[%c0_21, %c1_22, %c0_23, %c0_24] : memref<1x6x6x8xf32, #tpu.memory_space<vmem>>, vector<1x4x4x8xf32>
    %23 = vector.shape_cast %22 : vector<1x4x4x8xf32> to vector<4x4x8xf32>
    %24 = vector.shape_cast %23 : vector<4x4x8xf32> to vector<16x8xf32>
    %c3 = arith.constant 3 : index
    %c0_25 = arith.constant 0 : index
    %c0_26 = arith.constant 0 : index
    %25 = vector.load %arg2[%c3, %c0_25, %c0_26] : memref<9x8x8xf32, #tpu.memory_space<vmem>>, vector<1x8x8xf32>
    %26 = vector.shape_cast %25 : vector<1x8x8xf32> to vector<8x8xf32>
    %cst_27 = arith.constant dense<0.000000e+00> : vector<16x8xf32>
    %27 = tpu.matmul %24, %26, %cst_27 {dimension_numbers = #tpu.dot_dimension_numbers<[1], [0], [0], [1], [0, 0, 1, 1], [], []>} : vector<16x8xf32>, vector<8x8xf32>, vector<16x8xf32> -> vector<16x8xf32>
    %28 = arith.addf %21, %27 : vector<16x8xf32>
    %c0_28 = arith.constant 0 : index
    %c1_29 = arith.constant 1 : index
    %c1_30 = arith.constant 1 : index
    %c0_31 = arith.constant 0 : index
    %29 = vector.load %arg1[%c0_28, %c1_29, %c1_30, %c0_31] : memref<1x6x6x8xf32, #tpu.memory_space<vmem>>, vector<1x4x4x8xf32>
    %30 = vector.shape_cast %29 : vector<1x4x4x8xf32> to vector<4x4x8xf32>
    %31 = vector.shape_cast %30 : vector<4x4x8xf32> to vector<16x8xf32>
    %c4 = arith.constant 4 : index
    %c0_32 = arith.constant 0 : index
    %c0_33 = arith.constant 0 : index
    %32 = vector.load %arg2[%c4, %c0_32, %c0_33] : memref<9x8x8xf32, #tpu.memory_space<vmem>>, vector<1x8x8xf32>
    %33 = vector.shape_cast %32 : vector<1x8x8xf32> to vector<8x8xf32>
    %cst_34 = arith.constant dense<0.000000e+00> : vector<16x8xf32>
    %34 = tpu.matmul %31, %33, %cst_34 {dimension_numbers = #tpu.dot_dimension_numbers<[1], [0], [0], [1], [0, 0, 1, 1], [], []>} : vector<16x8xf32>, vector<8x8xf32>, vector<16x8xf32> -> vector<16x8xf32>
    %35 = arith.addf %28, %34 : vector<16x8xf32>
    %c0_35 = arith.constant 0 : index
    %c1_36 = arith.constant 1 : index
    %c2_37 = arith.constant 2 : index
    %c0_38 = arith.constant 0 : index
    %36 = vector.load %arg1[%c0_35, %c1_36, %c2_37, %c0_38] : memref<1x6x6x8xf32, #tpu.memory_space<vmem>>, vector<1x4x4x8xf32>
    %37 = vector.shape_cast %36 : vector<1x4x4x8xf32> to vector<4x4x8xf32>
    %38 = vector.shape_cast %37 : vector<4x4x8xf32> to vector<16x8xf32>
    %c5 = arith.constant 5 : index
    %c0_39 = arith.constant 0 : index
    %c0_40 = arith.constant 0 : index
    %39 = vector.load %arg2[%c5, %c0_39, %c0_40] : memref<9x8x8xf32, #tpu.memory_space<vmem>>, vector<1x8x8xf32>
    %40 = vector.shape_cast %39 : vector<1x8x8xf32> to vector<8x8xf32>
    %cst_41 = arith.constant dense<0.000000e+00> : vector<16x8xf32>
    %41 = tpu.matmul %38, %40, %cst_41 {dimension_numbers = #tpu.dot_dimension_numbers<[1], [0], [0], [1], [0, 0, 1, 1], [], []>} : vector<16x8xf32>, vector<8x8xf32>, vector<16x8xf32> -> vector<16x8xf32>
    %42 = arith.addf %35, %41 : vector<16x8xf32>
    %c0_42 = arith.constant 0 : index
    %c2_43 = arith.constant 2 : index
    %c0_44 = arith.constant 0 : index
    %c0_45 = arith.constant 0 : index
    %43 = vector.load %arg1[%c0_42, %c2_43, %c0_44, %c0_45] : memref<1x6x6x8xf32, #tpu.memory_space<vmem>>, vector<1x4x4x8xf32>
    %44 = vector.shape_cast %43 : vector<1x4x4x8xf32> to vector<4x4x8xf32>
    %45 = vector.shape_cast %44 : vector<4x4x8xf32> to vector<16x8xf32>
    %c6 = arith.constant 6 : index
    %c0_46 = arith.constant 0 : index
    %c0_47 = arith.constant 0 : index
    %46 = vector.load %arg2[%c6, %c0_46, %c0_47] : memref<9x8x8xf32, #tpu.memory_space<vmem>>, vector<1x8x8xf32>
    %47 = vector.shape_cast %46 : vector<1x8x8xf32> to vector<8x8xf32>
    %cst_48 = arith.constant dense<0.000000e+00> : vector<16x8xf32>
    %48 = tpu.matmul %45, %47, %cst_48 {dimension_numbers = #tpu.dot_dimension_numbers<[1], [0], [0], [1], [0, 0, 1, 1], [], []>} : vector<16x8xf32>, vector<8x8xf32>, vector<16x8xf32> -> vector<16x8xf32>
    %49 = arith.addf %42, %48 : vector<16x8xf32>
    %c0_49 = arith.constant 0 : index
    %c2_50 = arith.constant 2 : index
    %c1_51 = arith.constant 1 : index
    %c0_52 = arith.constant 0 : index
    %50 = vector.load %arg1[%c0_49, %c2_50, %c1_51, %c0_52] : memref<1x6x6x8xf32, #tpu.memory_space<vmem>>, vector<1x4x4x8xf32>
    %51 = vector.shape_cast %50 : vector<1x4x4x8xf32> to vector<4x4x8xf32>
    %52 = vector.shape_cast %51 : vector<4x4x8xf32> to vector<16x8xf32>
    %c7 = arith.constant 7 : index
    %c0_53 = arith.constant 0 : index
    %c0_54 = arith.constant 0 : index
    %53 = vector.load %arg2[%c7, %c0_53, %c0_54] : memref<9x8x8xf32, #tpu.memory_space<vmem>>, vector<1x8x8xf32>
    %54 = vector.shape_cast %53 : vector<1x8x8xf32> to vector<8x8xf32>
    %cst_55 = arith.constant dense<0.000000e+00> : vector<16x8xf32>
    %55 = tpu.matmul %52, %54, %cst_55 {dimension_numbers = #tpu.dot_dimension_numbers<[1], [0], [0], [1], [0, 0, 1, 1], [], []>} : vector<16x8xf32>, vector<8x8xf32>, vector<16x8xf32> -> vector<16x8xf32>
    %56 = arith.addf %49, %55 : vector<16x8xf32>
    %c0_56 = arith.constant 0 : index
    %c2_57 = arith.constant 2 : index
    %c2_58 = arith.constant 2 : index
    %c0_59 = arith.constant 0 : index
    %57 = vector.load %arg1[%c0_56, %c2_57, %c2_58, %c0_59] : memref<1x6x6x8xf32, #tpu.memory_space<vmem>>, vector<1x4x4x8xf32>
    %58 = vector.shape_cast %57 : vector<1x4x4x8xf32> to vector<4x4x8xf32>
    %59 = vector.shape_cast %58 : vector<4x4x8xf32> to vector<16x8xf32>
    %c8 = arith.constant 8 : index
    %c0_60 = arith.constant 0 : index
    %c0_61 = arith.constant 0 : index
    %60 = vector.load %arg2[%c8, %c0_60, %c0_61] : memref<9x8x8xf32, #tpu.memory_space<vmem>>, vector<1x8x8xf32>
    %61 = vector.shape_cast %60 : vector<1x8x8xf32> to vector<8x8xf32>
    %cst_62 = arith.constant dense<0.000000e+00> : vector<16x8xf32>
    %62 = tpu.matmul %59, %61, %cst_62 {dimension_numbers = #tpu.dot_dimension_numbers<[1], [0], [0], [1], [0, 0, 1, 1], [], []>} : vector<16x8xf32>, vector<8x8xf32>, vector<16x8xf32> -> vector<16x8xf32>
    %63 = arith.addf %56, %62 : vector<16x8xf32>
    %c0_63 = arith.constant 0 : index
    %c0_64 = arith.constant 0 : index
    %64 = vector.load %arg3[%c0_63, %c0_64] : memref<1x8xf32, #tpu.memory_space<vmem>>, vector<1x8xf32>
    %65 = vector.broadcast %64 : vector<1x8xf32> to vector<16x8xf32>
    %66 = arith.addf %63, %65 : vector<16x8xf32>
    %cst_65 = arith.constant 0.000000e+00 : f32
    %67 = vector.broadcast %cst_65 : f32 to vector<16x8xf32>
    %68 = arith.maximumf %66, %67 : vector<16x8xf32>
    %c0_66 = arith.constant 0 : index
    %c0_67 = arith.constant 0 : index
    %c0_68 = arith.constant 0 : index
    %69 = vector.load %arg4[%c0_66, %c0_67, %c0_68] : memref<1x16x8xf32, #tpu.memory_space<vmem>>, vector<1x16x8xf32>
    %70 = vector.shape_cast %69 : vector<1x16x8xf32> to vector<16x8xf32>
    %71 = vector.shape_cast %68 : vector<16x8xf32> to vector<1x16x8xf32>
    tpu.vector_store %arg4[%c0_66, %c0_67, %c0_68], %71 {strides = array<i32>} : memref<1x16x8xf32, #tpu.memory_space<vmem>>, vector<1x16x8xf32>,
    return
  }
  func.func @transform_0(%arg0: i32) -> (i32, i32, i32, i32) {
    %c0_i32 = arith.constant 0 : i32
    %c0_i32_0 = arith.constant 0 : i32
    %c0_i32_1 = arith.constant 0 : i32
    %c0_i32_2 = arith.constant 0 : i32
    return %arg0, %c0_i32, %c0_i32_0, %c0_i32_1 : i32, i32, i32, i32
  }
  func.func @transform_1(%arg0: i32) -> (i32, i32, i32) {
    %c0_i32 = arith.constant 0 : i32
    %c0_i32_0 = arith.constant 0 : i32
    %c0_i32_1 = arith.constant 0 : i32
    %c0_i32_2 = arith.constant 0 : i32
    return %c0_i32, %c0_i32_0, %c0_i32_1 : i32, i32, i32
  }
  func.func @transform_2(%arg0: i32) -> (i32, i32) {
    %c0_i32 = arith.constant 0 : i32
    %c0_i32_0 = arith.constant 0 : i32
    %c0_i32_1 = arith.constant 0 : i32
    return %c0_i32, %c0_i32_0 : i32, i32
  }
  func.func @transform_3(%arg0: i32) -> (i32, i32, i32) {
    %c0_i32 = arith.constant 0 : i32
    %c0_i32_0 = arith.constant 0 : i32
    %c0_i32_1 = arith.constant 0 : i32
    return %arg0, %c0_i32, %c0_i32_0 : i32, i32, i32
  }
}

module attributes {stable_mosaic.version = 11 : i64} {
  func.func @_conv3x3_kernel(%arg0: i32, %arg1: memref<1x20x5x8xf32, #tpu.memory_space<vmem>>, %arg2: memref<9x8x8xf32, #tpu.memory_space<vmem>>, %arg3: memref<1x8xf32, #tpu.memory_space<vmem>>, %arg4: memref<1x16x8xf32, #tpu.memory_space<vmem>>) attributes {dimension_semantics = [#tpu.dimension_semantics<parallel>], iteration_bounds = array<i64: 2>, scalar_prefetch = 0 : i64, scratch_operands = 0 : i64, tpu.core_type = #tpu.core_type<tc>, window_params = [{transform_indices = @transform_0, window_bounds = array<i64: 1, 20, 5, 8>}, {pipeline_mode = #tpu.pipeline_mode<synchronous>, transform_indices = @transform_1, window_bounds = array<i64: 9, 8, 8>}, {pipeline_mode = #tpu.pipeline_mode<synchronous>, transform_indices = @transform_2, window_bounds = array<i64: 1, 8>}, {transform_indices = @transform_3, window_bounds = array<i64: 1, 16, 8>}]} {
    %cst = arith.constant 0.000000e+00 : f32
    %0 = vector.broadcast %cst : f32 to vector<16x8xf32>
    %c0 = arith.constant 0 : index
    %c0_0 = arith.constant 0 : index
    %c0_1 = arith.constant 0 : index
    %c0_2 = arith.constant 0 : index
    %1 = vector.load %arg1[%c0, %c0_0, %c0_1, %c0_2] : memref<1x20x5x8xf32, #tpu.memory_space<vmem>>, vector<1x4x4x8xf32>
    %2 = vector.shape_cast %1 : vector<1x4x4x8xf32> to vector<4x4x8xf32>
    %3 = vector.shape_cast %2 : vector<4x4x8xf32> to vector<16x8xf32>
    %c0_3 = arith.constant 0 : index
    %c0_4 = arith.constant 0 : index
    %c0_5 = arith.constant 0 : index
    %4 = vector.load %arg2[%c0_3, %c0_4, %c0_5] : memref<9x8x8xf32, #tpu.memory_space<vmem>>, vector<1x8x8xf32>
    %5 = vector.shape_cast %4 : vector<1x8x8xf32> to vector<8x8xf32>
    %cst_6 = arith.constant dense<0.000000e+00> : vector<16x8xf32>
    %6 = tpu.matmul %3, %5, %cst_6 {dimension_numbers = #tpu.dot_dimension_numbers<[1], [0], [0], [1], [0, 0, 1, 1], [], []>} : vector<16x8xf32>, vector<8x8xf32>, vector<16x8xf32> -> vector<16x8xf32>
    %7 = arith.addf %0, %6 : vector<16x8xf32>
    %c0_7 = arith.constant 0 : index
    %c5 = arith.constant 5 : index
    %c0_8 = arith.constant 0 : index
    %c0_9 = arith.constant 0 : index
    %8 = vector.load %arg1[%c0_7, %c5, %c0_8, %c0_9] : memref<1x20x5x8xf32, #tpu.memory_space<vmem>>, vector<1x4x4x8xf32>
    %9 = vector.shape_cast %8 : vector<1x4x4x8xf32> to vector<4x4x8xf32>
    %10 = vector.shape_cast %9 : vector<4x4x8xf32> to vector<16x8xf32>
    %c1 = arith.constant 1 : index
    %c0_10 = arith.constant 0 : index
    %c0_11 = arith.constant 0 : index
    %11 = vector.load %arg2[%c1, %c0_10, %c0_11] : memref<9x8x8xf32, #tpu.memory_space<vmem>>, vector<1x8x8xf32>
    %12 = vector.shape_cast %11 : vector<1x8x8xf32> to vector<8x8xf32>
    %cst_12 = arith.constant dense<0.000000e+00> : vector<16x8xf32>
    %13 = tpu.matmul %10, %12, %cst_12 {dimension_numbers = #tpu.dot_dimension_numbers<[1], [0], [0], [1], [0, 0, 1, 1], [], []>} : vector<16x8xf32>, vector<8x8xf32>, vector<16x8xf32> -> vector<16x8xf32>
    %14 = arith.addf %7, %13 : vector<16x8xf32>
    %c0_13 = arith.constant 0 : index
    %c0_14 = arith.constant 0 : index
    %c1_15 = arith.constant 1 : index
    %c0_16 = arith.constant 0 : index
    %15 = vector.load %arg1[%c0_13, %c0_14, %c1_15, %c0_16] : memref<1x20x5x8xf32, #tpu.memory_space<vmem>>, vector<1x4x4x8xf32>
    %16 = vector.shape_cast %15 : vector<1x4x4x8xf32> to vector<4x4x8xf32>
    %17 = vector.shape_cast %16 : vector<4x4x8xf32> to vector<16x8xf32>
    %c2 = arith.constant 2 : index
    %c0_17 = arith.constant 0 : index
    %c0_18 = arith.constant 0 : index
    %18 = vector.load %arg2[%c2, %c0_17, %c0_18] : memref<9x8x8xf32, #tpu.memory_space<vmem>>, vector<1x8x8xf32>
    %19 = vector.shape_cast %18 : vector<1x8x8xf32> to vector<8x8xf32>
    %cst_19 = arith.constant dense<0.000000e+00> : vector<16x8xf32>
    %20 = tpu.matmul %17, %19, %cst_19 {dimension_numbers = #tpu.dot_dimension_numbers<[1], [0], [0], [1], [0, 0, 1, 1], [], []>} : vector<16x8xf32>, vector<8x8xf32>, vector<16x8xf32> -> vector<16x8xf32>
    %21 = arith.addf %14, %20 : vector<16x8xf32>
    %c0_20 = arith.constant 0 : index
    %c10 = arith.constant 10 : index
    %c0_21 = arith.constant 0 : index
    %c0_22 = arith.constant 0 : index
    %22 = vector.load %arg1[%c0_20, %c10, %c0_21, %c0_22] : memref<1x20x5x8xf32, #tpu.memory_space<vmem>>, vector<1x4x4x8xf32>
    %23 = vector.shape_cast %22 : vector<1x4x4x8xf32> to vector<4x4x8xf32>
    %24 = vector.shape_cast %23 : vector<4x4x8xf32> to vector<16x8xf32>
    %c3 = arith.constant 3 : index
    %c0_23 = arith.constant 0 : index
    %c0_24 = arith.constant 0 : index
    %25 = vector.load %arg2[%c3, %c0_23, %c0_24] : memref<9x8x8xf32, #tpu.memory_space<vmem>>, vector<1x8x8xf32>
    %26 = vector.shape_cast %25 : vector<1x8x8xf32> to vector<8x8xf32>
    %cst_25 = arith.constant dense<0.000000e+00> : vector<16x8xf32>
    %27 = tpu.matmul %24, %26, %cst_25 {dimension_numbers = #tpu.dot_dimension_numbers<[1], [0], [0], [1], [0, 0, 1, 1], [], []>} : vector<16x8xf32>, vector<8x8xf32>, vector<16x8xf32> -> vector<16x8xf32>
    %28 = arith.addf %21, %27 : vector<16x8xf32>
    %c0_26 = arith.constant 0 : index
    %c15 = arith.constant 15 : index
    %c0_27 = arith.constant 0 : index
    %c0_28 = arith.constant 0 : index
    %29 = vector.load %arg1[%c0_26, %c15, %c0_27, %c0_28] : memref<1x20x5x8xf32, #tpu.memory_space<vmem>>, vector<1x4x4x8xf32>
    %30 = vector.shape_cast %29 : vector<1x4x4x8xf32> to vector<4x4x8xf32>
    %31 = vector.shape_cast %30 : vector<4x4x8xf32> to vector<16x8xf32>
    %c4 = arith.constant 4 : index
    %c0_29 = arith.constant 0 : index
    %c0_30 = arith.constant 0 : index
    %32 = vector.load %arg2[%c4, %c0_29, %c0_30] : memref<9x8x8xf32, #tpu.memory_space<vmem>>, vector<1x8x8xf32>
    %33 = vector.shape_cast %32 : vector<1x8x8xf32> to vector<8x8xf32>
    %cst_31 = arith.constant dense<0.000000e+00> : vector<16x8xf32>
    %34 = tpu.matmul %31, %33, %cst_31 {dimension_numbers = #tpu.dot_dimension_numbers<[1], [0], [0], [1], [0, 0, 1, 1], [], []>} : vector<16x8xf32>, vector<8x8xf32>, vector<16x8xf32> -> vector<16x8xf32>
    %35 = arith.addf %28, %34 : vector<16x8xf32>
    %c0_32 = arith.constant 0 : index
    %c10_33 = arith.constant 10 : index
    %c1_34 = arith.constant 1 : index
    %c0_35 = arith.constant 0 : index
    %36 = vector.load %arg1[%c0_32, %c10_33, %c1_34, %c0_35] : memref<1x20x5x8xf32, #tpu.memory_space<vmem>>, vector<1x4x4x8xf32>
    %37 = vector.shape_cast %36 : vector<1x4x4x8xf32> to vector<4x4x8xf32>
    %38 = vector.shape_cast %37 : vector<4x4x8xf32> to vector<16x8xf32>
    %c5_36 = arith.constant 5 : index
    %c0_37 = arith.constant 0 : index
    %c0_38 = arith.constant 0 : index
    %39 = vector.load %arg2[%c5_36, %c0_37, %c0_38] : memref<9x8x8xf32, #tpu.memory_space<vmem>>, vector<1x8x8xf32>
    %40 = vector.shape_cast %39 : vector<1x8x8xf32> to vector<8x8xf32>
    %cst_39 = arith.constant dense<0.000000e+00> : vector<16x8xf32>
    %41 = tpu.matmul %38, %40, %cst_39 {dimension_numbers = #tpu.dot_dimension_numbers<[1], [0], [0], [1], [0, 0, 1, 1], [], []>} : vector<16x8xf32>, vector<8x8xf32>, vector<16x8xf32> -> vector<16x8xf32>
    %42 = arith.addf %35, %41 : vector<16x8xf32>
    %c0_40 = arith.constant 0 : index
    %c1_41 = arith.constant 1 : index
    %c0_42 = arith.constant 0 : index
    %c0_43 = arith.constant 0 : index
    %43 = vector.load %arg1[%c0_40, %c1_41, %c0_42, %c0_43] : memref<1x20x5x8xf32, #tpu.memory_space<vmem>>, vector<1x4x4x8xf32>
    %44 = vector.shape_cast %43 : vector<1x4x4x8xf32> to vector<4x4x8xf32>
    %45 = vector.shape_cast %44 : vector<4x4x8xf32> to vector<16x8xf32>
    %c6 = arith.constant 6 : index
    %c0_44 = arith.constant 0 : index
    %c0_45 = arith.constant 0 : index
    %46 = vector.load %arg2[%c6, %c0_44, %c0_45] : memref<9x8x8xf32, #tpu.memory_space<vmem>>, vector<1x8x8xf32>
    %47 = vector.shape_cast %46 : vector<1x8x8xf32> to vector<8x8xf32>
    %cst_46 = arith.constant dense<0.000000e+00> : vector<16x8xf32>
    %48 = tpu.matmul %45, %47, %cst_46 {dimension_numbers = #tpu.dot_dimension_numbers<[1], [0], [0], [1], [0, 0, 1, 1], [], []>} : vector<16x8xf32>, vector<8x8xf32>, vector<16x8xf32> -> vector<16x8xf32>
    %49 = arith.addf %42, %48 : vector<16x8xf32>
    %c0_47 = arith.constant 0 : index
    %c6_48 = arith.constant 6 : index
    %c0_49 = arith.constant 0 : index
    %c0_50 = arith.constant 0 : index
    %50 = vector.load %arg1[%c0_47, %c6_48, %c0_49, %c0_50] : memref<1x20x5x8xf32, #tpu.memory_space<vmem>>, vector<1x4x4x8xf32>
    %51 = vector.shape_cast %50 : vector<1x4x4x8xf32> to vector<4x4x8xf32>
    %52 = vector.shape_cast %51 : vector<4x4x8xf32> to vector<16x8xf32>
    %c7 = arith.constant 7 : index
    %c0_51 = arith.constant 0 : index
    %c0_52 = arith.constant 0 : index
    %53 = vector.load %arg2[%c7, %c0_51, %c0_52] : memref<9x8x8xf32, #tpu.memory_space<vmem>>, vector<1x8x8xf32>
    %54 = vector.shape_cast %53 : vector<1x8x8xf32> to vector<8x8xf32>
    %cst_53 = arith.constant dense<0.000000e+00> : vector<16x8xf32>
    %55 = tpu.matmul %52, %54, %cst_53 {dimension_numbers = #tpu.dot_dimension_numbers<[1], [0], [0], [1], [0, 0, 1, 1], [], []>} : vector<16x8xf32>, vector<8x8xf32>, vector<16x8xf32> -> vector<16x8xf32>
    %56 = arith.addf %49, %55 : vector<16x8xf32>
    %c0_54 = arith.constant 0 : index
    %c1_55 = arith.constant 1 : index
    %c1_56 = arith.constant 1 : index
    %c0_57 = arith.constant 0 : index
    %57 = vector.load %arg1[%c0_54, %c1_55, %c1_56, %c0_57] : memref<1x20x5x8xf32, #tpu.memory_space<vmem>>, vector<1x4x4x8xf32>
    %58 = vector.shape_cast %57 : vector<1x4x4x8xf32> to vector<4x4x8xf32>
    %59 = vector.shape_cast %58 : vector<4x4x8xf32> to vector<16x8xf32>
    %c8 = arith.constant 8 : index
    %c0_58 = arith.constant 0 : index
    %c0_59 = arith.constant 0 : index
    %60 = vector.load %arg2[%c8, %c0_58, %c0_59] : memref<9x8x8xf32, #tpu.memory_space<vmem>>, vector<1x8x8xf32>
    %61 = vector.shape_cast %60 : vector<1x8x8xf32> to vector<8x8xf32>
    %cst_60 = arith.constant dense<0.000000e+00> : vector<16x8xf32>
    %62 = tpu.matmul %59, %61, %cst_60 {dimension_numbers = #tpu.dot_dimension_numbers<[1], [0], [0], [1], [0, 0, 1, 1], [], []>} : vector<16x8xf32>, vector<8x8xf32>, vector<16x8xf32> -> vector<16x8xf32>
    %63 = arith.addf %56, %62 : vector<16x8xf32>
    %c0_61 = arith.constant 0 : index
    %c0_62 = arith.constant 0 : index
    %64 = vector.load %arg3[%c0_61, %c0_62] : memref<1x8xf32, #tpu.memory_space<vmem>>, vector<1x8xf32>
    %65 = vector.broadcast %64 : vector<1x8xf32> to vector<16x8xf32>
    %66 = arith.addf %63, %65 : vector<16x8xf32>
    %cst_63 = arith.constant 0.000000e+00 : f32
    %67 = vector.broadcast %cst_63 : f32 to vector<16x8xf32>
    %68 = arith.maximumf %66, %67 : vector<16x8xf32>
    %c0_64 = arith.constant 0 : index
    %c0_65 = arith.constant 0 : index
    %c0_66 = arith.constant 0 : index
    %69 = vector.load %arg4[%c0_64, %c0_65, %c0_66] : memref<1x16x8xf32, #tpu.memory_space<vmem>>, vector<1x16x8xf32>
    %70 = vector.shape_cast %69 : vector<1x16x8xf32> to vector<16x8xf32>
    %71 = vector.shape_cast %68 : vector<16x8xf32> to vector<1x16x8xf32>
    tpu.vector_store %arg4[%c0_64, %c0_65, %c0_66], %71 {strides = array<i32>} : memref<1x16x8xf32, #tpu.memory_space<vmem>>, vector<1x16x8xf32>,
    return
  }
  func.func @transform_0(%arg0: i32) -> (i32, i32, i32, i32) {
    %c0_i32 = arith.constant 0 : i32
    %c0_i32_0 = arith.constant 0 : i32
    %c0_i32_1 = arith.constant 0 : i32
    %c0_i32_2 = arith.constant 0 : i32
    return %arg0, %c0_i32, %c0_i32_0, %c0_i32_1 : i32, i32, i32, i32
  }
  func.func @transform_1(%arg0: i32) -> (i32, i32, i32) {
    %c0_i32 = arith.constant 0 : i32
    %c0_i32_0 = arith.constant 0 : i32
    %c0_i32_1 = arith.constant 0 : i32
    %c0_i32_2 = arith.constant 0 : i32
    return %c0_i32, %c0_i32_0, %c0_i32_1 : i32, i32, i32
  }
  func.func @transform_2(%arg0: i32) -> (i32, i32) {
    %c0_i32 = arith.constant 0 : i32
    %c0_i32_0 = arith.constant 0 : i32
    %c0_i32_1 = arith.constant 0 : i32
    return %c0_i32, %c0_i32_0 : i32, i32
  }
  func.func @transform_3(%arg0: i32) -> (i32, i32, i32) {
    %c0_i32 = arith.constant 0 : i32
    %c0_i32_0 = arith.constant 0 : i32
    %c0_i32_1 = arith.constant 0 : i32
    return %arg0, %c0_i32, %c0_i32_0 : i32, i32, i32
  }
}

module attributes {stable_mosaic.version = 11 : i64} {
  func.func @_proj_pos_kernel(%arg0: i32, %arg1: memref<1x4x32xf32, #tpu.memory_space<vmem>>, %arg2: memref<32x32xf32, #tpu.memory_space<vmem>>, %arg3: memref<1x32xf32, #tpu.memory_space<vmem>>, %arg4: memref<4x32xf32, #tpu.memory_space<vmem>>, %arg5: memref<1x4x32xf32, #tpu.memory_space<vmem>>) attributes {dimension_semantics = [#tpu.dimension_semantics<parallel>], iteration_bounds = array<i64: 2>, scalar_prefetch = 0 : i64, scratch_operands = 0 : i64, tpu.core_type = #tpu.core_type<tc>, window_params = [{transform_indices = @transform_0, window_bounds = array<i64: 1, 4, 32>}, {pipeline_mode = #tpu.pipeline_mode<synchronous>, transform_indices = @transform_1, window_bounds = array<i64: 32, 32>}, {pipeline_mode = #tpu.pipeline_mode<synchronous>, transform_indices = @transform_2, window_bounds = array<i64: 1, 32>}, {pipeline_mode = #tpu.pipeline_mode<synchronous>, transform_indices = @transform_3, window_bounds = array<i64: 4, 32>}, {transform_indices = @transform_4, window_bounds = array<i64: 1, 4, 32>}]} {
    %c0 = arith.constant 0 : index
    %c0_0 = arith.constant 0 : index
    %c0_1 = arith.constant 0 : index
    %0 = vector.load %arg1[%c0, %c0_0, %c0_1] : memref<1x4x32xf32, #tpu.memory_space<vmem>>, vector<1x4x32xf32>
    %1 = vector.shape_cast %0 : vector<1x4x32xf32> to vector<4x32xf32>
    %c0_2 = arith.constant 0 : index
    %c0_3 = arith.constant 0 : index
    %2 = vector.load %arg2[%c0_2, %c0_3] : memref<32x32xf32, #tpu.memory_space<vmem>>, vector<32x32xf32>
    %cst = arith.constant dense<0.000000e+00> : vector<4x32xf32>
    %3 = tpu.matmul %1, %2, %cst {dimension_numbers = #tpu.dot_dimension_numbers<[1], [0], [0], [1], [0, 0, 1, 1], [], []>} : vector<4x32xf32>, vector<32x32xf32>, vector<4x32xf32> -> vector<4x32xf32>
    %c0_4 = arith.constant 0 : index
    %c0_5 = arith.constant 0 : index
    %4 = vector.load %arg3[%c0_4, %c0_5] : memref<1x32xf32, #tpu.memory_space<vmem>>, vector<1x32xf32>
    %5 = vector.broadcast %4 : vector<1x32xf32> to vector<4x32xf32>
    %6 = arith.addf %3, %5 : vector<4x32xf32>
    %cst_6 = arith.constant 5.65685415 : f32
    %7 = vector.broadcast %cst_6 : f32 to vector<4x32xf32>
    %8 = arith.mulf %6, %7 : vector<4x32xf32>
    %c0_7 = arith.constant 0 : index
    %c0_8 = arith.constant 0 : index
    %9 = vector.load %arg4[%c0_7, %c0_8] : memref<4x32xf32, #tpu.memory_space<vmem>>, vector<4x32xf32>
    %10 = arith.addf %8, %9 : vector<4x32xf32>
    %c0_9 = arith.constant 0 : index
    %c0_10 = arith.constant 0 : index
    %c0_11 = arith.constant 0 : index
    %11 = vector.load %arg5[%c0_9, %c0_10, %c0_11] : memref<1x4x32xf32, #tpu.memory_space<vmem>>, vector<1x4x32xf32>
    %12 = vector.shape_cast %11 : vector<1x4x32xf32> to vector<4x32xf32>
    %13 = vector.shape_cast %10 : vector<4x32xf32> to vector<1x4x32xf32>
    tpu.vector_store %arg5[%c0_9, %c0_10, %c0_11], %13 {strides = array<i32>} : memref<1x4x32xf32, #tpu.memory_space<vmem>>, vector<1x4x32xf32>,
    return
  }
  func.func @transform_0(%arg0: i32) -> (i32, i32, i32) {
    %c0_i32 = arith.constant 0 : i32
    %c0_i32_0 = arith.constant 0 : i32
    %c0_i32_1 = arith.constant 0 : i32
    return %arg0, %c0_i32, %c0_i32_0 : i32, i32, i32
  }
  func.func @transform_1(%arg0: i32) -> (i32, i32) {
    %c0_i32 = arith.constant 0 : i32
    %c0_i32_0 = arith.constant 0 : i32
    %c0_i32_1 = arith.constant 0 : i32
    return %c0_i32, %c0_i32_0 : i32, i32
  }
  func.func @transform_2(%arg0: i32) -> (i32, i32) {
    %c0_i32 = arith.constant 0 : i32
    %c0_i32_0 = arith.constant 0 : i32
    %c0_i32_1 = arith.constant 0 : i32
    return %c0_i32, %c0_i32_0 : i32, i32
  }
  func.func @transform_3(%arg0: i32) -> (i32, i32) {
    %c0_i32 = arith.constant 0 : i32
    %c0_i32_0 = arith.constant 0 : i32
    %c0_i32_1 = arith.constant 0 : i32
    return %c0_i32, %c0_i32_0 : i32, i32
  }
  func.func @transform_4(%arg0: i32) -> (i32, i32, i32) {
    %c0_i32 = arith.constant 0 : i32
    %c0_i32_0 = arith.constant 0 : i32
    %c0_i32_1 = arith.constant 0 : i32
    return %arg0, %c0_i32, %c0_i32_0 : i32, i32, i32
  }
}

module attributes {stable_mosaic.version = 11 : i64} {
  func.func @_ffn_block_kernel(%arg0: i32, %arg1: memref<1x4x32xf32, #tpu.memory_space<vmem>>, %arg2: memref<32x64xf32, #tpu.memory_space<vmem>>, %arg3: memref<1x64xf32, #tpu.memory_space<vmem>>, %arg4: memref<64x32xf32, #tpu.memory_space<vmem>>, %arg5: memref<1x32xf32, #tpu.memory_space<vmem>>, %arg6: memref<1x32xf32, #tpu.memory_space<vmem>>, %arg7: memref<1x32xf32, #tpu.memory_space<vmem>>, %arg8: memref<1x4x32xf32, #tpu.memory_space<vmem>>) attributes {dimension_semantics = [#tpu.dimension_semantics<parallel>], iteration_bounds = array<i64: 2>, scalar_prefetch = 0 : i64, scratch_operands = 0 : i64, tpu.core_type = #tpu.core_type<tc>, window_params = [{transform_indices = @transform_0, window_bounds = array<i64: 1, 4, 32>}, {pipeline_mode = #tpu.pipeline_mode<synchronous>, transform_indices = @transform_1, window_bounds = array<i64: 32, 64>}, {pipeline_mode = #tpu.pipeline_mode<synchronous>, transform_indices = @transform_2, window_bounds = array<i64: 1, 64>}, {pipeline_mode = #tpu.pipeline_mode<synchronous>, transform_indices = @transform_3, window_bounds = array<i64: 64, 32>}, {pipeline_mode = #tpu.pipeline_mode<synchronous>, transform_indices = @transform_4, window_bounds = array<i64: 1, 32>}, {pipeline_mode = #tpu.pipeline_mode<synchronous>, transform_indices = @transform_5, window_bounds = array<i64: 1, 32>}, {pipeline_mode = #tpu.pipeline_mode<synchronous>, transform_indices = @transform_6, window_bounds = array<i64: 1, 32>}, {transform_indices = @transform_7, window_bounds = array<i64: 1, 4, 32>}]} {
    %c0 = arith.constant 0 : index
    %c0_0 = arith.constant 0 : index
    %c0_1 = arith.constant 0 : index
    %0 = vector.load %arg1[%c0, %c0_0, %c0_1] : memref<1x4x32xf32, #tpu.memory_space<vmem>>, vector<1x4x32xf32>
    %1 = vector.shape_cast %0 : vector<1x4x32xf32> to vector<4x32xf32>
    %c0_2 = arith.constant 0 : index
    %c0_3 = arith.constant 0 : index
    %2 = vector.load %arg2[%c0_2, %c0_3] : memref<32x64xf32, #tpu.memory_space<vmem>>, vector<32x64xf32>
    %cst = arith.constant dense<0.000000e+00> : vector<4x64xf32>
    %3 = tpu.matmul %1, %2, %cst {dimension_numbers = #tpu.dot_dimension_numbers<[1], [0], [0], [1], [0, 0, 1, 1], [], []>} : vector<4x32xf32>, vector<32x64xf32>, vector<4x64xf32> -> vector<4x64xf32>
    %c0_4 = arith.constant 0 : index
    %c0_5 = arith.constant 0 : index
    %4 = vector.load %arg3[%c0_4, %c0_5] : memref<1x64xf32, #tpu.memory_space<vmem>>, vector<1x64xf32>
    %5 = vector.broadcast %4 : vector<1x64xf32> to vector<4x64xf32>
    %6 = arith.addf %3, %5 : vector<4x64xf32>
    %cst_6 = arith.constant 0.000000e+00 : f32
    %7 = vector.broadcast %cst_6 : f32 to vector<4x64xf32>
    %8 = arith.maximumf %6, %7 : vector<4x64xf32>
    %c0_7 = arith.constant 0 : index
    %c0_8 = arith.constant 0 : index
    %9 = vector.load %arg4[%c0_7, %c0_8] : memref<64x32xf32, #tpu.memory_space<vmem>>, vector<64x32xf32>
    %cst_9 = arith.constant dense<0.000000e+00> : vector<4x32xf32>
    %10 = tpu.matmul %8, %9, %cst_9 {dimension_numbers = #tpu.dot_dimension_numbers<[1], [0], [0], [1], [0, 0, 1, 1], [], []>} : vector<4x64xf32>, vector<64x32xf32>, vector<4x32xf32> -> vector<4x32xf32>
    %c0_10 = arith.constant 0 : index
    %c0_11 = arith.constant 0 : index
    %11 = vector.load %arg5[%c0_10, %c0_11] : memref<1x32xf32, #tpu.memory_space<vmem>>, vector<1x32xf32>
    %12 = vector.broadcast %11 : vector<1x32xf32> to vector<4x32xf32>
    %13 = arith.addf %10, %12 : vector<4x32xf32>
    %14 = arith.addf %1, %13 : vector<4x32xf32>
    %cst_12 = arith.constant dense<0.000000e+00> : vector<4xf32>
    %15 = vector.multi_reduction <add>, %14, %cst_12 [1] : vector<4x32xf32> to vector<4xf32>
    %16 = vector.shape_cast %15 : vector<4xf32> to vector<4x1xf32>
    %cst_13 = arith.constant 3.200000e+01 : f32
    %17 = vector.broadcast %cst_13 : f32 to vector<4x1xf32>
    %18 = arith.divf %16, %17 : vector<4x1xf32>
    %19 = vector.broadcast %18 : vector<4x1xf32> to vector<4x32xf32>
    %20 = arith.subf %14, %19 : vector<4x32xf32>
    %21 = arith.mulf %20, %20 : vector<4x32xf32>
    %cst_14 = arith.constant dense<0.000000e+00> : vector<4xf32>
    %22 = vector.multi_reduction <add>, %21, %cst_14 [1] : vector<4x32xf32> to vector<4xf32>
    %23 = vector.shape_cast %22 : vector<4xf32> to vector<4x1xf32>
    %cst_15 = arith.constant 3.200000e+01 : f32
    %24 = vector.broadcast %cst_15 : f32 to vector<4x1xf32>
    %25 = arith.divf %23, %24 : vector<4x1xf32>
    %26 = vector.broadcast %18 : vector<4x1xf32> to vector<4x32xf32>
    %27 = arith.subf %14, %26 : vector<4x32xf32>
    %cst_16 = arith.constant 9.99999974E-6 : f32
    %28 = vector.broadcast %cst_16 : f32 to vector<4x1xf32>
    %29 = arith.addf %25, %28 : vector<4x1xf32>
    %30 = math.rsqrt %29 : vector<4x1xf32>
    %31 = vector.broadcast %30 : vector<4x1xf32> to vector<4x32xf32>
    %32 = arith.mulf %27, %31 : vector<4x32xf32>
    %c0_17 = arith.constant 0 : index
    %c0_18 = arith.constant 0 : index
    %33 = vector.load %arg6[%c0_17, %c0_18] : memref<1x32xf32, #tpu.memory_space<vmem>>, vector<1x32xf32>
    %34 = vector.broadcast %33 : vector<1x32xf32> to vector<4x32xf32>
    %35 = arith.mulf %32, %34 : vector<4x32xf32>
    %c0_19 = arith.constant 0 : index
    %c0_20 = arith.constant 0 : index
    %36 = vector.load %arg7[%c0_19, %c0_20] : memref<1x32xf32, #tpu.memory_space<vmem>>, vector<1x32xf32>
    %37 = vector.broadcast %36 : vector<1x32xf32> to vector<4x32xf32>
    %38 = arith.addf %35, %37 : vector<4x32xf32>
    %c0_21 = arith.constant 0 : index
    %c0_22 = arith.constant 0 : index
    %c0_23 = arith.constant 0 : index
    %39 = vector.load %arg8[%c0_21, %c0_22, %c0_23] : memref<1x4x32xf32, #tpu.memory_space<vmem>>, vector<1x4x32xf32>
    %40 = vector.shape_cast %39 : vector<1x4x32xf32> to vector<4x32xf32>
    %41 = vector.shape_cast %38 : vector<4x32xf32> to vector<1x4x32xf32>
    tpu.vector_store %arg8[%c0_21, %c0_22, %c0_23], %41 {strides = array<i32>} : memref<1x4x32xf32, #tpu.memory_space<vmem>>, vector<1x4x32xf32>,
    return
  }
  func.func @transform_0(%arg0: i32) -> (i32, i32, i32) {
    %c0_i32 = arith.constant 0 : i32
    %c0_i32_0 = arith.constant 0 : i32
    %c0_i32_1 = arith.constant 0 : i32
    return %arg0, %c0_i32, %c0_i32_0 : i32, i32, i32
  }
  func.func @transform_1(%arg0: i32) -> (i32, i32) {
    %c0_i32 = arith.constant 0 : i32
    %c0_i32_0 = arith.constant 0 : i32
    %c0_i32_1 = arith.constant 0 : i32
    return %c0_i32, %c0_i32_0 : i32, i32
  }
  func.func @transform_2(%arg0: i32) -> (i32, i32) {
    %c0_i32 = arith.constant 0 : i32
    %c0_i32_0 = arith.constant 0 : i32
    %c0_i32_1 = arith.constant 0 : i32
    return %c0_i32, %c0_i32_0 : i32, i32
  }
  func.func @transform_3(%arg0: i32) -> (i32, i32) {
    %c0_i32 = arith.constant 0 : i32
    %c0_i32_0 = arith.constant 0 : i32
    %c0_i32_1 = arith.constant 0 : i32
    return %c0_i32, %c0_i32_0 : i32, i32
  }
  func.func @transform_4(%arg0: i32) -> (i32, i32) {
    %c0_i32 = arith.constant 0 : i32
    %c0_i32_0 = arith.constant 0 : i32
    %c0_i32_1 = arith.constant 0 : i32
    return %c0_i32, %c0_i32_0 : i32, i32
  }
  func.func @transform_5(%arg0: i32) -> (i32, i32) {
    %c0_i32 = arith.constant 0 : i32
    %c0_i32_0 = arith.constant 0 : i32
    %c0_i32_1 = arith.constant 0 : i32
    return %c0_i32, %c0_i32_0 : i32, i32
  }
  func.func @transform_6(%arg0: i32) -> (i32, i32) {
    %c0_i32 = arith.constant 0 : i32
    %c0_i32_0 = arith.constant 0 : i32
    %c0_i32_1 = arith.constant 0 : i32
    return %c0_i32, %c0_i32_0 : i32, i32
  }
  func.func @transform_7(%arg0: i32) -> (i32, i32, i32) {
    %c0_i32 = arith.constant 0 : i32
    %c0_i32_0 = arith.constant 0 : i32
    %c0_i32_1 = arith.constant 0 : i32
    return %arg0, %c0_i32, %c0_i32_0 : i32, i32, i32
  }
}

module attributes {stable_mosaic.version = 11 : i64} {
  func.func @_attn_block_kernel(%arg0: i32, %arg1: memref<1x4x32xf32, #tpu.memory_space<vmem>>, %arg2: memref<1x4x32xf32, #tpu.memory_space<vmem>>, %arg3: memref<32x96xf32, #tpu.memory_space<vmem>>, %arg4: memref<1x96xf32, #tpu.memory_space<vmem>>, %arg5: memref<32x32xf32, #tpu.memory_space<vmem>>, %arg6: memref<1x32xf32, #tpu.memory_space<vmem>>, %arg7: memref<1x4x4xf32, #tpu.memory_space<vmem>>, %arg8: memref<1x32xf32, #tpu.memory_space<vmem>>, %arg9: memref<1x32xf32, #tpu.memory_space<vmem>>, %arg10: memref<1x4x32xf32, #tpu.memory_space<vmem>>) attributes {dimension_semantics = [#tpu.dimension_semantics<parallel>], iteration_bounds = array<i64: 2>, scalar_prefetch = 0 : i64, scratch_operands = 0 : i64, tpu.core_type = #tpu.core_type<tc>, window_params = [{transform_indices = @transform_0, window_bounds = array<i64: 1, 4, 32>}, {transform_indices = @transform_1, window_bounds = array<i64: 1, 4, 32>}, {pipeline_mode = #tpu.pipeline_mode<synchronous>, transform_indices = @transform_2, window_bounds = array<i64: 32, 96>}, {pipeline_mode = #tpu.pipeline_mode<synchronous>, transform_indices = @transform_3, window_bounds = array<i64: 1, 96>}, {pipeline_mode = #tpu.pipeline_mode<synchronous>, transform_indices = @transform_4, window_bounds = array<i64: 32, 32>}, {pipeline_mode = #tpu.pipeline_mode<synchronous>, transform_indices = @transform_5, window_bounds = array<i64: 1, 32>}, {transform_indices = @transform_6, window_bounds = array<i64: 1, 4, 4>}, {pipeline_mode = #tpu.pipeline_mode<synchronous>, transform_indices = @transform_7, window_bounds = array<i64: 1, 32>}, {pipeline_mode = #tpu.pipeline_mode<synchronous>, transform_indices = @transform_8, window_bounds = array<i64: 1, 32>}, {transform_indices = @transform_9, window_bounds = array<i64: 1, 4, 32>}]} {
    %c0 = arith.constant 0 : index
    %c0_0 = arith.constant 0 : index
    %c0_1 = arith.constant 0 : index
    %0 = vector.load %arg1[%c0, %c0_0, %c0_1] : memref<1x4x32xf32, #tpu.memory_space<vmem>>, vector<1x4x32xf32>
    %1 = vector.shape_cast %0 : vector<1x4x32xf32> to vector<4x32xf32>
    %c0_2 = arith.constant 0 : index
    %c0_3 = arith.constant 0 : index
    %2 = vector.load %arg3[%c0_2, %c0_3] : memref<32x96xf32, #tpu.memory_space<vmem>>, vector<32x96xf32>
    %c0_4 = arith.constant 0 : index
    %c0_5 = arith.constant 0 : index
    %3 = vector.load %arg4[%c0_4, %c0_5] : memref<1x96xf32, #tpu.memory_space<vmem>>, vector<1x96xf32>
    %cst = arith.constant dense<0.000000e+00> : vector<4x96xf32>
    %4 = tpu.matmul %1, %2, %cst {dimension_numbers = #tpu.dot_dimension_numbers<[1], [0], [0], [1], [0, 0, 1, 1], [], []>} : vector<4x32xf32>, vector<32x96xf32>, vector<4x96xf32> -> vector<4x96xf32>
    %5 = vector.broadcast %3 : vector<1x96xf32> to vector<4x96xf32>
    %6 = arith.addf %4, %5 : vector<4x96xf32>
    %7 = vector.extract_strided_slice %6 {offsets = [0, 0], sizes = [4, 32], strides = [1, 1]} : vector<4x96xf32> to vector<4x32xf32>
    %8 = vector.extract_strided_slice %6 {offsets = [0, 32], sizes = [4, 32], strides = [1, 1]} : vector<4x96xf32> to vector<4x32xf32>
    %9 = vector.extract_strided_slice %6 {offsets = [0, 64], sizes = [4, 32], strides = [1, 1]} : vector<4x96xf32> to vector<4x32xf32>
    %c0_6 = arith.constant 0 : index
    %c0_7 = arith.constant 0 : index
    %c0_8 = arith.constant 0 : index
    %10 = vector.load %arg7[%c0_6, %c0_7, %c0_8] : memref<1x4x4xf32, #tpu.memory_space<vmem>>, vector<1x4x4xf32>
    %11 = vector.shape_cast %10 : vector<1x4x4xf32> to vector<4x4xf32>
    %c0_9 = arith.constant 0 : index
    %c0_10 = arith.constant 0 : index
    %12 = vector.load %arg5[%c0_9, %c0_10] : memref<32x32xf32, #tpu.memory_space<vmem>>, vector<32x32xf32>
    %cst_11 = arith.constant 0.000000e+00 : f32
    %13 = vector.broadcast %cst_11 : f32 to vector<4x32xf32>
    %14 = vector.extract_strided_slice %7 {offsets = [0, 0], sizes = [4, 8], strides = [1, 1]} : vector<4x32xf32> to vector<4x8xf32>
    %15 = vector.extract_strided_slice %8 {offsets = [0, 0], sizes = [4, 8], strides = [1, 1]} : vector<4x32xf32> to vector<4x8xf32>
    %cst_12 = arith.constant dense<0.000000e+00> : vector<4x4xf32>
    %16 = tpu.matmul %14, %15, %cst_12 {dimension_numbers = #tpu.dot_dimension_numbers<[1], [1], [0], [0], [0, 0, 1, 0], [], []>} : vector<4x8xf32>, vector<4x8xf32>, vector<4x4xf32> -> vector<4x4xf32>
    %cst_13 = arith.constant 0.353553385 : f32
    %17 = vector.broadcast %cst_13 : f32 to vector<4x4xf32>
    %18 = arith.mulf %16, %17 : vector<4x4xf32>
    %19 = arith.addf %18, %11 : vector<4x4xf32>
    %cst_14 = arith.constant dense<0xFF800000> : vector<4xf32>
    %20 = vector.multi_reduction <maximumf>, %19, %cst_14 [1] : vector<4x4xf32> to vector<4xf32>
    %21 = vector.shape_cast %20 : vector<4xf32> to vector<4x1xf32>
    %22 = vector.broadcast %21 : vector<4x1xf32> to vector<4x4xf32>
    %23 = arith.subf %19, %22 : vector<4x4xf32>
    %24 = math.exp %23 : vector<4x4xf32>
    %cst_15 = arith.constant dense<0.000000e+00> : vector<4xf32>
    %25 = vector.multi_reduction <add>, %24, %cst_15 [1] : vector<4x4xf32> to vector<4xf32>
    %26 = vector.shape_cast %25 : vector<4xf32> to vector<4x1xf32>
    %27 = vector.broadcast %26 : vector<4x1xf32> to vector<4x4xf32>
    %28 = arith.divf %24, %27 : vector<4x4xf32>
    %29 = vector.extract_strided_slice %9 {offsets = [0, 0], sizes = [4, 8], strides = [1, 1]} : vector<4x32xf32> to vector<4x8xf32>
    %cst_16 = arith.constant dense<0.000000e+00> : vector<4x8xf32>
    %30 = tpu.matmul %28, %29, %cst_16 {dimension_numbers = #tpu.dot_dimension_numbers<[1], [0], [0], [1], [0, 0, 1, 1], [], []>} : vector<4x4xf32>, vector<4x8xf32>, vector<4x8xf32> -> vector<4x8xf32>
    %31 = vector.extract_strided_slice %12 {offsets = [0, 0], sizes = [8, 32], strides = [1, 1]} : vector<32x32xf32> to vector<8x32xf32>
    %cst_17 = arith.constant dense<0.000000e+00> : vector<4x32xf32>
    %32 = tpu.matmul %30, %31, %cst_17 {dimension_numbers = #tpu.dot_dimension_numbers<[1], [0], [0], [1], [0, 0, 1, 1], [], []>} : vector<4x8xf32>, vector<8x32xf32>, vector<4x32xf32> -> vector<4x32xf32>
    %33 = arith.addf %13, %32 : vector<4x32xf32>
    %34 = vector.extract_strided_slice %7 {offsets = [0, 8], sizes = [4, 8], strides = [1, 1]} : vector<4x32xf32> to vector<4x8xf32>
    %35 = vector.extract_strided_slice %8 {offsets = [0, 8], sizes = [4, 8], strides = [1, 1]} : vector<4x32xf32> to vector<4x8xf32>
    %cst_18 = arith.constant dense<0.000000e+00> : vector<4x4xf32>
    %36 = tpu.matmul %34, %35, %cst_18 {dimension_numbers = #tpu.dot_dimension_numbers<[1], [1], [0], [0], [0, 0, 1, 0], [], []>} : vector<4x8xf32>, vector<4x8xf32>, vector<4x4xf32> -> vector<4x4xf32>
    %cst_19 = arith.constant 0.353553385 : f32
    %37 = vector.broadcast %cst_19 : f32 to vector<4x4xf32>
    %38 = arith.mulf %36, %37 : vector<4x4xf32>
    %39 = arith.addf %38, %11 : vector<4x4xf32>
    %cst_20 = arith.constant dense<0xFF800000> : vector<4xf32>
    %40 = vector.multi_reduction <maximumf>, %39, %cst_20 [1] : vector<4x4xf32> to vector<4xf32>
    %41 = vector.shape_cast %40 : vector<4xf32> to vector<4x1xf32>
    %42 = vector.broadcast %41 : vector<4x1xf32> to vector<4x4xf32>
    %43 = arith.subf %39, %42 : vector<4x4xf32>
    %44 = math.exp %43 : vector<4x4xf32>
    %cst_21 = arith.constant dense<0.000000e+00> : vector<4xf32>
    %45 = vector.multi_reduction <add>, %44, %cst_21 [1] : vector<4x4xf32> to vector<4xf32>
    %46 = vector.shape_cast %45 : vector<4xf32> to vector<4x1xf32>
    %47 = vector.broadcast %46 : vector<4x1xf32> to vector<4x4xf32>
    %48 = arith.divf %44, %47 : vector<4x4xf32>
    %49 = vector.extract_strided_slice %9 {offsets = [0, 8], sizes = [4, 8], strides = [1, 1]} : vector<4x32xf32> to vector<4x8xf32>
    %cst_22 = arith.constant dense<0.000000e+00> : vector<4x8xf32>
    %50 = tpu.matmul %48, %49, %cst_22 {dimension_numbers = #tpu.dot_dimension_numbers<[1], [0], [0], [1], [0, 0, 1, 1], [], []>} : vector<4x4xf32>, vector<4x8xf32>, vector<4x8xf32> -> vector<4x8xf32>
    %51 = vector.extract_strided_slice %12 {offsets = [8, 0], sizes = [8, 32], strides = [1, 1]} : vector<32x32xf32> to vector<8x32xf32>
    %cst_23 = arith.constant dense<0.000000e+00> : vector<4x32xf32>
    %52 = tpu.matmul %50, %51, %cst_23 {dimension_numbers = #tpu.dot_dimension_numbers<[1], [0], [0], [1], [0, 0, 1, 1], [], []>} : vector<4x8xf32>, vector<8x32xf32>, vector<4x32xf32> -> vector<4x32xf32>
    %53 = arith.addf %33, %52 : vector<4x32xf32>
    %54 = vector.extract_strided_slice %7 {offsets = [0, 16], sizes = [4, 8], strides = [1, 1]} : vector<4x32xf32> to vector<4x8xf32>
    %55 = vector.extract_strided_slice %8 {offsets = [0, 16], sizes = [4, 8], strides = [1, 1]} : vector<4x32xf32> to vector<4x8xf32>
    %cst_24 = arith.constant dense<0.000000e+00> : vector<4x4xf32>
    %56 = tpu.matmul %54, %55, %cst_24 {dimension_numbers = #tpu.dot_dimension_numbers<[1], [1], [0], [0], [0, 0, 1, 0], [], []>} : vector<4x8xf32>, vector<4x8xf32>, vector<4x4xf32> -> vector<4x4xf32>
    %cst_25 = arith.constant 0.353553385 : f32
    %57 = vector.broadcast %cst_25 : f32 to vector<4x4xf32>
    %58 = arith.mulf %56, %57 : vector<4x4xf32>
    %59 = arith.addf %58, %11 : vector<4x4xf32>
    %cst_26 = arith.constant dense<0xFF800000> : vector<4xf32>
    %60 = vector.multi_reduction <maximumf>, %59, %cst_26 [1] : vector<4x4xf32> to vector<4xf32>
    %61 = vector.shape_cast %60 : vector<4xf32> to vector<4x1xf32>
    %62 = vector.broadcast %61 : vector<4x1xf32> to vector<4x4xf32>
    %63 = arith.subf %59, %62 : vector<4x4xf32>
    %64 = math.exp %63 : vector<4x4xf32>
    %cst_27 = arith.constant dense<0.000000e+00> : vector<4xf32>
    %65 = vector.multi_reduction <add>, %64, %cst_27 [1] : vector<4x4xf32> to vector<4xf32>
    %66 = vector.shape_cast %65 : vector<4xf32> to vector<4x1xf32>
    %67 = vector.broadcast %66 : vector<4x1xf32> to vector<4x4xf32>
    %68 = arith.divf %64, %67 : vector<4x4xf32>
    %69 = vector.extract_strided_slice %9 {offsets = [0, 16], sizes = [4, 8], strides = [1, 1]} : vector<4x32xf32> to vector<4x8xf32>
    %cst_28 = arith.constant dense<0.000000e+00> : vector<4x8xf32>
    %70 = tpu.matmul %68, %69, %cst_28 {dimension_numbers = #tpu.dot_dimension_numbers<[1], [0], [0], [1], [0, 0, 1, 1], [], []>} : vector<4x4xf32>, vector<4x8xf32>, vector<4x8xf32> -> vector<4x8xf32>
    %71 = vector.extract_strided_slice %12 {offsets = [16, 0], sizes = [8, 32], strides = [1, 1]} : vector<32x32xf32> to vector<8x32xf32>
    %cst_29 = arith.constant dense<0.000000e+00> : vector<4x32xf32>
    %72 = tpu.matmul %70, %71, %cst_29 {dimension_numbers = #tpu.dot_dimension_numbers<[1], [0], [0], [1], [0, 0, 1, 1], [], []>} : vector<4x8xf32>, vector<8x32xf32>, vector<4x32xf32> -> vector<4x32xf32>
    %73 = arith.addf %53, %72 : vector<4x32xf32>
    %74 = vector.extract_strided_slice %7 {offsets = [0, 24], sizes = [4, 8], strides = [1, 1]} : vector<4x32xf32> to vector<4x8xf32>
    %75 = vector.extract_strided_slice %8 {offsets = [0, 24], sizes = [4, 8], strides = [1, 1]} : vector<4x32xf32> to vector<4x8xf32>
    %cst_30 = arith.constant dense<0.000000e+00> : vector<4x4xf32>
    %76 = tpu.matmul %74, %75, %cst_30 {dimension_numbers = #tpu.dot_dimension_numbers<[1], [1], [0], [0], [0, 0, 1, 0], [], []>} : vector<4x8xf32>, vector<4x8xf32>, vector<4x4xf32> -> vector<4x4xf32>
    %cst_31 = arith.constant 0.353553385 : f32
    %77 = vector.broadcast %cst_31 : f32 to vector<4x4xf32>
    %78 = arith.mulf %76, %77 : vector<4x4xf32>
    %79 = arith.addf %78, %11 : vector<4x4xf32>
    %cst_32 = arith.constant dense<0xFF800000> : vector<4xf32>
    %80 = vector.multi_reduction <maximumf>, %79, %cst_32 [1] : vector<4x4xf32> to vector<4xf32>
    %81 = vector.shape_cast %80 : vector<4xf32> to vector<4x1xf32>
    %82 = vector.broadcast %81 : vector<4x1xf32> to vector<4x4xf32>
    %83 = arith.subf %79, %82 : vector<4x4xf32>
    %84 = math.exp %83 : vector<4x4xf32>
    %cst_33 = arith.constant dense<0.000000e+00> : vector<4xf32>
    %85 = vector.multi_reduction <add>, %84, %cst_33 [1] : vector<4x4xf32> to vector<4xf32>
    %86 = vector.shape_cast %85 : vector<4xf32> to vector<4x1xf32>
    %87 = vector.broadcast %86 : vector<4x1xf32> to vector<4x4xf32>
    %88 = arith.divf %84, %87 : vector<4x4xf32>
    %89 = vector.extract_strided_slice %9 {offsets = [0, 24], sizes = [4, 8], strides = [1, 1]} : vector<4x32xf32> to vector<4x8xf32>
    %cst_34 = arith.constant dense<0.000000e+00> : vector<4x8xf32>
    %90 = tpu.matmul %88, %89, %cst_34 {dimension_numbers = #tpu.dot_dimension_numbers<[1], [0], [0], [1], [0, 0, 1, 1], [], []>} : vector<4x4xf32>, vector<4x8xf32>, vector<4x8xf32> -> vector<4x8xf32>
    %91 = vector.extract_strided_slice %12 {offsets = [24, 0], sizes = [8, 32], strides = [1, 1]} : vector<32x32xf32> to vector<8x32xf32>
    %cst_35 = arith.constant dense<0.000000e+00> : vector<4x32xf32>
    %92 = tpu.matmul %90, %91, %cst_35 {dimension_numbers = #tpu.dot_dimension_numbers<[1], [0], [0], [1], [0, 0, 1, 1], [], []>} : vector<4x8xf32>, vector<8x32xf32>, vector<4x32xf32> -> vector<4x32xf32>
    %93 = arith.addf %73, %92 : vector<4x32xf32>
    %94 = arith.addf %1, %93 : vector<4x32xf32>
    %c0_36 = arith.constant 0 : index
    %c0_37 = arith.constant 0 : index
    %95 = vector.load %arg6[%c0_36, %c0_37] : memref<1x32xf32, #tpu.memory_space<vmem>>, vector<1x32xf32>
    %96 = vector.broadcast %95 : vector<1x32xf32> to vector<4x32xf32>
    %97 = arith.addf %94, %96 : vector<4x32xf32>
    %cst_38 = arith.constant dense<0.000000e+00> : vector<4xf32>
    %98 = vector.multi_reduction <add>, %97, %cst_38 [1] : vector<4x32xf32> to vector<4xf32>
    %99 = vector.shape_cast %98 : vector<4xf32> to vector<4x1xf32>
    %cst_39 = arith.constant 3.200000e+01 : f32
    %100 = vector.broadcast %cst_39 : f32 to vector<4x1xf32>
    %101 = arith.divf %99, %100 : vector<4x1xf32>
    %102 = vector.broadcast %101 : vector<4x1xf32> to vector<4x32xf32>
    %103 = arith.subf %97, %102 : vector<4x32xf32>
    %104 = arith.mulf %103, %103 : vector<4x32xf32>
    %cst_40 = arith.constant dense<0.000000e+00> : vector<4xf32>
    %105 = vector.multi_reduction <add>, %104, %cst_40 [1] : vector<4x32xf32> to vector<4xf32>
    %106 = vector.shape_cast %105 : vector<4xf32> to vector<4x1xf32>
    %cst_41 = arith.constant 3.200000e+01 : f32
    %107 = vector.broadcast %cst_41 : f32 to vector<4x1xf32>
    %108 = arith.divf %106, %107 : vector<4x1xf32>
    %109 = vector.broadcast %101 : vector<4x1xf32> to vector<4x32xf32>
    %110 = arith.subf %97, %109 : vector<4x32xf32>
    %cst_42 = arith.constant 9.99999974E-6 : f32
    %111 = vector.broadcast %cst_42 : f32 to vector<4x1xf32>
    %112 = arith.addf %108, %111 : vector<4x1xf32>
    %113 = math.rsqrt %112 : vector<4x1xf32>
    %114 = vector.broadcast %113 : vector<4x1xf32> to vector<4x32xf32>
    %115 = arith.mulf %110, %114 : vector<4x32xf32>
    %c0_43 = arith.constant 0 : index
    %c0_44 = arith.constant 0 : index
    %116 = vector.load %arg8[%c0_43, %c0_44] : memref<1x32xf32, #tpu.memory_space<vmem>>, vector<1x32xf32>
    %117 = vector.broadcast %116 : vector<1x32xf32> to vector<4x32xf32>
    %118 = arith.mulf %115, %117 : vector<4x32xf32>
    %c0_45 = arith.constant 0 : index
    %c0_46 = arith.constant 0 : index
    %119 = vector.load %arg9[%c0_45, %c0_46] : memref<1x32xf32, #tpu.memory_space<vmem>>, vector<1x32xf32>
    %120 = vector.broadcast %119 : vector<1x32xf32> to vector<4x32xf32>
    %121 = arith.addf %118, %120 : vector<4x32xf32>
    %c0_47 = arith.constant 0 : index
    %c0_48 = arith.constant 0 : index
    %c0_49 = arith.constant 0 : index
    %122 = vector.load %arg10[%c0_47, %c0_48, %c0_49] : memref<1x4x32xf32, #tpu.memory_space<vmem>>, vector<1x4x32xf32>
    %123 = vector.shape_cast %122 : vector<1x4x32xf32> to vector<4x32xf32>
    %124 = vector.shape_cast %121 : vector<4x32xf32> to vector<1x4x32xf32>
    tpu.vector_store %arg10[%c0_47, %c0_48, %c0_49], %124 {strides = array<i32>} : memref<1x4x32xf32, #tpu.memory_space<vmem>>, vector<1x4x32xf32>,
    return
  }
  func.func @transform_0(%arg0: i32) -> (i32, i32, i32) {
    %c0_i32 = arith.constant 0 : i32
    %c0_i32_0 = arith.constant 0 : i32
    %c0_i32_1 = arith.constant 0 : i32
    return %arg0, %c0_i32, %c0_i32_0 : i32, i32, i32
  }
  func.func @transform_1(%arg0: i32) -> (i32, i32, i32) {
    %c0_i32 = arith.constant 0 : i32
    %c0_i32_0 = arith.constant 0 : i32
    %c0_i32_1 = arith.constant 0 : i32
    return %arg0, %c0_i32, %c0_i32_0 : i32, i32, i32
  }
  func.func @transform_2(%arg0: i32) -> (i32, i32) {
    %c0_i32 = arith.constant 0 : i32
    %c0_i32_0 = arith.constant 0 : i32
    %c0_i32_1 = arith.constant 0 : i32
    return %c0_i32, %c0_i32_0 : i32, i32
  }
  func.func @transform_3(%arg0: i32) -> (i32, i32) {
    %c0_i32 = arith.constant 0 : i32
    %c0_i32_0 = arith.constant 0 : i32
    %c0_i32_1 = arith.constant 0 : i32
    return %c0_i32, %c0_i32_0 : i32, i32
  }
  func.func @transform_4(%arg0: i32) -> (i32, i32) {
    %c0_i32 = arith.constant 0 : i32
    %c0_i32_0 = arith.constant 0 : i32
    %c0_i32_1 = arith.constant 0 : i32
    return %c0_i32, %c0_i32_0 : i32, i32
  }
  func.func @transform_5(%arg0: i32) -> (i32, i32) {
    %c0_i32 = arith.constant 0 : i32
    %c0_i32_0 = arith.constant 0 : i32
    %c0_i32_1 = arith.constant 0 : i32
    return %c0_i32, %c0_i32_0 : i32, i32
  }
  func.func @transform_6(%arg0: i32) -> (i32, i32, i32) {
    %c0_i32 = arith.constant 0 : i32
    %c0_i32_0 = arith.constant 0 : i32
    %c0_i32_1 = arith.constant 0 : i32
    return %arg0, %c0_i32, %c0_i32_0 : i32, i32, i32
  }
  func.func @transform_7(%arg0: i32) -> (i32, i32) {
    %c0_i32 = arith.constant 0 : i32
    %c0_i32_0 = arith.constant 0 : i32
    %c0_i32_1 = arith.constant 0 : i32
    return %c0_i32, %c0_i32_0 : i32, i32
  }
  func.func @transform_8(%arg0: i32) -> (i32, i32) {
    %c0_i32 = arith.constant 0 : i32
    %c0_i32_0 = arith.constant 0 : i32
    %c0_i32_1 = arith.constant 0 : i32
    return %c0_i32, %c0_i32_0 : i32, i32
  }
  func.func @transform_9(%arg0: i32) -> (i32, i32, i32) {
    %c0_i32 = arith.constant 0 : i32
    %c0_i32_0 = arith.constant 0 : i32
    %c0_i32_1 = arith.constant 0 : i32
    return %arg0, %c0_i32, %c0_i32_0 : i32, i32, i32
  }
}

module attributes {stable_mosaic.version = 11 : i64} {
  func.func @_attn_block_kernel(%arg0: i32, %arg1: memref<1x6x32xf32, #tpu.memory_space<vmem>>, %arg2: memref<1x6x32xf32, #tpu.memory_space<vmem>>, %arg3: memref<32x96xf32, #tpu.memory_space<vmem>>, %arg4: memref<1x96xf32, #tpu.memory_space<vmem>>, %arg5: memref<32x32xf32, #tpu.memory_space<vmem>>, %arg6: memref<1x32xf32, #tpu.memory_space<vmem>>, %arg7: memref<1x6x6xf32, #tpu.memory_space<vmem>>, %arg8: memref<1x32xf32, #tpu.memory_space<vmem>>, %arg9: memref<1x32xf32, #tpu.memory_space<vmem>>, %arg10: memref<1x6x32xf32, #tpu.memory_space<vmem>>) attributes {dimension_semantics = [#tpu.dimension_semantics<parallel>], iteration_bounds = array<i64: 2>, scalar_prefetch = 0 : i64, scratch_operands = 0 : i64, tpu.core_type = #tpu.core_type<tc>, window_params = [{transform_indices = @transform_0, window_bounds = array<i64: 1, 6, 32>}, {transform_indices = @transform_1, window_bounds = array<i64: 1, 6, 32>}, {pipeline_mode = #tpu.pipeline_mode<synchronous>, transform_indices = @transform_2, window_bounds = array<i64: 32, 96>}, {pipeline_mode = #tpu.pipeline_mode<synchronous>, transform_indices = @transform_3, window_bounds = array<i64: 1, 96>}, {pipeline_mode = #tpu.pipeline_mode<synchronous>, transform_indices = @transform_4, window_bounds = array<i64: 32, 32>}, {pipeline_mode = #tpu.pipeline_mode<synchronous>, transform_indices = @transform_5, window_bounds = array<i64: 1, 32>}, {transform_indices = @transform_6, window_bounds = array<i64: 1, 6, 6>}, {pipeline_mode = #tpu.pipeline_mode<synchronous>, transform_indices = @transform_7, window_bounds = array<i64: 1, 32>}, {pipeline_mode = #tpu.pipeline_mode<synchronous>, transform_indices = @transform_8, window_bounds = array<i64: 1, 32>}, {transform_indices = @transform_9, window_bounds = array<i64: 1, 6, 32>}]} {
    %c0 = arith.constant 0 : index
    %c0_0 = arith.constant 0 : index
    %c0_1 = arith.constant 0 : index
    %0 = vector.load %arg1[%c0, %c0_0, %c0_1] : memref<1x6x32xf32, #tpu.memory_space<vmem>>, vector<1x6x32xf32>
    %1 = vector.shape_cast %0 : vector<1x6x32xf32> to vector<6x32xf32>
    %c0_2 = arith.constant 0 : index
    %c0_3 = arith.constant 0 : index
    %2 = vector.load %arg3[%c0_2, %c0_3] : memref<32x96xf32, #tpu.memory_space<vmem>>, vector<32x96xf32>
    %c0_4 = arith.constant 0 : index
    %c0_5 = arith.constant 0 : index
    %3 = vector.load %arg4[%c0_4, %c0_5] : memref<1x96xf32, #tpu.memory_space<vmem>>, vector<1x96xf32>
    %cst = arith.constant dense<0.000000e+00> : vector<6x96xf32>
    %4 = tpu.matmul %1, %2, %cst {dimension_numbers = #tpu.dot_dimension_numbers<[1], [0], [0], [1], [0, 0, 1, 1], [], []>} : vector<6x32xf32>, vector<32x96xf32>, vector<6x96xf32> -> vector<6x96xf32>
    %5 = vector.broadcast %3 : vector<1x96xf32> to vector<6x96xf32>
    %6 = arith.addf %4, %5 : vector<6x96xf32>
    %7 = vector.extract_strided_slice %6 {offsets = [0, 0], sizes = [6, 32], strides = [1, 1]} : vector<6x96xf32> to vector<6x32xf32>
    %8 = vector.extract_strided_slice %6 {offsets = [0, 32], sizes = [6, 32], strides = [1, 1]} : vector<6x96xf32> to vector<6x32xf32>
    %9 = vector.extract_strided_slice %6 {offsets = [0, 64], sizes = [6, 32], strides = [1, 1]} : vector<6x96xf32> to vector<6x32xf32>
    %c0_6 = arith.constant 0 : index
    %c0_7 = arith.constant 0 : index
    %c0_8 = arith.constant 0 : index
    %10 = vector.load %arg7[%c0_6, %c0_7, %c0_8] : memref<1x6x6xf32, #tpu.memory_space<vmem>>, vector<1x6x6xf32>
    %11 = vector.shape_cast %10 : vector<1x6x6xf32> to vector<6x6xf32>
    %c0_9 = arith.constant 0 : index
    %c0_10 = arith.constant 0 : index
    %12 = vector.load %arg5[%c0_9, %c0_10] : memref<32x32xf32, #tpu.memory_space<vmem>>, vector<32x32xf32>
    %cst_11 = arith.constant 0.000000e+00 : f32
    %13 = vector.broadcast %cst_11 : f32 to vector<6x32xf32>
    %14 = vector.extract_strided_slice %7 {offsets = [0, 0], sizes = [6, 8], strides = [1, 1]} : vector<6x32xf32> to vector<6x8xf32>
    %15 = vector.extract_strided_slice %8 {offsets = [0, 0], sizes = [6, 8], strides = [1, 1]} : vector<6x32xf32> to vector<6x8xf32>
    %cst_12 = arith.constant dense<0.000000e+00> : vector<6x6xf32>
    %16 = tpu.matmul %14, %15, %cst_12 {dimension_numbers = #tpu.dot_dimension_numbers<[1], [1], [0], [0], [0, 0, 1, 0], [], []>} : vector<6x8xf32>, vector<6x8xf32>, vector<6x6xf32> -> vector<6x6xf32>
    %cst_13 = arith.constant 0.353553385 : f32
    %17 = vector.broadcast %cst_13 : f32 to vector<6x6xf32>
    %18 = arith.mulf %16, %17 : vector<6x6xf32>
    %19 = arith.addf %18, %11 : vector<6x6xf32>
    %cst_14 = arith.constant dense<0xFF800000> : vector<6xf32>
    %20 = vector.multi_reduction <maximumf>, %19, %cst_14 [1] : vector<6x6xf32> to vector<6xf32>
    %21 = vector.shape_cast %20 : vector<6xf32> to vector<6x1xf32>
    %22 = vector.broadcast %21 : vector<6x1xf32> to vector<6x6xf32>
    %23 = arith.subf %19, %22 : vector<6x6xf32>
    %24 = math.exp %23 : vector<6x6xf32>
    %cst_15 = arith.constant dense<0.000000e+00> : vector<6xf32>
    %25 = vector.multi_reduction <add>, %24, %cst_15 [1] : vector<6x6xf32> to vector<6xf32>
    %26 = vector.shape_cast %25 : vector<6xf32> to vector<6x1xf32>
    %27 = vector.broadcast %26 : vector<6x1xf32> to vector<6x6xf32>
    %28 = arith.divf %24, %27 : vector<6x6xf32>
    %29 = vector.extract_strided_slice %9 {offsets = [0, 0], sizes = [6, 8], strides = [1, 1]} : vector<6x32xf32> to vector<6x8xf32>
    %cst_16 = arith.constant dense<0.000000e+00> : vector<6x8xf32>
    %30 = tpu.matmul %28, %29, %cst_16 {dimension_numbers = #tpu.dot_dimension_numbers<[1], [0], [0], [1], [0, 0, 1, 1], [], []>} : vector<6x6xf32>, vector<6x8xf32>, vector<6x8xf32> -> vector<6x8xf32>
    %31 = vector.extract_strided_slice %12 {offsets = [0, 0], sizes = [8, 32], strides = [1, 1]} : vector<32x32xf32> to vector<8x32xf32>
    %cst_17 = arith.constant dense<0.000000e+00> : vector<6x32xf32>
    %32 = tpu.matmul %30, %31, %cst_17 {dimension_numbers = #tpu.dot_dimension_numbers<[1], [0], [0], [1], [0, 0, 1, 1], [], []>} : vector<6x8xf32>, vector<8x32xf32>, vector<6x32xf32> -> vector<6x32xf32>
    %33 = arith.addf %13, %32 : vector<6x32xf32>
    %34 = vector.extract_strided_slice %7 {offsets = [0, 8], sizes = [6, 8], strides = [1, 1]} : vector<6x32xf32> to vector<6x8xf32>
    %35 = vector.extract_strided_slice %8 {offsets = [0, 8], sizes = [6, 8], strides = [1, 1]} : vector<6x32xf32> to vector<6x8xf32>
    %cst_18 = arith.constant dense<0.000000e+00> : vector<6x6xf32>
    %36 = tpu.matmul %34, %35, %cst_18 {dimension_numbers = #tpu.dot_dimension_numbers<[1], [1], [0], [0], [0, 0, 1, 0], [], []>} : vector<6x8xf32>, vector<6x8xf32>, vector<6x6xf32> -> vector<6x6xf32>
    %cst_19 = arith.constant 0.353553385 : f32
    %37 = vector.broadcast %cst_19 : f32 to vector<6x6xf32>
    %38 = arith.mulf %36, %37 : vector<6x6xf32>
    %39 = arith.addf %38, %11 : vector<6x6xf32>
    %cst_20 = arith.constant dense<0xFF800000> : vector<6xf32>
    %40 = vector.multi_reduction <maximumf>, %39, %cst_20 [1] : vector<6x6xf32> to vector<6xf32>
    %41 = vector.shape_cast %40 : vector<6xf32> to vector<6x1xf32>
    %42 = vector.broadcast %41 : vector<6x1xf32> to vector<6x6xf32>
    %43 = arith.subf %39, %42 : vector<6x6xf32>
    %44 = math.exp %43 : vector<6x6xf32>
    %cst_21 = arith.constant dense<0.000000e+00> : vector<6xf32>
    %45 = vector.multi_reduction <add>, %44, %cst_21 [1] : vector<6x6xf32> to vector<6xf32>
    %46 = vector.shape_cast %45 : vector<6xf32> to vector<6x1xf32>
    %47 = vector.broadcast %46 : vector<6x1xf32> to vector<6x6xf32>
    %48 = arith.divf %44, %47 : vector<6x6xf32>
    %49 = vector.extract_strided_slice %9 {offsets = [0, 8], sizes = [6, 8], strides = [1, 1]} : vector<6x32xf32> to vector<6x8xf32>
    %cst_22 = arith.constant dense<0.000000e+00> : vector<6x8xf32>
    %50 = tpu.matmul %48, %49, %cst_22 {dimension_numbers = #tpu.dot_dimension_numbers<[1], [0], [0], [1], [0, 0, 1, 1], [], []>} : vector<6x6xf32>, vector<6x8xf32>, vector<6x8xf32> -> vector<6x8xf32>
    %51 = vector.extract_strided_slice %12 {offsets = [8, 0], sizes = [8, 32], strides = [1, 1]} : vector<32x32xf32> to vector<8x32xf32>
    %cst_23 = arith.constant dense<0.000000e+00> : vector<6x32xf32>
    %52 = tpu.matmul %50, %51, %cst_23 {dimension_numbers = #tpu.dot_dimension_numbers<[1], [0], [0], [1], [0, 0, 1, 1], [], []>} : vector<6x8xf32>, vector<8x32xf32>, vector<6x32xf32> -> vector<6x32xf32>
    %53 = arith.addf %33, %52 : vector<6x32xf32>
    %54 = vector.extract_strided_slice %7 {offsets = [0, 16], sizes = [6, 8], strides = [1, 1]} : vector<6x32xf32> to vector<6x8xf32>
    %55 = vector.extract_strided_slice %8 {offsets = [0, 16], sizes = [6, 8], strides = [1, 1]} : vector<6x32xf32> to vector<6x8xf32>
    %cst_24 = arith.constant dense<0.000000e+00> : vector<6x6xf32>
    %56 = tpu.matmul %54, %55, %cst_24 {dimension_numbers = #tpu.dot_dimension_numbers<[1], [1], [0], [0], [0, 0, 1, 0], [], []>} : vector<6x8xf32>, vector<6x8xf32>, vector<6x6xf32> -> vector<6x6xf32>
    %cst_25 = arith.constant 0.353553385 : f32
    %57 = vector.broadcast %cst_25 : f32 to vector<6x6xf32>
    %58 = arith.mulf %56, %57 : vector<6x6xf32>
    %59 = arith.addf %58, %11 : vector<6x6xf32>
    %cst_26 = arith.constant dense<0xFF800000> : vector<6xf32>
    %60 = vector.multi_reduction <maximumf>, %59, %cst_26 [1] : vector<6x6xf32> to vector<6xf32>
    %61 = vector.shape_cast %60 : vector<6xf32> to vector<6x1xf32>
    %62 = vector.broadcast %61 : vector<6x1xf32> to vector<6x6xf32>
    %63 = arith.subf %59, %62 : vector<6x6xf32>
    %64 = math.exp %63 : vector<6x6xf32>
    %cst_27 = arith.constant dense<0.000000e+00> : vector<6xf32>
    %65 = vector.multi_reduction <add>, %64, %cst_27 [1] : vector<6x6xf32> to vector<6xf32>
    %66 = vector.shape_cast %65 : vector<6xf32> to vector<6x1xf32>
    %67 = vector.broadcast %66 : vector<6x1xf32> to vector<6x6xf32>
    %68 = arith.divf %64, %67 : vector<6x6xf32>
    %69 = vector.extract_strided_slice %9 {offsets = [0, 16], sizes = [6, 8], strides = [1, 1]} : vector<6x32xf32> to vector<6x8xf32>
    %cst_28 = arith.constant dense<0.000000e+00> : vector<6x8xf32>
    %70 = tpu.matmul %68, %69, %cst_28 {dimension_numbers = #tpu.dot_dimension_numbers<[1], [0], [0], [1], [0, 0, 1, 1], [], []>} : vector<6x6xf32>, vector<6x8xf32>, vector<6x8xf32> -> vector<6x8xf32>
    %71 = vector.extract_strided_slice %12 {offsets = [16, 0], sizes = [8, 32], strides = [1, 1]} : vector<32x32xf32> to vector<8x32xf32>
    %cst_29 = arith.constant dense<0.000000e+00> : vector<6x32xf32>
    %72 = tpu.matmul %70, %71, %cst_29 {dimension_numbers = #tpu.dot_dimension_numbers<[1], [0], [0], [1], [0, 0, 1, 1], [], []>} : vector<6x8xf32>, vector<8x32xf32>, vector<6x32xf32> -> vector<6x32xf32>
    %73 = arith.addf %53, %72 : vector<6x32xf32>
    %74 = vector.extract_strided_slice %7 {offsets = [0, 24], sizes = [6, 8], strides = [1, 1]} : vector<6x32xf32> to vector<6x8xf32>
    %75 = vector.extract_strided_slice %8 {offsets = [0, 24], sizes = [6, 8], strides = [1, 1]} : vector<6x32xf32> to vector<6x8xf32>
    %cst_30 = arith.constant dense<0.000000e+00> : vector<6x6xf32>
    %76 = tpu.matmul %74, %75, %cst_30 {dimension_numbers = #tpu.dot_dimension_numbers<[1], [1], [0], [0], [0, 0, 1, 0], [], []>} : vector<6x8xf32>, vector<6x8xf32>, vector<6x6xf32> -> vector<6x6xf32>
    %cst_31 = arith.constant 0.353553385 : f32
    %77 = vector.broadcast %cst_31 : f32 to vector<6x6xf32>
    %78 = arith.mulf %76, %77 : vector<6x6xf32>
    %79 = arith.addf %78, %11 : vector<6x6xf32>
    %cst_32 = arith.constant dense<0xFF800000> : vector<6xf32>
    %80 = vector.multi_reduction <maximumf>, %79, %cst_32 [1] : vector<6x6xf32> to vector<6xf32>
    %81 = vector.shape_cast %80 : vector<6xf32> to vector<6x1xf32>
    %82 = vector.broadcast %81 : vector<6x1xf32> to vector<6x6xf32>
    %83 = arith.subf %79, %82 : vector<6x6xf32>
    %84 = math.exp %83 : vector<6x6xf32>
    %cst_33 = arith.constant dense<0.000000e+00> : vector<6xf32>
    %85 = vector.multi_reduction <add>, %84, %cst_33 [1] : vector<6x6xf32> to vector<6xf32>
    %86 = vector.shape_cast %85 : vector<6xf32> to vector<6x1xf32>
    %87 = vector.broadcast %86 : vector<6x1xf32> to vector<6x6xf32>
    %88 = arith.divf %84, %87 : vector<6x6xf32>
    %89 = vector.extract_strided_slice %9 {offsets = [0, 24], sizes = [6, 8], strides = [1, 1]} : vector<6x32xf32> to vector<6x8xf32>
    %cst_34 = arith.constant dense<0.000000e+00> : vector<6x8xf32>
    %90 = tpu.matmul %88, %89, %cst_34 {dimension_numbers = #tpu.dot_dimension_numbers<[1], [0], [0], [1], [0, 0, 1, 1], [], []>} : vector<6x6xf32>, vector<6x8xf32>, vector<6x8xf32> -> vector<6x8xf32>
    %91 = vector.extract_strided_slice %12 {offsets = [24, 0], sizes = [8, 32], strides = [1, 1]} : vector<32x32xf32> to vector<8x32xf32>
    %cst_35 = arith.constant dense<0.000000e+00> : vector<6x32xf32>
    %92 = tpu.matmul %90, %91, %cst_35 {dimension_numbers = #tpu.dot_dimension_numbers<[1], [0], [0], [1], [0, 0, 1, 1], [], []>} : vector<6x8xf32>, vector<8x32xf32>, vector<6x32xf32> -> vector<6x32xf32>
    %93 = arith.addf %73, %92 : vector<6x32xf32>
    %94 = arith.addf %1, %93 : vector<6x32xf32>
    %c0_36 = arith.constant 0 : index
    %c0_37 = arith.constant 0 : index
    %95 = vector.load %arg6[%c0_36, %c0_37] : memref<1x32xf32, #tpu.memory_space<vmem>>, vector<1x32xf32>
    %96 = vector.broadcast %95 : vector<1x32xf32> to vector<6x32xf32>
    %97 = arith.addf %94, %96 : vector<6x32xf32>
    %cst_38 = arith.constant dense<0.000000e+00> : vector<6xf32>
    %98 = vector.multi_reduction <add>, %97, %cst_38 [1] : vector<6x32xf32> to vector<6xf32>
    %99 = vector.shape_cast %98 : vector<6xf32> to vector<6x1xf32>
    %cst_39 = arith.constant 3.200000e+01 : f32
    %100 = vector.broadcast %cst_39 : f32 to vector<6x1xf32>
    %101 = arith.divf %99, %100 : vector<6x1xf32>
    %102 = vector.broadcast %101 : vector<6x1xf32> to vector<6x32xf32>
    %103 = arith.subf %97, %102 : vector<6x32xf32>
    %104 = arith.mulf %103, %103 : vector<6x32xf32>
    %cst_40 = arith.constant dense<0.000000e+00> : vector<6xf32>
    %105 = vector.multi_reduction <add>, %104, %cst_40 [1] : vector<6x32xf32> to vector<6xf32>
    %106 = vector.shape_cast %105 : vector<6xf32> to vector<6x1xf32>
    %cst_41 = arith.constant 3.200000e+01 : f32
    %107 = vector.broadcast %cst_41 : f32 to vector<6x1xf32>
    %108 = arith.divf %106, %107 : vector<6x1xf32>
    %109 = vector.broadcast %101 : vector<6x1xf32> to vector<6x32xf32>
    %110 = arith.subf %97, %109 : vector<6x32xf32>
    %cst_42 = arith.constant 9.99999974E-6 : f32
    %111 = vector.broadcast %cst_42 : f32 to vector<6x1xf32>
    %112 = arith.addf %108, %111 : vector<6x1xf32>
    %113 = math.rsqrt %112 : vector<6x1xf32>
    %114 = vector.broadcast %113 : vector<6x1xf32> to vector<6x32xf32>
    %115 = arith.mulf %110, %114 : vector<6x32xf32>
    %c0_43 = arith.constant 0 : index
    %c0_44 = arith.constant 0 : index
    %116 = vector.load %arg8[%c0_43, %c0_44] : memref<1x32xf32, #tpu.memory_space<vmem>>, vector<1x32xf32>
    %117 = vector.broadcast %116 : vector<1x32xf32> to vector<6x32xf32>
    %118 = arith.mulf %115, %117 : vector<6x32xf32>
    %c0_45 = arith.constant 0 : index
    %c0_46 = arith.constant 0 : index
    %119 = vector.load %arg9[%c0_45, %c0_46] : memref<1x32xf32, #tpu.memory_space<vmem>>, vector<1x32xf32>
    %120 = vector.broadcast %119 : vector<1x32xf32> to vector<6x32xf32>
    %121 = arith.addf %118, %120 : vector<6x32xf32>
    %c0_47 = arith.constant 0 : index
    %c0_48 = arith.constant 0 : index
    %c0_49 = arith.constant 0 : index
    %122 = vector.load %arg10[%c0_47, %c0_48, %c0_49] : memref<1x6x32xf32, #tpu.memory_space<vmem>>, vector<1x6x32xf32>
    %123 = vector.shape_cast %122 : vector<1x6x32xf32> to vector<6x32xf32>
    %124 = vector.shape_cast %121 : vector<6x32xf32> to vector<1x6x32xf32>
    tpu.vector_store %arg10[%c0_47, %c0_48, %c0_49], %124 {strides = array<i32>} : memref<1x6x32xf32, #tpu.memory_space<vmem>>, vector<1x6x32xf32>,
    return
  }
  func.func @transform_0(%arg0: i32) -> (i32, i32, i32) {
    %c0_i32 = arith.constant 0 : i32
    %c0_i32_0 = arith.constant 0 : i32
    %c0_i32_1 = arith.constant 0 : i32
    return %arg0, %c0_i32, %c0_i32_0 : i32, i32, i32
  }
  func.func @transform_1(%arg0: i32) -> (i32, i32, i32) {
    %c0_i32 = arith.constant 0 : i32
    %c0_i32_0 = arith.constant 0 : i32
    %c0_i32_1 = arith.constant 0 : i32
    return %arg0, %c0_i32, %c0_i32_0 : i32, i32, i32
  }
  func.func @transform_2(%arg0: i32) -> (i32, i32) {
    %c0_i32 = arith.constant 0 : i32
    %c0_i32_0 = arith.constant 0 : i32
    %c0_i32_1 = arith.constant 0 : i32
    return %c0_i32, %c0_i32_0 : i32, i32
  }
  func.func @transform_3(%arg0: i32) -> (i32, i32) {
    %c0_i32 = arith.constant 0 : i32
    %c0_i32_0 = arith.constant 0 : i32
    %c0_i32_1 = arith.constant 0 : i32
    return %c0_i32, %c0_i32_0 : i32, i32
  }
  func.func @transform_4(%arg0: i32) -> (i32, i32) {
    %c0_i32 = arith.constant 0 : i32
    %c0_i32_0 = arith.constant 0 : i32
    %c0_i32_1 = arith.constant 0 : i32
    return %c0_i32, %c0_i32_0 : i32, i32
  }
  func.func @transform_5(%arg0: i32) -> (i32, i32) {
    %c0_i32 = arith.constant 0 : i32
    %c0_i32_0 = arith.constant 0 : i32
    %c0_i32_1 = arith.constant 0 : i32
    return %c0_i32, %c0_i32_0 : i32, i32
  }
  func.func @transform_6(%arg0: i32) -> (i32, i32, i32) {
    %c0_i32 = arith.constant 0 : i32
    %c0_i32_0 = arith.constant 0 : i32
    %c0_i32_1 = arith.constant 0 : i32
    return %arg0, %c0_i32, %c0_i32_0 : i32, i32, i32
  }
  func.func @transform_7(%arg0: i32) -> (i32, i32) {
    %c0_i32 = arith.constant 0 : i32
    %c0_i32_0 = arith.constant 0 : i32
    %c0_i32_1 = arith.constant 0 : i32
    return %c0_i32, %c0_i32_0 : i32, i32
  }
  func.func @transform_8(%arg0: i32) -> (i32, i32) {
    %c0_i32 = arith.constant 0 : i32
    %c0_i32_0 = arith.constant 0 : i32
    %c0_i32_1 = arith.constant 0 : i32
    return %c0_i32, %c0_i32_0 : i32, i32
  }
  func.func @transform_9(%arg0: i32) -> (i32, i32, i32) {
    %c0_i32 = arith.constant 0 : i32
    %c0_i32_0 = arith.constant 0 : i32
    %c0_i32_1 = arith.constant 0 : i32
    return %arg0, %c0_i32, %c0_i32_0 : i32, i32, i32
  }
}

module attributes {stable_mosaic.version = 11 : i64} {
  func.func @_embed_pos_kernel(%arg0: i32, %arg1: memref<1x6x1xi32, #tpu.memory_space<vmem>>, %arg2: memref<16x32xf32, #tpu.memory_space<vmem>>, %arg3: memref<6x32xf32, #tpu.memory_space<vmem>>, %arg4: memref<1x6x32xf32, #tpu.memory_space<vmem>>) attributes {dimension_semantics = [#tpu.dimension_semantics<parallel>], iteration_bounds = array<i64: 2>, scalar_prefetch = 0 : i64, scratch_operands = 0 : i64, tpu.core_type = #tpu.core_type<tc>, window_params = [{transform_indices = @transform_0, window_bounds = array<i64: 1, 6, 1>}, {pipeline_mode = #tpu.pipeline_mode<synchronous>, transform_indices = @transform_1, window_bounds = array<i64: 16, 32>}, {pipeline_mode = #tpu.pipeline_mode<synchronous>, transform_indices = @transform_2, window_bounds = array<i64: 6, 32>}, {transform_indices = @transform_3, window_bounds = array<i64: 1, 6, 32>}]} {
    %c0 = arith.constant 0 : index
    %c0_0 = arith.constant 0 : index
    %c0_1 = arith.constant 0 : index
    %0 = vector.load %arg1[%c0, %c0_0, %c0_1] : memref<1x6x1xi32, #tpu.memory_space<vmem>>, vector<1x6x1xi32>
    %1 = vector.shape_cast %0 : vector<1x6x1xi32> to vector<6x1xi32>
    %2 = tpu.iota {dimensions = array<i32: 1>} : vector<6x16xi32>
    %3 = vector.broadcast %1 : vector<6x1xi32> to vector<6x16xi32>
    %4 = arith.cmpi eq, %2, %3 : vector<6x16xi32>
    %5 = arith.extui %4 : vector<6x16xi1> to vector<6x16xi32>
    %6 = arith.sitofp %5 : vector<6x16xi32> to vector<6x16xf32>
    %c0_2 = arith.constant 0 : index
    %c0_3 = arith.constant 0 : index
    %7 = vector.load %arg2[%c0_2, %c0_3] : memref<16x32xf32, #tpu.memory_space<vmem>>, vector<16x32xf32>
    %cst = arith.constant dense<0.000000e+00> : vector<6x32xf32>
    %8 = tpu.matmul %6, %7, %cst {dimension_numbers = #tpu.dot_dimension_numbers<[1], [0], [0], [1], [0, 0, 1, 1], [], []>} : vector<6x16xf32>, vector<16x32xf32>, vector<6x32xf32> -> vector<6x32xf32>
    %cst_4 = arith.constant 5.65685415 : f32
    %9 = vector.broadcast %cst_4 : f32 to vector<6x32xf32>
    %10 = arith.mulf %8, %9 : vector<6x32xf32>
    %c0_5 = arith.constant 0 : index
    %c0_6 = arith.constant 0 : index
    %11 = vector.load %arg3[%c0_5, %c0_6] : memref<6x32xf32, #tpu.memory_space<vmem>>, vector<6x32xf32>
    %12 = arith.addf %10, %11 : vector<6x32xf32>
    %c0_7 = arith.constant 0 : index
    %c0_8 = arith.constant 0 : index
    %c0_9 = arith.constant 0 : index
    %13 = vector.load %arg4[%c0_7, %c0_8, %c0_9] : memref<1x6x32xf32, #tpu.memory_space<vmem>>, vector<1x6x32xf32>
    %14 = vector.shape_cast %13 : vector<1x6x32xf32> to vector<6x32xf32>
    %15 = vector.shape_cast %12 : vector<6x32xf32> to vector<1x6x32xf32>
    tpu.vector_store %arg4[%c0_7, %c0_8, %c0_9], %15 {strides = array<i32>} : memref<1x6x32xf32, #tpu.memory_space<vmem>>, vector<1x6x32xf32>,
    return
  }
  func.func @transform_0(%arg0: i32) -> (i32, i32, i32) {
    %c0_i32 = arith.constant 0 : i32
    %c0_i32_0 = arith.constant 0 : i32
    %c0_i32_1 = arith.constant 0 : i32
    return %arg0, %c0_i32, %c0_i32_0 : i32, i32, i32
  }
  func.func @transform_1(%arg0: i32) -> (i32, i32) {
    %c0_i32 = arith.constant 0 : i32
    %c0_i32_0 = arith.constant 0 : i32
    %c0_i32_1 = arith.constant 0 : i32
    return %c0_i32, %c0_i32_0 : i32, i32
  }
  func.func @transform_2(%arg0: i32) -> (i32, i32) {
    %c0_i32 = arith.constant 0 : i32
    %c0_i32_0 = arith.constant 0 : i32
    %c0_i32_1 = arith.constant 0 : i32
    return %c0_i32, %c0_i32_0 : i32, i32
  }
  func.func @transform_3(%arg0: i32) -> (i32, i32, i32) {
    %c0_i32 = arith.constant 0 : i32
    %c0_i32_0 = arith.constant 0 : i32
    %c0_i32_1 = arith.constant 0 : i32
    return %arg0, %c0_i32, %c0_i32_0 : i32, i32, i32
  }
}

module attributes {stable_mosaic.version = 11 : i64} {
  func.func @_attn_block_kernel(%arg0: i32, %arg1: memref<1x6x32xf32, #tpu.memory_space<vmem>>, %arg2: memref<1x4x32xf32, #tpu.memory_space<vmem>>, %arg3: memref<32x96xf32, #tpu.memory_space<vmem>>, %arg4: memref<1x96xf32, #tpu.memory_space<vmem>>, %arg5: memref<32x32xf32, #tpu.memory_space<vmem>>, %arg6: memref<1x32xf32, #tpu.memory_space<vmem>>, %arg7: memref<1x6x4xf32, #tpu.memory_space<vmem>>, %arg8: memref<1x32xf32, #tpu.memory_space<vmem>>, %arg9: memref<1x32xf32, #tpu.memory_space<vmem>>, %arg10: memref<1x6x32xf32, #tpu.memory_space<vmem>>) attributes {dimension_semantics = [#tpu.dimension_semantics<parallel>], iteration_bounds = array<i64: 2>, scalar_prefetch = 0 : i64, scratch_operands = 0 : i64, tpu.core_type = #tpu.core_type<tc>, window_params = [{transform_indices = @transform_0, window_bounds = array<i64: 1, 6, 32>}, {transform_indices = @transform_1, window_bounds = array<i64: 1, 4, 32>}, {pipeline_mode = #tpu.pipeline_mode<synchronous>, transform_indices = @transform_2, window_bounds = array<i64: 32, 96>}, {pipeline_mode = #tpu.pipeline_mode<synchronous>, transform_indices = @transform_3, window_bounds = array<i64: 1, 96>}, {pipeline_mode = #tpu.pipeline_mode<synchronous>, transform_indices = @transform_4, window_bounds = array<i64: 32, 32>}, {pipeline_mode = #tpu.pipeline_mode<synchronous>, transform_indices = @transform_5, window_bounds = array<i64: 1, 32>}, {transform_indices = @transform_6, window_bounds = array<i64: 1, 6, 4>}, {pipeline_mode = #tpu.pipeline_mode<synchronous>, transform_indices = @transform_7, window_bounds = array<i64: 1, 32>}, {pipeline_mode = #tpu.pipeline_mode<synchronous>, transform_indices = @transform_8, window_bounds = array<i64: 1, 32>}, {transform_indices = @transform_9, window_bounds = array<i64: 1, 6, 32>}]} {
    %c0 = arith.constant 0 : index
    %c0_0 = arith.constant 0 : index
    %c0_1 = arith.constant 0 : index
    %0 = vector.load %arg1[%c0, %c0_0, %c0_1] : memref<1x6x32xf32, #tpu.memory_space<vmem>>, vector<1x6x32xf32>
    %1 = vector.shape_cast %0 : vector<1x6x32xf32> to vector<6x32xf32>
    %c0_2 = arith.constant 0 : index
    %c0_3 = arith.constant 0 : index
    %2 = vector.load %arg3[%c0_2, %c0_3] : memref<32x96xf32, #tpu.memory_space<vmem>>, vector<32x96xf32>
    %c0_4 = arith.constant 0 : index
    %c0_5 = arith.constant 0 : index
    %3 = vector.load %arg4[%c0_4, %c0_5] : memref<1x96xf32, #tpu.memory_space<vmem>>, vector<1x96xf32>
    %c0_6 = arith.constant 0 : index
    %c0_7 = arith.constant 0 : index
    %c0_8 = arith.constant 0 : index
    %4 = vector.load %arg2[%c0_6, %c0_7, %c0_8] : memref<1x4x32xf32, #tpu.memory_space<vmem>>, vector<1x4x32xf32>
    %5 = vector.shape_cast %4 : vector<1x4x32xf32> to vector<4x32xf32>
    %6 = vector.extract_strided_slice %2 {offsets = [0, 0], sizes = [32, 32], strides = [1, 1]} : vector<32x96xf32> to vector<32x32xf32>
    %cst = arith.constant dense<0.000000e+00> : vector<6x32xf32>
    %7 = tpu.matmul %1, %6, %cst {dimension_numbers = #tpu.dot_dimension_numbers<[1], [0], [0], [1], [0, 0, 1, 1], [], []>} : vector<6x32xf32>, vector<32x32xf32>, vector<6x32xf32> -> vector<6x32xf32>
    %8 = vector.extract_strided_slice %3 {offsets = [0, 0], sizes = [1, 32], strides = [1, 1]} : vector<1x96xf32> to vector<1x32xf32>
    %9 = vector.broadcast %8 : vector<1x32xf32> to vector<6x32xf32>
    %10 = arith.addf %7, %9 : vector<6x32xf32>
    %11 = vector.extract_strided_slice %2 {offsets = [0, 32], sizes = [32, 64], strides = [1, 1]} : vector<32x96xf32> to vector<32x64xf32>
    %cst_9 = arith.constant dense<0.000000e+00> : vector<4x64xf32>
    %12 = tpu.matmul %5, %11, %cst_9 {dimension_numbers = #tpu.dot_dimension_numbers<[1], [0], [0], [1], [0, 0, 1, 1], [], []>} : vector<4x32xf32>, vector<32x64xf32>, vector<4x64xf32> -> vector<4x64xf32>
    %13 = vector.extract_strided_slice %3 {offsets = [0, 32], sizes = [1, 64], strides = [1, 1]} : vector<1x96xf32> to vector<1x64xf32>
    %14 = vector.broadcast %13 : vector<1x64xf32> to vector<4x64xf32>
    %15 = arith.addf %12, %14 : vector<4x64xf32>
    %16 = vector.extract_strided_slice %15 {offsets = [0, 0], sizes = [4, 32], strides = [1, 1]} : vector<4x64xf32> to vector<4x32xf32>
    %17 = vector.extract_strided_slice %15 {offsets = [0, 32], sizes = [4, 32], strides = [1, 1]} : vector<4x64xf32> to vector<4x32xf32>
    %c0_10 = arith.constant 0 : index
    %c0_11 = arith.constant 0 : index
    %c0_12 = arith.constant 0 : index
    %18 = vector.load %arg7[%c0_10, %c0_11, %c0_12] : memref<1x6x4xf32, #tpu.memory_space<vmem>>, vector<1x6x4xf32>
    %19 = vector.shape_cast %18 : vector<1x6x4xf32> to vector<6x4xf32>
    %c0_13 = arith.constant 0 : index
    %c0_14 = arith.constant 0 : index
    %20 = vector.load %arg5[%c0_13, %c0_14] : memref<32x32xf32, #tpu.memory_space<vmem>>, vector<32x32xf32>
    %cst_15 = arith.constant 0.000000e+00 : f32
    %21 = vector.broadcast %cst_15 : f32 to vector<6x32xf32>
    %22 = vector.extract_strided_slice %10 {offsets = [0, 0], sizes = [6, 8], strides = [1, 1]} : vector<6x32xf32> to vector<6x8xf32>
    %23 = vector.extract_strided_slice %16 {offsets = [0, 0], sizes = [4, 8], strides = [1, 1]} : vector<4x32xf32> to vector<4x8xf32>
    %cst_16 = arith.constant dense<0.000000e+00> : vector<6x4xf32>
    %24 = tpu.matmul %22, %23, %cst_16 {dimension_numbers = #tpu.dot_dimension_numbers<[1], [1], [0], [0], [0, 0, 1, 0], [], []>} : vector<6x8xf32>, vector<4x8xf32>, vector<6x4xf32> -> vector<6x4xf32>
    %cst_17 = arith.constant 0.353553385 : f32
    %25 = vector.broadcast %cst_17 : f32 to vector<6x4xf32>
    %26 = arith.mulf %24, %25 : vector<6x4xf32>
    %27 = arith.addf %26, %19 : vector<6x4xf32>
    %cst_18 = arith.constant dense<0xFF800000> : vector<6xf32>
    %28 = vector.multi_reduction <maximumf>, %27, %cst_18 [1] : vector<6x4xf32> to vector<6xf32>
    %29 = vector.shape_cast %28 : vector<6xf32> to vector<6x1xf32>
    %30 = vector.broadcast %29 : vector<6x1xf32> to vector<6x4xf32>
    %31 = arith.subf %27, %30 : vector<6x4xf32>
    %32 = math.exp %31 : vector<6x4xf32>
    %cst_19 = arith.constant dense<0.000000e+00> : vector<6xf32>
    %33 = vector.multi_reduction <add>, %32, %cst_19 [1] : vector<6x4xf32> to vector<6xf32>
    %34 = vector.shape_cast %33 : vector<6xf32> to vector<6x1xf32>
    %35 = vector.broadcast %34 : vector<6x1xf32> to vector<6x4xf32>
    %36 = arith.divf %32, %35 : vector<6x4xf32>
    %37 = vector.extract_strided_slice %17 {offsets = [0, 0], sizes = [4, 8], strides = [1, 1]} : vector<4x32xf32> to vector<4x8xf32>
    %cst_20 = arith.constant dense<0.000000e+00> : vector<6x8xf32>
    %38 = tpu.matmul %36, %37, %cst_20 {dimension_numbers = #tpu.dot_dimension_numbers<[1], [0], [0], [1], [0, 0, 1, 1], [], []>} : vector<6x4xf32>, vector<4x8xf32>, vector<6x8xf32> -> vector<6x8xf32>
    %39 = vector.extract_strided_slice %20 {offsets = [0, 0], sizes = [8, 32], strides = [1, 1]} : vector<32x32xf32> to vector<8x32xf32>
    %cst_21 = arith.constant dense<0.000000e+00> : vector<6x32xf32>
    %40 = tpu.matmul %38, %39, %cst_21 {dimension_numbers = #tpu.dot_dimension_numbers<[1], [0], [0], [1], [0, 0, 1, 1], [], []>} : vector<6x8xf32>, vector<8x32xf32>, vector<6x32xf32> -> vector<6x32xf32>
    %41 = arith.addf %21, %40 : vector<6x32xf32>
    %42 = vector.extract_strided_slice %10 {offsets = [0, 8], sizes = [6, 8], strides = [1, 1]} : vector<6x32xf32> to vector<6x8xf32>
    %43 = vector.extract_strided_slice %16 {offsets = [0, 8], sizes = [4, 8], strides = [1, 1]} : vector<4x32xf32> to vector<4x8xf32>
    %cst_22 = arith.constant dense<0.000000e+00> : vector<6x4xf32>
    %44 = tpu.matmul %42, %43, %cst_22 {dimension_numbers = #tpu.dot_dimension_numbers<[1], [1], [0], [0], [0, 0, 1, 0], [], []>} : vector<6x8xf32>, vector<4x8xf32>, vector<6x4xf32> -> vector<6x4xf32>
    %cst_23 = arith.constant 0.353553385 : f32
    %45 = vector.broadcast %cst_23 : f32 to vector<6x4xf32>
    %46 = arith.mulf %44, %45 : vector<6x4xf32>
    %47 = arith.addf %46, %19 : vector<6x4xf32>
    %cst_24 = arith.constant dense<0xFF800000> : vector<6xf32>
    %48 = vector.multi_reduction <maximumf>, %47, %cst_24 [1] : vector<6x4xf32> to vector<6xf32>
    %49 = vector.shape_cast %48 : vector<6xf32> to vector<6x1xf32>
    %50 = vector.broadcast %49 : vector<6x1xf32> to vector<6x4xf32>
    %51 = arith.subf %47, %50 : vector<6x4xf32>
    %52 = math.exp %51 : vector<6x4xf32>
    %cst_25 = arith.constant dense<0.000000e+00> : vector<6xf32>
    %53 = vector.multi_reduction <add>, %52, %cst_25 [1] : vector<6x4xf32> to vector<6xf32>
    %54 = vector.shape_cast %53 : vector<6xf32> to vector<6x1xf32>
    %55 = vector.broadcast %54 : vector<6x1xf32> to vector<6x4xf32>
    %56 = arith.divf %52, %55 : vector<6x4xf32>
    %57 = vector.extract_strided_slice %17 {offsets = [0, 8], sizes = [4, 8], strides = [1, 1]} : vector<4x32xf32> to vector<4x8xf32>
    %cst_26 = arith.constant dense<0.000000e+00> : vector<6x8xf32>
    %58 = tpu.matmul %56, %57, %cst_26 {dimension_numbers = #tpu.dot_dimension_numbers<[1], [0], [0], [1], [0, 0, 1, 1], [], []>} : vector<6x4xf32>, vector<4x8xf32>, vector<6x8xf32> -> vector<6x8xf32>
    %59 = vector.extract_strided_slice %20 {offsets = [8, 0], sizes = [8, 32], strides = [1, 1]} : vector<32x32xf32> to vector<8x32xf32>
    %cst_27 = arith.constant dense<0.000000e+00> : vector<6x32xf32>
    %60 = tpu.matmul %58, %59, %cst_27 {dimension_numbers = #tpu.dot_dimension_numbers<[1], [0], [0], [1], [0, 0, 1, 1], [], []>} : vector<6x8xf32>, vector<8x32xf32>, vector<6x32xf32> -> vector<6x32xf32>
    %61 = arith.addf %41, %60 : vector<6x32xf32>
    %62 = vector.extract_strided_slice %10 {offsets = [0, 16], sizes = [6, 8], strides = [1, 1]} : vector<6x32xf32> to vector<6x8xf32>
    %63 = vector.extract_strided_slice %16 {offsets = [0, 16], sizes = [4, 8], strides = [1, 1]} : vector<4x32xf32> to vector<4x8xf32>
    %cst_28 = arith.constant dense<0.000000e+00> : vector<6x4xf32>
    %64 = tpu.matmul %62, %63, %cst_28 {dimension_numbers = #tpu.dot_dimension_numbers<[1], [1], [0], [0], [0, 0, 1, 0], [], []>} : vector<6x8xf32>, vector<4x8xf32>, vector<6x4xf32> -> vector<6x4xf32>
    %cst_29 = arith.constant 0.353553385 : f32
    %65 = vector.broadcast %cst_29 : f32 to vector<6x4xf32>
    %66 = arith.mulf %64, %65 : vector<6x4xf32>
    %67 = arith.addf %66, %19 : vector<6x4xf32>
    %cst_30 = arith.constant dense<0xFF800000> : vector<6xf32>
    %68 = vector.multi_reduction <maximumf>, %67, %cst_30 [1] : vector<6x4xf32> to vector<6xf32>
    %69 = vector.shape_cast %68 : vector<6xf32> to vector<6x1xf32>
    %70 = vector.broadcast %69 : vector<6x1xf32> to vector<6x4xf32>
    %71 = arith.subf %67, %70 : vector<6x4xf32>
    %72 = math.exp %71 : vector<6x4xf32>
    %cst_31 = arith.constant dense<0.000000e+00> : vector<6xf32>
    %73 = vector.multi_reduction <add>, %72, %cst_31 [1] : vector<6x4xf32> to vector<6xf32>
    %74 = vector.shape_cast %73 : vector<6xf32> to vector<6x1xf32>
    %75 = vector.broadcast %74 : vector<6x1xf32> to vector<6x4xf32>
    %76 = arith.divf %72, %75 : vector<6x4xf32>
    %77 = vector.extract_strided_slice %17 {offsets = [0, 16], sizes = [4, 8], strides = [1, 1]} : vector<4x32xf32> to vector<4x8xf32>
    %cst_32 = arith.constant dense<0.000000e+00> : vector<6x8xf32>
    %78 = tpu.matmul %76, %77, %cst_32 {dimension_numbers = #tpu.dot_dimension_numbers<[1], [0], [0], [1], [0, 0, 1, 1], [], []>} : vector<6x4xf32>, vector<4x8xf32>, vector<6x8xf32> -> vector<6x8xf32>
    %79 = vector.extract_strided_slice %20 {offsets = [16, 0], sizes = [8, 32], strides = [1, 1]} : vector<32x32xf32> to vector<8x32xf32>
    %cst_33 = arith.constant dense<0.000000e+00> : vector<6x32xf32>
    %80 = tpu.matmul %78, %79, %cst_33 {dimension_numbers = #tpu.dot_dimension_numbers<[1], [0], [0], [1], [0, 0, 1, 1], [], []>} : vector<6x8xf32>, vector<8x32xf32>, vector<6x32xf32> -> vector<6x32xf32>
    %81 = arith.addf %61, %80 : vector<6x32xf32>
    %82 = vector.extract_strided_slice %10 {offsets = [0, 24], sizes = [6, 8], strides = [1, 1]} : vector<6x32xf32> to vector<6x8xf32>
    %83 = vector.extract_strided_slice %16 {offsets = [0, 24], sizes = [4, 8], strides = [1, 1]} : vector<4x32xf32> to vector<4x8xf32>
    %cst_34 = arith.constant dense<0.000000e+00> : vector<6x4xf32>
    %84 = tpu.matmul %82, %83, %cst_34 {dimension_numbers = #tpu.dot_dimension_numbers<[1], [1], [0], [0], [0, 0, 1, 0], [], []>} : vector<6x8xf32>, vector<4x8xf32>, vector<6x4xf32> -> vector<6x4xf32>
    %cst_35 = arith.constant 0.353553385 : f32
    %85 = vector.broadcast %cst_35 : f32 to vector<6x4xf32>
    %86 = arith.mulf %84, %85 : vector<6x4xf32>
    %87 = arith.addf %86, %19 : vector<6x4xf32>
    %cst_36 = arith.constant dense<0xFF800000> : vector<6xf32>
    %88 = vector.multi_reduction <maximumf>, %87, %cst_36 [1] : vector<6x4xf32> to vector<6xf32>
    %89 = vector.shape_cast %88 : vector<6xf32> to vector<6x1xf32>
    %90 = vector.broadcast %89 : vector<6x1xf32> to vector<6x4xf32>
    %91 = arith.subf %87, %90 : vector<6x4xf32>
    %92 = math.exp %91 : vector<6x4xf32>
    %cst_37 = arith.constant dense<0.000000e+00> : vector<6xf32>
    %93 = vector.multi_reduction <add>, %92, %cst_37 [1] : vector<6x4xf32> to vector<6xf32>
    %94 = vector.shape_cast %93 : vector<6xf32> to vector<6x1xf32>
    %95 = vector.broadcast %94 : vector<6x1xf32> to vector<6x4xf32>
    %96 = arith.divf %92, %95 : vector<6x4xf32>
    %97 = vector.extract_strided_slice %17 {offsets = [0, 24], sizes = [4, 8], strides = [1, 1]} : vector<4x32xf32> to vector<4x8xf32>
    %cst_38 = arith.constant dense<0.000000e+00> : vector<6x8xf32>
    %98 = tpu.matmul %96, %97, %cst_38 {dimension_numbers = #tpu.dot_dimension_numbers<[1], [0], [0], [1], [0, 0, 1, 1], [], []>} : vector<6x4xf32>, vector<4x8xf32>, vector<6x8xf32> -> vector<6x8xf32>
    %99 = vector.extract_strided_slice %20 {offsets = [24, 0], sizes = [8, 32], strides = [1, 1]} : vector<32x32xf32> to vector<8x32xf32>
    %cst_39 = arith.constant dense<0.000000e+00> : vector<6x32xf32>
    %100 = tpu.matmul %98, %99, %cst_39 {dimension_numbers = #tpu.dot_dimension_numbers<[1], [0], [0], [1], [0, 0, 1, 1], [], []>} : vector<6x8xf32>, vector<8x32xf32>, vector<6x32xf32> -> vector<6x32xf32>
    %101 = arith.addf %81, %100 : vector<6x32xf32>
    %102 = arith.addf %1, %101 : vector<6x32xf32>
    %c0_40 = arith.constant 0 : index
    %c0_41 = arith.constant 0 : index
    %103 = vector.load %arg6[%c0_40, %c0_41] : memref<1x32xf32, #tpu.memory_space<vmem>>, vector<1x32xf32>
    %104 = vector.broadcast %103 : vector<1x32xf32> to vector<6x32xf32>
    %105 = arith.addf %102, %104 : vector<6x32xf32>
    %cst_42 = arith.constant dense<0.000000e+00> : vector<6xf32>
    %106 = vector.multi_reduction <add>, %105, %cst_42 [1] : vector<6x32xf32> to vector<6xf32>
    %107 = vector.shape_cast %106 : vector<6xf32> to vector<6x1xf32>
    %cst_43 = arith.constant 3.200000e+01 : f32
    %108 = vector.broadcast %cst_43 : f32 to vector<6x1xf32>
    %109 = arith.divf %107, %108 : vector<6x1xf32>
    %110 = vector.broadcast %109 : vector<6x1xf32> to vector<6x32xf32>
    %111 = arith.subf %105, %110 : vector<6x32xf32>
    %112 = arith.mulf %111, %111 : vector<6x32xf32>
    %cst_44 = arith.constant dense<0.000000e+00> : vector<6xf32>
    %113 = vector.multi_reduction <add>, %112, %cst_44 [1] : vector<6x32xf32> to vector<6xf32>
    %114 = vector.shape_cast %113 : vector<6xf32> to vector<6x1xf32>
    %cst_45 = arith.constant 3.200000e+01 : f32
    %115 = vector.broadcast %cst_45 : f32 to vector<6x1xf32>
    %116 = arith.divf %114, %115 : vector<6x1xf32>
    %117 = vector.broadcast %109 : vector<6x1xf32> to vector<6x32xf32>
    %118 = arith.subf %105, %117 : vector<6x32xf32>
    %cst_46 = arith.constant 9.99999974E-6 : f32
    %119 = vector.broadcast %cst_46 : f32 to vector<6x1xf32>
    %120 = arith.addf %116, %119 : vector<6x1xf32>
    %121 = math.rsqrt %120 : vector<6x1xf32>
    %122 = vector.broadcast %121 : vector<6x1xf32> to vector<6x32xf32>
    %123 = arith.mulf %118, %122 : vector<6x32xf32>
    %c0_47 = arith.constant 0 : index
    %c0_48 = arith.constant 0 : index
    %124 = vector.load %arg8[%c0_47, %c0_48] : memref<1x32xf32, #tpu.memory_space<vmem>>, vector<1x32xf32>
    %125 = vector.broadcast %124 : vector<1x32xf32> to vector<6x32xf32>
    %126 = arith.mulf %123, %125 : vector<6x32xf32>
    %c0_49 = arith.constant 0 : index
    %c0_50 = arith.constant 0 : index
    %127 = vector.load %arg9[%c0_49, %c0_50] : memref<1x32xf32, #tpu.memory_space<vmem>>, vector<1x32xf32>
    %128 = vector.broadcast %127 : vector<1x32xf32> to vector<6x32xf32>
    %129 = arith.addf %126, %128 : vector<6x32xf32>
    %c0_51 = arith.constant 0 : index
    %c0_52 = arith.constant 0 : index
    %c0_53 = arith.constant 0 : index
    %130 = vector.load %arg10[%c0_51, %c0_52, %c0_53] : memref<1x6x32xf32, #tpu.memory_space<vmem>>, vector<1x6x32xf32>
    %131 = vector.shape_cast %130 : vector<1x6x32xf32> to vector<6x32xf32>
    %132 = vector.shape_cast %129 : vector<6x32xf32> to vector<1x6x32xf32>
    tpu.vector_store %arg10[%c0_51, %c0_52, %c0_53], %132 {strides = array<i32>} : memref<1x6x32xf32, #tpu.memory_space<vmem>>, vector<1x6x32xf32>,
    return
  }
  func.func @transform_0(%arg0: i32) -> (i32, i32, i32) {
    %c0_i32 = arith.constant 0 : i32
    %c0_i32_0 = arith.constant 0 : i32
    %c0_i32_1 = arith.constant 0 : i32
    return %arg0, %c0_i32, %c0_i32_0 : i32, i32, i32
  }
  func.func @transform_1(%arg0: i32) -> (i32, i32, i32) {
    %c0_i32 = arith.constant 0 : i32
    %c0_i32_0 = arith.constant 0 : i32
    %c0_i32_1 = arith.constant 0 : i32
    return %arg0, %c0_i32, %c0_i32_0 : i32, i32, i32
  }
  func.func @transform_2(%arg0: i32) -> (i32, i32) {
    %c0_i32 = arith.constant 0 : i32
    %c0_i32_0 = arith.constant 0 : i32
    %c0_i32_1 = arith.constant 0 : i32
    return %c0_i32, %c0_i32_0 : i32, i32
  }
  func.func @transform_3(%arg0: i32) -> (i32, i32) {
    %c0_i32 = arith.constant 0 : i32
    %c0_i32_0 = arith.constant 0 : i32
    %c0_i32_1 = arith.constant 0 : i32
    return %c0_i32, %c0_i32_0 : i32, i32
  }
  func.func @transform_4(%arg0: i32) -> (i32, i32) {
    %c0_i32 = arith.constant 0 : i32
    %c0_i32_0 = arith.constant 0 : i32
    %c0_i32_1 = arith.constant 0 : i32
    return %c0_i32, %c0_i32_0 : i32, i32
  }
  func.func @transform_5(%arg0: i32) -> (i32, i32) {
    %c0_i32 = arith.constant 0 : i32
    %c0_i32_0 = arith.constant 0 : i32
    %c0_i32_1 = arith.constant 0 : i32
    return %c0_i32, %c0_i32_0 : i32, i32
  }
  func.func @transform_6(%arg0: i32) -> (i32, i32, i32) {
    %c0_i32 = arith.constant 0 : i32
    %c0_i32_0 = arith.constant 0 : i32
    %c0_i32_1 = arith.constant 0 : i32
    return %arg0, %c0_i32, %c0_i32_0 : i32, i32, i32
  }
  func.func @transform_7(%arg0: i32) -> (i32, i32) {
    %c0_i32 = arith.constant 0 : i32
    %c0_i32_0 = arith.constant 0 : i32
    %c0_i32_1 = arith.constant 0 : i32
    return %c0_i32, %c0_i32_0 : i32, i32
  }
  func.func @transform_8(%arg0: i32) -> (i32, i32) {
    %c0_i32 = arith.constant 0 : i32
    %c0_i32_0 = arith.constant 0 : i32
    %c0_i32_1 = arith.constant 0 : i32
    return %c0_i32, %c0_i32_0 : i32, i32
  }
  func.func @transform_9(%arg0: i32) -> (i32, i32, i32) {
    %c0_i32 = arith.constant 0 : i32
    %c0_i32_0 = arith.constant 0 : i32
    %c0_i32_1 = arith.constant 0 : i32
    return %arg0, %c0_i32, %c0_i32_0 : i32, i32, i32
  }
}

module attributes {stable_mosaic.version = 11 : i64} {
  func.func @_final_proj_kernel(%arg0: i32, %arg1: memref<1x6x32xf32, #tpu.memory_space<vmem>>, %arg2: memref<32x16xf32, #tpu.memory_space<vmem>>, %arg3: memref<1x16xf32, #tpu.memory_space<vmem>>, %arg4: memref<1x6x16xf32, #tpu.memory_space<vmem>>) attributes {dimension_semantics = [#tpu.dimension_semantics<parallel>], iteration_bounds = array<i64: 2>, scalar_prefetch = 0 : i64, scratch_operands = 0 : i64, tpu.core_type = #tpu.core_type<tc>, window_params = [{transform_indices = @transform_0, window_bounds = array<i64: 1, 6, 32>}, {pipeline_mode = #tpu.pipeline_mode<synchronous>, transform_indices = @transform_1, window_bounds = array<i64: 32, 16>}, {pipeline_mode = #tpu.pipeline_mode<synchronous>, transform_indices = @transform_2, window_bounds = array<i64: 1, 16>}, {transform_indices = @transform_3, window_bounds = array<i64: 1, 6, 16>}]} {
    %c0 = arith.constant 0 : index
    %c0_0 = arith.constant 0 : index
    %c0_1 = arith.constant 0 : index
    %0 = vector.load %arg1[%c0, %c0_0, %c0_1] : memref<1x6x32xf32, #tpu.memory_space<vmem>>, vector<1x6x32xf32>
    %1 = vector.shape_cast %0 : vector<1x6x32xf32> to vector<6x32xf32>
    %c0_2 = arith.constant 0 : index
    %c0_3 = arith.constant 0 : index
    %2 = vector.load %arg2[%c0_2, %c0_3] : memref<32x16xf32, #tpu.memory_space<vmem>>, vector<32x16xf32>
    %cst = arith.constant dense<0.000000e+00> : vector<6x16xf32>
    %3 = tpu.matmul %1, %2, %cst {dimension_numbers = #tpu.dot_dimension_numbers<[1], [0], [0], [1], [0, 0, 1, 1], [], []>} : vector<6x32xf32>, vector<32x16xf32>, vector<6x16xf32> -> vector<6x16xf32>
    %c0_4 = arith.constant 0 : index
    %c0_5 = arith.constant 0 : index
    %4 = vector.load %arg3[%c0_4, %c0_5] : memref<1x16xf32, #tpu.memory_space<vmem>>, vector<1x16xf32>
    %5 = vector.broadcast %4 : vector<1x16xf32> to vector<6x16xf32>
    %6 = arith.addf %3, %5 : vector<6x16xf32>
    %c0_6 = arith.constant 0 : index
    %c0_7 = arith.constant 0 : index
    %c0_8 = arith.constant 0 : index
    %7 = vector.load %arg4[%c0_6, %c0_7, %c0_8] : memref<1x6x16xf32, #tpu.memory_space<vmem>>, vector<1x6x16xf32>
    %8 = vector.shape_cast %7 : vector<1x6x16xf32> to vector<6x16xf32>
    %9 = vector.shape_cast %6 : vector<6x16xf32> to vector<1x6x16xf32>
    tpu.vector_store %arg4[%c0_6, %c0_7, %c0_8], %9 {strides = array<i32>} : memref<1x6x16xf32, #tpu.memory_space<vmem>>, vector<1x6x16xf32>,
    return
  }
  func.func @transform_0(%arg0: i32) -> (i32, i32, i32) {
    %c0_i32 = arith.constant 0 : i32
    %c0_i32_0 = arith.constant 0 : i32
    %c0_i32_1 = arith.constant 0 : i32
    return %arg0, %c0_i32, %c0_i32_0 : i32, i32, i32
  }
  func.func @transform_1(%arg0: i32) -> (i32, i32) {
    %c0_i32 = arith.constant 0 : i32
    %c0_i32_0 = arith.constant 0 : i32
    %c0_i32_1 = arith.constant 0 : i32
    return %c0_i32, %c0_i32_0 : i32, i32
  }
  func.func @transform_2(%arg0: i32) -> (i32, i32) {
    %c0_i32 = arith.constant 0 : i32
    %c0_i32_0 = arith.constant 0 : i32
    %c0_i32_1 = arith.constant 0 : i32
    return %c0_i32, %c0_i32_0 : i32, i32
  }
  func.func @transform_3(%arg0: i32) -> (i32, i32, i32) {
    %c0_i32 = arith.constant 0 : i32
    %c0_i32_0 = arith.constant 0 : i32
    %c0_i32_1 = arith.constant 0 : i32
    return %arg0, %c0_i32, %c0_i32_0 : i32, i32, i32
  }
}

module attributes {stable_mosaic.version = 11 : i64} {
  func.func @_ffn_block_kernel(%arg0: i32, %arg1: memref<1x6x32xf32, #tpu.memory_space<vmem>>, %arg2: memref<32x64xf32, #tpu.memory_space<vmem>>, %arg3: memref<1x64xf32, #tpu.memory_space<vmem>>, %arg4: memref<64x32xf32, #tpu.memory_space<vmem>>, %arg5: memref<1x32xf32, #tpu.memory_space<vmem>>, %arg6: memref<1x32xf32, #tpu.memory_space<vmem>>, %arg7: memref<1x32xf32, #tpu.memory_space<vmem>>, %arg8: memref<1x6x32xf32, #tpu.memory_space<vmem>>) attributes {dimension_semantics = [#tpu.dimension_semantics<parallel>], iteration_bounds = array<i64: 2>, scalar_prefetch = 0 : i64, scratch_operands = 0 : i64, tpu.core_type = #tpu.core_type<tc>, window_params = [{transform_indices = @transform_0, window_bounds = array<i64: 1, 6, 32>}, {pipeline_mode = #tpu.pipeline_mode<synchronous>, transform_indices = @transform_1, window_bounds = array<i64: 32, 64>}, {pipeline_mode = #tpu.pipeline_mode<synchronous>, transform_indices = @transform_2, window_bounds = array<i64: 1, 64>}, {pipeline_mode = #tpu.pipeline_mode<synchronous>, transform_indices = @transform_3, window_bounds = array<i64: 64, 32>}, {pipeline_mode = #tpu.pipeline_mode<synchronous>, transform_indices = @transform_4, window_bounds = array<i64: 1, 32>}, {pipeline_mode = #tpu.pipeline_mode<synchronous>, transform_indices = @transform_5, window_bounds = array<i64: 1, 32>}, {pipeline_mode = #tpu.pipeline_mode<synchronous>, transform_indices = @transform_6, window_bounds = array<i64: 1, 32>}, {transform_indices = @transform_7, window_bounds = array<i64: 1, 6, 32>}]} {
    %c0 = arith.constant 0 : index
    %c0_0 = arith.constant 0 : index
    %c0_1 = arith.constant 0 : index
    %0 = vector.load %arg1[%c0, %c0_0, %c0_1] : memref<1x6x32xf32, #tpu.memory_space<vmem>>, vector<1x6x32xf32>
    %1 = vector.shape_cast %0 : vector<1x6x32xf32> to vector<6x32xf32>
    %c0_2 = arith.constant 0 : index
    %c0_3 = arith.constant 0 : index
    %2 = vector.load %arg2[%c0_2, %c0_3] : memref<32x64xf32, #tpu.memory_space<vmem>>, vector<32x64xf32>
    %cst = arith.constant dense<0.000000e+00> : vector<6x64xf32>
    %3 = tpu.matmul %1, %2, %cst {dimension_numbers = #tpu.dot_dimension_numbers<[1], [0], [0], [1], [0, 0, 1, 1], [], []>} : vector<6x32xf32>, vector<32x64xf32>, vector<6x64xf32> -> vector<6x64xf32>
    %c0_4 = arith.constant 0 : index
    %c0_5 = arith.constant 0 : index
    %4 = vector.load %arg3[%c0_4, %c0_5] : memref<1x64xf32, #tpu.memory_space<vmem>>, vector<1x64xf32>
    %5 = vector.broadcast %4 : vector<1x64xf32> to vector<6x64xf32>
    %6 = arith.addf %3, %5 : vector<6x64xf32>
    %cst_6 = arith.constant 0.000000e+00 : f32
    %7 = vector.broadcast %cst_6 : f32 to vector<6x64xf32>
    %8 = arith.maximumf %6, %7 : vector<6x64xf32>
    %c0_7 = arith.constant 0 : index
    %c0_8 = arith.constant 0 : index
    %9 = vector.load %arg4[%c0_7, %c0_8] : memref<64x32xf32, #tpu.memory_space<vmem>>, vector<64x32xf32>
    %cst_9 = arith.constant dense<0.000000e+00> : vector<6x32xf32>
    %10 = tpu.matmul %8, %9, %cst_9 {dimension_numbers = #tpu.dot_dimension_numbers<[1], [0], [0], [1], [0, 0, 1, 1], [], []>} : vector<6x64xf32>, vector<64x32xf32>, vector<6x32xf32> -> vector<6x32xf32>
    %c0_10 = arith.constant 0 : index
    %c0_11 = arith.constant 0 : index
    %11 = vector.load %arg5[%c0_10, %c0_11] : memref<1x32xf32, #tpu.memory_space<vmem>>, vector<1x32xf32>
    %12 = vector.broadcast %11 : vector<1x32xf32> to vector<6x32xf32>
    %13 = arith.addf %10, %12 : vector<6x32xf32>
    %14 = arith.addf %1, %13 : vector<6x32xf32>
    %cst_12 = arith.constant dense<0.000000e+00> : vector<6xf32>
    %15 = vector.multi_reduction <add>, %14, %cst_12 [1] : vector<6x32xf32> to vector<6xf32>
    %16 = vector.shape_cast %15 : vector<6xf32> to vector<6x1xf32>
    %cst_13 = arith.constant 3.200000e+01 : f32
    %17 = vector.broadcast %cst_13 : f32 to vector<6x1xf32>
    %18 = arith.divf %16, %17 : vector<6x1xf32>
    %19 = vector.broadcast %18 : vector<6x1xf32> to vector<6x32xf32>
    %20 = arith.subf %14, %19 : vector<6x32xf32>
    %21 = arith.mulf %20, %20 : vector<6x32xf32>
    %cst_14 = arith.constant dense<0.000000e+00> : vector<6xf32>
    %22 = vector.multi_reduction <add>, %21, %cst_14 [1] : vector<6x32xf32> to vector<6xf32>
    %23 = vector.shape_cast %22 : vector<6xf32> to vector<6x1xf32>
    %cst_15 = arith.constant 3.200000e+01 : f32
    %24 = vector.broadcast %cst_15 : f32 to vector<6x1xf32>
    %25 = arith.divf %23, %24 : vector<6x1xf32>
    %26 = vector.broadcast %18 : vector<6x1xf32> to vector<6x32xf32>
    %27 = arith.subf %14, %26 : vector<6x32xf32>
    %cst_16 = arith.constant 9.99999974E-6 : f32
    %28 = vector.broadcast %cst_16 : f32 to vector<6x1xf32>
    %29 = arith.addf %25, %28 : vector<6x1xf32>
    %30 = math.rsqrt %29 : vector<6x1xf32>
    %31 = vector.broadcast %30 : vector<6x1xf32> to vector<6x32xf32>
    %32 = arith.mulf %27, %31 : vector<6x32xf32>
    %c0_17 = arith.constant 0 : index
    %c0_18 = arith.constant 0 : index
    %33 = vector.load %arg6[%c0_17, %c0_18] : memref<1x32xf32, #tpu.memory_space<vmem>>, vector<1x32xf32>
    %34 = vector.broadcast %33 : vector<1x32xf32> to vector<6x32xf32>
    %35 = arith.mulf %32, %34 : vector<6x32xf32>
    %c0_19 = arith.constant 0 : index
    %c0_20 = arith.constant 0 : index
    %36 = vector.load %arg7[%c0_19, %c0_20] : memref<1x32xf32, #tpu.memory_space<vmem>>, vector<1x32xf32>
    %37 = vector.broadcast %36 : vector<1x32xf32> to vector<6x32xf32>
    %38 = arith.addf %35, %37 : vector<6x32xf32>
    %c0_21 = arith.constant 0 : index
    %c0_22 = arith.constant 0 : index
    %c0_23 = arith.constant 0 : index
    %39 = vector.load %arg8[%c0_21, %c0_22, %c0_23] : memref<1x6x32xf32, #tpu.memory_space<vmem>>, vector<1x6x32xf32>
    %40 = vector.shape_cast %39 : vector<1x6x32xf32> to vector<6x32xf32>
    %41 = vector.shape_cast %38 : vector<6x32xf32> to vector<1x6x32xf32>
    tpu.vector_store %arg8[%c0_21, %c0_22, %c0_23], %41 {strides = array<i32>} : memref<1x6x32xf32, #tpu.memory_space<vmem>>, vector<1x6x32xf32>,
    return
  }
  func.func @transform_0(%arg0: i32) -> (i32, i32, i32) {
    %c0_i32 = arith.constant 0 : i32
    %c0_i32_0 = arith.constant 0 : i32
    %c0_i32_1 = arith.constant 0 : i32
    return %arg0, %c0_i32, %c0_i32_0 : i32, i32, i32
  }
  func.func @transform_1(%arg0: i32) -> (i32, i32) {
    %c0_i32 = arith.constant 0 : i32
    %c0_i32_0 = arith.constant 0 : i32
    %c0_i32_1 = arith.constant 0 : i32
    return %c0_i32, %c0_i32_0 : i32, i32
  }
  func.func @transform_2(%arg0: i32) -> (i32, i32) {
    %c0_i32 = arith.constant 0 : i32
    %c0_i32_0 = arith.constant 0 : i32
    %c0_i32_1 = arith.constant 0 : i32
    return %c0_i32, %c0_i32_0 : i32, i32
  }
  func.func @transform_3(%arg0: i32) -> (i32, i32) {
    %c0_i32 = arith.constant 0 : i32
    %c0_i32_0 = arith.constant 0 : i32
    %c0_i32_1 = arith.constant 0 : i32
    return %c0_i32, %c0_i32_0 : i32, i32
  }
  func.func @transform_4(%arg0: i32) -> (i32, i32) {
    %c0_i32 = arith.constant 0 : i32
    %c0_i32_0 = arith.constant 0 : i32
    %c0_i32_1 = arith.constant 0 : i32
    return %c0_i32, %c0_i32_0 : i32, i32
  }
  func.func @transform_5(%arg0: i32) -> (i32, i32) {
    %c0_i32 = arith.constant 0 : i32
    %c0_i32_0 = arith.constant 0 : i32
    %c0_i32_1 = arith.constant 0 : i32
    return %c0_i32, %c0_i32_0 : i32, i32
  }
  func.func @transform_6(%arg0: i32) -> (i32, i32) {
    %c0_i32 = arith.constant 0 : i32
    %c0_i32_0 = arith.constant 0 : i32
    %c0_i32_1 = arith.constant 0 : i32
    return %c0_i32, %c0_i32_0 : i32, i32
  }
  func.func @transform_7(%arg0: i32) -> (i32, i32, i32) {
    %c0_i32 = arith.constant 0 : i32
    %c0_i32_0 = arith.constant 0 : i32
    %c0_i32_1 = arith.constant 0 : i32
    return %arg0, %c0_i32, %c0_i32_0 : i32, i32, i32
  }
}

</mosaic_0001>

<bundles_post_ra>
// kernel: forward.21
= control target key start
LH: loop header
LB: loop body
LE: loop exit
PB: predicated region body
PF: predicated region fallthrough
CT: control target
= control target key end

     0   :  { %s409_s15 = smov 0   ;;  %s444_s0 = inlined_call_operand.vmem [shape: f32[2,4,32], index: 0, kind: input, shape index: {}]   ;;  %s445_s1 = inlined_call_operand.vmem [shape: f32[32,32], index: 1, kind: input, shape index: {}]   ;;  %s446_s2 = inlined_call_operand.vmem [shape: f32[1,32], index: 2, kind: input, shape index: {}]   ;;  %s447_s3 = inlined_call_operand.vmem [shape: f32[4,32], index: 3, kind: input, shape index: {}]   ;;  %s448_s4 = inlined_call_operand.vmem [shape: f32[2,4,32], index: 4, kind: output, shape index: {}]  }
   0x1 LB: > { %s337_s16 = sadd.s32 4294967295, %s380_s15   ;;  %p341_p0 = scmp.ge.s32.totalorder %s380_s15, 1  ;;  %s380_s15 = sphi %s409_s15, %s14_s15  }
   0x2   : > { %p161_p1 = scmp.lt.s32.totalorder %s380_s15, 3 }
   0x4   : > { %p162_p2 = pnand %p341_p0, %p161_p1 }
   0x5   : > { %p185_p3 = scmp.lt.s32.totalorder (!%p162_p2), %s337_s16, 1 }
   0x6   : > { %165 = sbr.rel (%p162_p2) target bundleno = 220 (0xdc), region = 36 }
   0xb   : > { %v197_v0 = vld [vmem:[%s445_s1 + $0x18] sm:$0xff]  ;;  %v382_v1 = vmov 0.0   ;;  %v196_v2 = vld [vmem:[%s445_s1 + $0x10] sm:$0xff]  ;;  %vm383_vm0 = vmmov 0   ;;  %s450_s16 = smov (!%p185_p3, %s337_s16), 1  ;;  %v195_v3 = vld [vmem:[%s445_s1 + $0x8] sm:$0xff] }
   0xc   : > { %353 = vmatprep.subr.mxu0 %v382_v1  ;;  %361 = vmatprep.mubr.msk.f32.mxu0 %vm383_vm0, %v382_v1  ;;  %s342_s23 = sshll.u32 %s450_s16, 2  ;;  %v194_v4 = vld [vmem:[%s445_s1] sm:$0xff]  ;;  %vm205_vm1 = vcmask 261120   ;;  %vm282_vm2 = vcmask 257024  }
   0xd   : > { %354 = vmatpush3.msra.mxu0 %v197_v0  ;;  %s188_s28 = scalar_lea.vmem %s444_s0, %s342_s23  ;;  %v344_v6 = vld [vmem:[%s446_s2] ss:$0 sm:$0xff]  ;;  %s192_s9 = scalar_lea.vmem %s448_s4, %s342_s23 }
   0xe   : > { %355 = vmatprep.subr.mxu0 %v382_v1  ;;  %v193_v5 = vld [vmem:[%s188_s28] sm:$0xf] }
   0xf   : > { %356 = vmatpush3.msra.mxu0 %v196_v2  ;;  %v280_v9 = vld [vmem:[%s447_s3] sm:$0xf] }
  0x10   : > { %357 = vmatprep.subr.mxu0 %v382_v1 }
  0x11   : > { %358 = vmatpush3.msra.mxu0 %v195_v3 }
  0x12   : > { %359 = vmatprep.subr.mxu0 %v382_v1 }
  0x13   : > { %360 = vmatpush3.msra.mxu0 %v194_v4 }
  0x14   : > { %362 = vmatmul.mubr.msk.f32.vlgmr.msra.gmra.mxu0 %vm205_vm1, %v193_v5 }
  0xd4   : > { %v275_v7 = vpop.f32.mrf.mxu0 }
  0xd5   : > { %v276_v8 = vadd.f32 %v344_v6, %v275_v7 }
  0xd6   : > { %v363_v10 = vpop.f32.mrf.mxu0 }
  0xd7   : > { %v279_v11 = vmul.f32 5.656854, %v276_v8 }
  0xd9   : > { %v281_v12 = vadd.f32 %v280_v9, %v279_v11 }
  0xdb   : > { %283 = vst.msk [vmem:[%s192_s9] sm:$0xf] %vm282_vm2, %v281_v12 }
  0xdc PF: > { %s14_s15 = sadd.s32 1, %s380_s15  }
  0xdd   : > { %p11_p4 = scmp.ge.s32.totalorder %s14_s15, 4  }
  0xdf   :  { %13 = sbr.rel (!%p11_p4) target bundleno = 1 (0x1), region = 66 }

// kernel: forward.18
= control target key start
LH: loop header
LB: loop body
LE: loop exit
PB: predicated region body
PF: predicated region fallthrough
CT: control target
= control target key end

     0   :  { %s1270_s12 = smov 0   ;;  %s1361_s0 = inlined_call_operand.vmem [shape: f32[2,20,5,8], index: 0, kind: input, shape index: {}]   ;;  %s1362_s1 = inlined_call_operand.vmem [shape: f32[9,8,8], index: 1, kind: input, shape index: {}]   ;;  %s1363_s2 = inlined_call_operand.vmem [shape: f32[1,8], index: 2, kind: input, shape index: {}]   ;;  %s1364_s3 = inlined_call_operand.vmem [shape: f32[2,16,8], index: 3, kind: output, shape index: {}]  }
   0x1 LB: > { %s1077_s13 = sadd.s32 4294967295, %s1248_s12   ;;  %p1081_p0 = scmp.ge.s32.totalorder %s1248_s12, 1  ;;  %s1248_s12 = sphi %s1270_s12, %s13_s12  }
   0x2   : > { %p137_p1 = scmp.lt.s32.totalorder %s1248_s12, 3 }
   0x4   : > { %p138_p2 = pnand %p1081_p0, %p137_p1 }
   0x5   : > { %p161_p3 = scmp.lt.s32.totalorder (!%p138_p2), %s1077_s13, 1 }
   0x6   : > { %141 = sbr.rel (%p138_p2) target bundleno = 235 (0xeb), region = 32 }
   0xb   : > { %v1089_v0 = vld [vmem:[%s1362_s1 + $0x8] sm:$0xff]  ;;  %v175_v1 = vld [vmem:[%s1362_s1] sm:$0xff]  ;;  %v1094_v2 = vld [vmem:[%s1362_s1 + $0x10] sm:$0xff]  ;;  %s1366_s13 = smov (!%p161_p3, %s1077_s13), 1  ;;  %vm189_vm0 = vcmask 64512  }
   0xc   : > { %1170 = vmatprep.subr.mxu0 %v1089_v0  ;;  %1175 = vmatprep.subr.mxu1 %v175_v1  ;;  %v1101_v3 = vld [vmem:[%s1362_s1 + $0x18] sm:$0xff]  ;;  %s1215_s22 = smul.u32 160, %s1366_s13  ;;  %v1108_v7 = vld [vmem:[%s1362_s1 + $0x20] sm:$0xff]  ;;  %v1115_v9 = vld [vmem:[%s1362_s1 + $0x28] sm:$0xff]  ;;  %s1142_s11 = sshll.u32 %s1366_s13, 4 }
   0xd   : > { %1171 = vmatpush3.msra.mxu0 %v1089_v0  ;;  %1176 = vmatpush3.msra.mxu1 %v175_v1  ;;  %v1122_v13 = vld [vmem:[%s1362_s1 + $0x30] sm:$0xff]  ;;  %v1129_v15 = vld [vmem:[%s1362_s1 + $0x38] sm:$0xff]  ;;  %v1136_v19 = vld [vmem:[%s1362_s1 + $0x40] sm:$0xff]  ;;  %s170_s16 = scalar_lea.vmem %s1364_s3, %s1142_s11 }
   0xe   : > { %1180 = vmatprep.subr.mxu0 %v1094_v2  ;;  %1185 = vmatprep.subr.mxu1 %v1101_v3  ;;  %s1296_s25 = scalar_lea.vmem %s1361_s0, %s1215_s22  ;;  %v1139_v57 = vld [vmem:[%s1363_s2] ss:$0 sm:$0xff] }
   0xf   : > { %v1224_v4 = vld [vmem:[%s1296_s25 + $0x28] ss:$8 sps:$4 sm:$0xff]   ;;  %v1226_v6 = vld [vmem:[%s1296_s25 + $0x38] ss:$8 sps:$4 sm:$0xff]  }
  0x10   : > { %v1225_v5 = vld [vmem:[%s1296_s25] ss:$8 sps:$4 sm:$0xff]   ;;  %1172 = vmatprep.mubr.msk.f32.mxu0 %vm189_vm0, %v1224_v4  ;;  %v1227_v8 = vld [vmem:[%s1296_s25 + $0x10] ss:$8 sps:$4 sm:$0xff]  }
  0x11   : > { %1177 = vmatprep.mubr.msk.f32.mxu1 %vm189_vm0, %v1225_v5  ;;  %1173 = vmatmul.mubr.msk.f32.vlgmr.msra.gmra.mxu0 %vm189_vm0, %v1226_v6  ;;  %v1228_v10 = vld [vmem:[%s1296_s25 + $0x1] ss:$8 sps:$4 sm:$0xff]   ;;  %v1229_v11 = vld [vmem:[%s1296_s25 + $0x50] ss:$8 sps:$4 sm:$0xff]  }
  0x12   : > { %1178 = vmatmul.mubr.msk.f32.vlgmr.msra.gmra.mxu1 %vm189_vm0, %v1227_v8  ;;  %1181 = vmatpush3.msra.mxu0 %v1094_v2  ;;  %v1230_v12 = vld [vmem:[%s1296_s25 + $0x11] ss:$8 sps:$4 sm:$0xff]   ;;  %v1231_v14 = vld [vmem:[%s1296_s25 + $0x60] ss:$8 sps:$4 sm:$0xff]  }
  0x13   : > { %1186 = vmatpush3.msra.mxu1 %v1101_v3  ;;  %1182 = vmatprep.mubr.msk.f32.mxu0 %vm189_vm0, %v1228_v10  ;;  %v1232_v16 = vld [vmem:[%s1296_s25 + $0x78] ss:$8 sps:$4 sm:$0xff]   ;;  %v1234_v18 = vld [vmem:[%s1296_s25 + $0x88] ss:$8 sps:$4 sm:$0xff]  }
  0x14   : > { %1187 = vmatprep.mubr.msk.f32.mxu1 %vm189_vm0, %v1229_v11  ;;  %1190 = vmatprep.subr.mxu0 %v1108_v7  ;;  %v1233_v17 = vld [vmem:[%s1296_s25 + $0x51] ss:$8 sps:$4 sm:$0xff]   ;;  %v1235_v20 = vld [vmem:[%s1296_s25 + $0x61] ss:$8 sps:$4 sm:$0xff]  }
  0x15   : > { %1183 = vmatmul.mubr.msk.f32.vlgmr.msra.gmra.mxu0 %vm189_vm0, %v1230_v12  ;;  %1195 = vmatprep.subr.mxu1 %v1115_v9  ;;  %v1236_v21 = vld [vmem:[%s1296_s25 + $0x8] ss:$8 sps:$4 sm:$0xff]   ;;  %v1238_v23 = vld [vmem:[%s1296_s25 + $0x18] ss:$8 sps:$4 sm:$0xff]  }
  0x16   : > { %1188 = vmatmul.mubr.msk.f32.vlgmr.msra.gmra.mxu1 %vm189_vm0, %v1231_v14  ;;  %1191 = vmatpush3.msra.mxu0 %v1108_v7  ;;  %v1237_v22 = vld [vmem:[%s1296_s25 + $0x30] ss:$8 sps:$4 sm:$0xff]   ;;  %v1239_v24 = vld [vmem:[%s1296_s25 + $0x40] ss:$8 sps:$4 sm:$0xff]  }
  0x17   : > { %1196 = vmatpush3.msra.mxu1 %v1115_v9  ;;  %1192 = vmatprep.mubr.msk.f32.mxu0 %vm189_vm0, %v1232_v16  ;;  %v1240_v25 = vld [vmem:[%s1296_s25 + $0x9] ss:$8 sps:$4 sm:$0xff]   ;;  %v1241_v26 = vld [vmem:[%s1296_s25 + $0x19] ss:$8 sps:$4 sm:$0xff]  }
  0x18   : > { %1197 = vmatprep.mubr.msk.f32.mxu1 %vm189_vm0, %v1233_v17  ;;  %1200 = vmatprep.subr.mxu0 %v1122_v13 }
  0x19   : > { %1193 = vmatmul.mubr.msk.f32.vlgmr.msra.gmra.mxu0 %vm189_vm0, %v1234_v18  ;;  %1205 = vmatprep.subr.mxu1 %v1129_v15 }
  0x1a   : > { %1198 = vmatmul.mubr.msk.f32.vlgmr.msra.gmra.mxu1 %vm189_vm0, %v1235_v20  ;;  %1201 = vmatpush3.msra.mxu0 %v1122_v13 }
  0x1b   : > { %1206 = vmatpush3.msra.mxu1 %v1129_v15  ;;  %1202 = vmatprep.mubr.msk.f32.mxu0 %vm189_vm0, %v1236_v21 }
  0x1c   : > { %1207 = vmatprep.mubr.msk.f32.mxu1 %vm189_vm0, %v1237_v22  ;;  %1210 = vmatprep.subr.mxu0 %v1136_v19 }
  0x1d   : > { %1203 = vmatmul.mubr.msk.f32.vlgmr.msra.gmra.mxu0 %vm189_vm0, %v1238_v23 }
  0x1e   : > { %1208 = vmatmul.mubr.msk.f32.vlgmr.msra.gmra.mxu1 %vm189_vm0, %v1239_v24  ;;  %1211 = vmatpush3.msra.mxu0 %v1136_v19 }
  0x1f   : > { %1212 = vmatprep.mubr.msk.f32.mxu0 %vm189_vm0, %v1240_v25 }
  0x21   : > { %1213 = vmatmul.mubr.msk.f32.vlgmr.msra.gmra.mxu0 %vm189_vm0, %v1241_v26 }
  0xd1   : > { %v1174_v27 = vpop.f32.mrf.mxu0 }
  0xd2   : > { %v1179_v28 = vpop.f32.mrf.mxu1 }
  0xd3   : > { %v260_v29 = vpop.f32.mrf.mxu0  ;;  %v351_v30 = vadd.f32 %v1179_v28, %v1174_v27 }
  0xd4   : > { %v345_v31 = vpop.f32.mrf.mxu1 }
  0xd5   : > { %v1184_v32 = vpop.f32.mrf.mxu0  ;;  %v346_v33 = vadd.f32 %v345_v31, %v260_v29 }
  0xd6   : > { %v446_v34 = vadd.f32 %v1184_v32, %v351_v30  ;;  %v1189_v35 = vpop.f32.mrf.mxu1 }
  0xd7   : > { %v436_v36 = vpop.f32.mrf.mxu0 }
  0xd8   : > { %v540_v37 = vadd.f32 %v1189_v35, %v446_v34  ;;  %v445_v38 = vadd.f32 %v436_v36, %v346_v33  ;;  %v530_v39 = vpop.f32.mrf.mxu1 }
  0xd9   : > { %v1194_v40 = vpop.f32.mrf.mxu0 }
  0xda   : > { %v539_v41 = vadd.f32 %v530_v39, %v445_v38  ;;  %v634_v42 = vadd.f32 %v1194_v40, %v540_v37  ;;  %v1199_v43 = vpop.f32.mrf.mxu1 }
  0xdb   : > { %v624_v44 = vpop.f32.mrf.mxu0 }
  0xdc   : > { %v727_v45 = vadd.f32 %v1199_v43, %v634_v42  ;;  %v633_v46 = vadd.f32 %v624_v44, %v539_v41  ;;  %v717_v47 = vpop.f32.mrf.mxu1 }
  0xdd   : > { %v1204_v48 = vpop.f32.mrf.mxu0 }
  0xde   : > { %v726_v49 = vadd.f32 %v717_v47, %v633_v46  ;;  %v821_v50 = vadd.f32 %v1204_v48, %v727_v45  ;;  %v1209_v51 = vpop.f32.mrf.mxu1 }
  0xdf   : > { %v811_v52 = vpop.f32.mrf.mxu0 }
  0xe0   : > { %v915_v53 = vadd.f32 %v1209_v51, %v821_v50  ;;  %v820_v54 = vadd.f32 %v811_v52, %v726_v49  ;;  %v905_v55 = vpop.f32.mrf.mxu1 }
  0xe1   : > { %v1214_v56 = vpop.f32.mrf.mxu0 }
  0xe2   : > { %v914_v58 = vadd.f32 %v905_v55, %v820_v54  ;;  %v1008_v59 = vadd.f32 %v1214_v56, %v915_v53 }
  0xe3   : > { %v998_v60 = vpop.f32.mrf.mxu0 }
  0xe4   : > { %v1017_v61 = vadd.f32 %v1139_v57, %v1008_v59  ;;  %v1007_v62 = vadd.f32 %v998_v60, %v914_v58 }
  0xe6   : > { %v1019_v63 = vmax.f32 %v1017_v61, 0.0  ;;  %v1016_v0 = vadd.f32 %v1139_v57, %v1007_v62 }
  0xe8   : > { %1021 = vst.msk [vmem:[%s170_s16 + $0x8] sm:$0xff] %vm189_vm0, %v1019_v63  ;;  %v1018_v1 = vmax.f32 %v1016_v0, 0.0 }
  0xea   : > { %1020 = vst.msk [vmem:[%s170_s16] sm:$0xff] %vm189_vm0, %v1018_v1 }
  0xeb PF: > { %s13_s12 = sadd.s32 1, %s1248_s12  }
  0xec   : > { %p10_p4 = scmp.ge.s32.totalorder %s13_s12, 4  }
  0xee   :  { %12 = sbr.rel (!%p10_p4) target bundleno = 1 (0x1), region = 75 }

// kernel: forward.19
= control target key start
LH: loop header
LB: loop body
LE: loop exit
PB: predicated region body
PF: predicated region fallthrough
CT: control target
= control target key end

     0   :  { %s1263_s12 = smov 0   ;;  %s1354_s0 = inlined_call_operand.vmem [shape: f32[2,6,6,8], index: 0, kind: input, shape index: {}]   ;;  %s1355_s1 = inlined_call_operand.vmem [shape: f32[9,8,8], index: 1, kind: input, shape index: {}]   ;;  %s1356_s2 = inlined_call_operand.vmem [shape: f32[1,8], index: 2, kind: input, shape index: {}]   ;;  %s1357_s3 = inlined_call_operand.vmem [shape: f32[2,16,8], index: 3, kind: output, shape index: {}]  }
   0x1 LB: > { %s1074_s13 = sadd.s32 4294967295, %s1241_s12   ;;  %p1078_p0 = scmp.ge.s32.totalorder %s1241_s12, 1  ;;  %s1241_s12 = sphi %s1263_s12, %s13_s12  }
   0x2   : > { %p137_p1 = scmp.lt.s32.totalorder %s1241_s12, 3 }
   0x4   : > { %p138_p2 = pnand %p1078_p0, %p137_p1 }
   0x5   : > { %p161_p3 = scmp.lt.s32.totalorder (!%p138_p2), %s1074_s13, 1 }
   0x6   : > { %141 = sbr.rel (%p138_p2) target bundleno = 235 (0xeb), region = 32 }
   0xb   : > { %v1082_v0 = vld [vmem:[%s1355_s1 + $0x8] sm:$0xff]  ;;  %v175_v1 = vld [vmem:[%s1355_s1] sm:$0xff]  ;;  %v1087_v2 = vld [vmem:[%s1355_s1 + $0x10] sm:$0xff]  ;;  %s1359_s13 = smov (!%p161_p3, %s1074_s13), 1  ;;  %vm188_vm0 = vcmask 64512  }
   0xc   : > { %1163 = vmatprep.subr.mxu0 %v1082_v0  ;;  %1168 = vmatprep.subr.mxu1 %v175_v1  ;;  %v1094_v3 = vld [vmem:[%s1355_s1 + $0x18] sm:$0xff]  ;;  %s1208_s22 = smul.u32 48, %s1359_s13  ;;  %v1101_v7 = vld [vmem:[%s1355_s1 + $0x20] sm:$0xff]  ;;  %v1108_v9 = vld [vmem:[%s1355_s1 + $0x28] sm:$0xff]  ;;  %s1135_s11 = sshll.u32 %s1359_s13, 4 }
   0xd   : > { %1164 = vmatpush3.msra.mxu0 %v1082_v0  ;;  %1169 = vmatpush3.msra.mxu1 %v175_v1  ;;  %v1115_v13 = vld [vmem:[%s1355_s1 + $0x30] sm:$0xff]  ;;  %v1122_v15 = vld [vmem:[%s1355_s1 + $0x38] sm:$0xff]  ;;  %v1129_v19 = vld [vmem:[%s1355_s1 + $0x40] sm:$0xff]  ;;  %s170_s16 = scalar_lea.vmem %s1357_s3, %s1135_s11 }
   0xe   : > { %1173 = vmatprep.subr.mxu0 %v1087_v2  ;;  %1178 = vmatprep.subr.mxu1 %v1094_v3  ;;  %s1289_s25 = scalar_lea.vmem %s1354_s0, %s1208_s22  ;;  %v1132_v57 = vld [vmem:[%s1356_s2] ss:$0 sm:$0xff] }
   0xf   : > { %v1217_v4 = vld [vmem:[%s1289_s25 + $0x1] ss:$8 sps:$4 sm:$0xff]   ;;  %v1219_v6 = vld [vmem:[%s1289_s25 + $0x11] ss:$8 sps:$4 sm:$0xff]  }
  0x10   : > { %v1218_v5 = vld [vmem:[%s1289_s25] ss:$8 sps:$4 sm:$0xff]   ;;  %1165 = vmatprep.mubr.msk.f32.mxu0 %vm188_vm0, %v1217_v4  ;;  %v1220_v8 = vld [vmem:[%s1289_s25 + $0x10] ss:$8 sps:$4 sm:$0xff]  }
  0x11   : > { %1170 = vmatprep.mubr.msk.f32.mxu1 %vm188_vm0, %v1218_v5  ;;  %1166 = vmatmul.mubr.msk.f32.vlgmr.msra.gmra.mxu0 %vm188_vm0, %v1219_v6  ;;  %v1221_v10 = vld [vmem:[%s1289_s25 + $0x2] ss:$8 sps:$4 sm:$0xff]   ;;  %v1223_v12 = vld [vmem:[%s1289_s25 + $0x12] ss:$8 sps:$4 sm:$0xff]  }
  0x12   : > { %1171 = vmatmul.mubr.msk.f32.vlgmr.msra.gmra.mxu1 %vm188_vm0, %v1220_v8  ;;  %1174 = vmatpush3.msra.mxu0 %v1087_v2  ;;  %v1222_v11 = vld [vmem:[%s1289_s25 + $0x8] ss:$8 sps:$4 sm:$0xff]   ;;  %v1224_v14 = vld [vmem:[%s1289_s25 + $0x18] ss:$8 sps:$4 sm:$0xff]  }
  0x13   : > { %1179 = vmatpush3.msra.mxu1 %v1094_v3  ;;  %1175 = vmatprep.mubr.msk.f32.mxu0 %vm188_vm0, %v1221_v10  ;;  %v1225_v16 = vld [vmem:[%s1289_s25 + $0x9] ss:$8 sps:$4 sm:$0xff]   ;;  %v1227_v18 = vld [vmem:[%s1289_s25 + $0x19] ss:$8 sps:$4 sm:$0xff]  }
  0x14   : > { %1180 = vmatprep.mubr.msk.f32.mxu1 %vm188_vm0, %v1222_v11  ;;  %1183 = vmatprep.subr.mxu0 %v1101_v7  ;;  %v1226_v17 = vld [vmem:[%s1289_s25 + $0xa] ss:$8 sps:$4 sm:$0xff]   ;;  %v1228_v20 = vld [vmem:[%s1289_s25 + $0x1a] ss:$8 sps:$4 sm:$0xff]  }
  0x15   : > { %1176 = vmatmul.mubr.msk.f32.vlgmr.msra.gmra.mxu0 %vm188_vm0, %v1223_v12  ;;  %1188 = vmatprep.subr.mxu1 %v1108_v9  ;;  %v1229_v21 = vld [vmem:[%s1289_s25 + $0x10] ss:$8 sps:$4 sm:$0xff]   ;;  %v1231_v23 = vld [vmem:[%s1289_s25 + $0x20] ss:$8 sps:$4 sm:$0xff]  }
  0x16   : > { %1181 = vmatmul.mubr.msk.f32.vlgmr.msra.gmra.mxu1 %vm188_vm0, %v1224_v14  ;;  %1184 = vmatpush3.msra.mxu0 %v1101_v7  ;;  %v1230_v22 = vld [vmem:[%s1289_s25 + $0x11] ss:$8 sps:$4 sm:$0xff]   ;;  %v1232_v24 = vld [vmem:[%s1289_s25 + $0x21] ss:$8 sps:$4 sm:$0xff]  }
  0x17   : > { %1189 = vmatpush3.msra.mxu1 %v1108_v9  ;;  %1185 = vmatprep.mubr.msk.f32.mxu0 %vm188_vm0, %v1225_v16  ;;  %v1233_v25 = vld [vmem:[%s1289_s25 + $0x12] ss:$8 sps:$4 sm:$0xff]   ;;  %v1234_v26 = vld [vmem:[%s1289_s25 + $0x22] ss:$8 sps:$4 sm:$0xff]  }
  0x18   : > { %1190 = vmatprep.mubr.msk.f32.mxu1 %vm188_vm0, %v1226_v17  ;;  %1193 = vmatprep.subr.mxu0 %v1115_v13 }
  0x19   : > { %1186 = vmatmul.mubr.msk.f32.vlgmr.msra.gmra.mxu0 %vm188_vm0, %v1227_v18  ;;  %1198 = vmatprep.subr.mxu1 %v1122_v15 }
  0x1a   : > { %1191 = vmatmul.mubr.msk.f32.vlgmr.msra.gmra.mxu1 %vm188_vm0, %v1228_v20  ;;  %1194 = vmatpush3.msra.mxu0 %v1115_v13 }
  0x1b   : > { %1199 = vmatpush3.msra.mxu1 %v1122_v15  ;;  %1195 = vmatprep.mubr.msk.f32.mxu0 %vm188_vm0, %v1229_v21 }
  0x1c   : > { %1200 = vmatprep.mubr.msk.f32.mxu1 %vm188_vm0, %v1230_v22  ;;  %1203 = vmatprep.subr.mxu0 %v1129_v19 }
  0x1d   : > { %1196 = vmatmul.mubr.msk.f32.vlgmr.msra.gmra.mxu0 %vm188_vm0, %v1231_v23 }
  0x1e   : > { %1201 = vmatmul.mubr.msk.f32.vlgmr.msra.gmra.mxu1 %vm188_vm0, %v1232_v24  ;;  %1204 = vmatpush3.msra.mxu0 %v1129_v19 }
  0x1f   : > { %1205 = vmatprep.mubr.msk.f32.mxu0 %vm188_vm0, %v1233_v25 }
  0x21   : > { %1206 = vmatmul.mubr.msk.f32.vlgmr.msra.gmra.mxu0 %vm188_vm0, %v1234_v26 }
  0xd1   : > { %v1167_v27 = vpop.f32.mrf.mxu0 }
  0xd2   : > { %v1172_v28 = vpop.f32.mrf.mxu1 }
  0xd3   : > { %v259_v29 = vpop.f32.mrf.mxu0  ;;  %v350_v30 = vadd.f32 %v1172_v28, %v1167_v27 }
  0xd4   : > { %v344_v31 = vpop.f32.mrf.mxu1 }
  0xd5   : > { %v1177_v32 = vpop.f32.mrf.mxu0  ;;  %v345_v33 = vadd.f32 %v344_v31, %v259_v29 }
  0xd6   : > { %v445_v34 = vadd.f32 %v1177_v32, %v350_v30  ;;  %v1182_v35 = vpop.f32.mrf.mxu1 }
  0xd7   : > { %v435_v36 = vpop.f32.mrf.mxu0 }
  0xd8   : > { %v539_v37 = vadd.f32 %v1182_v35, %v445_v34  ;;  %v444_v38 = vadd.f32 %v435_v36, %v345_v33  ;;  %v529_v39 = vpop.f32.mrf.mxu1 }
  0xd9   : > { %v1187_v40 = vpop.f32.mrf.mxu0 }
  0xda   : > { %v538_v41 = vadd.f32 %v529_v39, %v444_v38  ;;  %v632_v42 = vadd.f32 %v1187_v40, %v539_v37  ;;  %v1192_v43 = vpop.f32.mrf.mxu1 }
  0xdb   : > { %v622_v44 = vpop.f32.mrf.mxu0 }
  0xdc   : > { %v725_v45 = vadd.f32 %v1192_v43, %v632_v42  ;;  %v631_v46 = vadd.f32 %v622_v44, %v538_v41  ;;  %v715_v47 = vpop.f32.mrf.mxu1 }
  0xdd   : > { %v1197_v48 = vpop.f32.mrf.mxu0 }
  0xde   : > { %v724_v49 = vadd.f32 %v715_v47, %v631_v46  ;;  %v819_v50 = vadd.f32 %v1197_v48, %v725_v45  ;;  %v1202_v51 = vpop.f32.mrf.mxu1 }
  0xdf   : > { %v809_v52 = vpop.f32.mrf.mxu0 }
  0xe0   : > { %v912_v53 = vadd.f32 %v1202_v51, %v819_v50  ;;  %v818_v54 = vadd.f32 %v809_v52, %v724_v49  ;;  %v902_v55 = vpop.f32.mrf.mxu1 }
  0xe1   : > { %v1207_v56 = vpop.f32.mrf.mxu0 }
  0xe2   : > { %v911_v58 = vadd.f32 %v902_v55, %v818_v54  ;;  %v1005_v59 = vadd.f32 %v1207_v56, %v912_v53 }
  0xe3   : > { %v995_v60 = vpop.f32.mrf.mxu0 }
  0xe4   : > { %v1014_v61 = vadd.f32 %v1132_v57, %v1005_v59  ;;  %v1004_v62 = vadd.f32 %v995_v60, %v911_v58 }
  0xe6   : > { %v1016_v63 = vmax.f32 %v1014_v61, 0.0  ;;  %v1013_v0 = vadd.f32 %v1132_v57, %v1004_v62 }
  0xe8   : > { %1018 = vst.msk [vmem:[%s170_s16 + $0x8] sm:$0xff] %vm188_vm0, %v1016_v63  ;;  %v1015_v1 = vmax.f32 %v1013_v0, 0.0 }
  0xea   : > { %1017 = vst.msk [vmem:[%s170_s16] sm:$0xff] %vm188_vm0, %v1015_v1 }
  0xeb PF: > { %s13_s12 = sadd.s32 1, %s1241_s12  }
  0xec   : > { %p10_p4 = scmp.ge.s32.totalorder %s13_s12, 4  }
  0xee   :  { %12 = sbr.rel (!%p10_p4) target bundleno = 1 (0x1), region = 72 }

// kernel: forward.17
= control target key start
LH: loop header
LB: loop body
LE: loop exit
PB: predicated region body
PF: predicated region fallthrough
CT: control target
= control target key end

     0   :  { %s1963_s12 = smov 0   ;;  %s2260_s0 = inlined_call_operand.vmem [shape: f32[2,36,9,8], index: 0, kind: input, shape index: {}]   ;;  %s2261_s1 = inlined_call_operand.vmem [shape: f32[9,8,8], index: 1, kind: input, shape index: {}]   ;;  %s2262_s2 = inlined_call_operand.vmem [shape: f32[1,8], index: 2, kind: input, shape index: {}]   ;;  %s2263_s3 = inlined_call_operand.vmem [shape: f32[2,64,8], index: 3, kind: output, shape index: {}]  }
   0x1 LB: > { %s1569_s13 = sadd.s32 4294967295, %s1941_s12   ;;  %p1573_p0 = scmp.ge.s32.totalorder %s1941_s12, 1  ;;  %s1941_s12 = sphi %s1963_s12, %s13_s12  }
   0x2   : > { %p137_p1 = scmp.lt.s32.totalorder %s1941_s12, 3 }
   0x4   : > { %p138_p2 = pnand %p1573_p0, %p137_p1 }
   0x5   : > { %p161_p3 = scmp.lt.s32.totalorder (!%p138_p2), %s1569_s13, 1 }
   0x6   : > { %141 = sbr.rel (%p138_p2) target bundleno = 290 (0x122), region = 32 }
   0xb   : > { %v1585_v0 = vld [vmem:[%s2261_s1 + $0x8] sm:$0xff]  ;;  %v179_v1 = vld [vmem:[%s2261_s1] sm:$0xff]  ;;  %v1602_v2 = vld [vmem:[%s2261_s1 + $0x10] sm:$0xff]  ;;  %s2265_s13 = smov (!%p161_p3, %s1569_s13), 1  ;;  %vm191_vm0 = vcmask 64512  }
   0xc   : > { %1924 = vmatprep.subr.mxu1 %v1585_v0  ;;  %1798 = vmatprep.subr.mxu0 %v1585_v0  ;;  %s1926_s20 = smul.u32 576, %s2265_s13  ;;  %v1619_v9 = vld [vmem:[%s2261_s1 + $0x18] sm:$0xff]  ;;  %v1636_v10 = vld [vmem:[%s2261_s1 + $0x20] sm:$0xff]  ;;  %v1653_v19 = vld [vmem:[%s2261_s1 + $0x28] sm:$0xff]  ;;  %s1716_s11 = sshll.u32 %s2265_s13, 6 }
   0xd   : > { %1925 = vmatpush3.msra.mxu1 %v1585_v0  ;;  %1799 = vmatpush3.msra.mxu0 %v1585_v0  ;;  %v1670_v20 = vld [vmem:[%s2261_s1 + $0x30] sm:$0xff]  ;;  %v1687_v37 = vld [vmem:[%s2261_s1 + $0x38] sm:$0xff]  ;;  %v1704_v38 = vld [vmem:[%s2261_s1 + $0x40] sm:$0xff]  ;;  %s2232_s13 = scalar_lea.vmem %s2263_s3, %s1716_s11 }
   0xe   : > { %1812 = vmatprep.subr.mxu1 %v179_v1  ;;  %1826 = vmatprep.subr.mxu0 %v1602_v2  ;;  %s1986_s23 = scalar_lea.vmem %s2260_s0, %s1926_s20 }
   0xf   : > { %v1577_v3 = vld [vmem:[%s1986_s23 + $0x90] sm:$0xff]  ;;  %v1993_v5 = vld [vmem:[%s1986_s23 + $0xa0] sm:$0xff] }
  0x10   : > { %v1990_v4 = vld [vmem:[%s1986_s23 + $0xd0] sm:$0xff]  ;;  %1800 = vmatprep.mubr.msk.f32.mxu0 %vm191_vm0, %v1577_v3  ;;  %v1999_v6 = vld [vmem:[%s1986_s23 + $0xe0] sm:$0xff] }
  0x11   : > { %1806 = vmatprep.mubr.msk.f32.mxu1 %vm191_vm0, %v1990_v4  ;;  %v2002_v7 = vld [vmem:[%s1986_s23 + $0xb0] sm:$0xff]  ;;  %1801 = vmatmul.mubr.msk.f32.vlgmr.msra.gmra.mxu0 %vm191_vm0, %v1993_v5  ;;  %v2018_v11 = vld [vmem:[%s1986_s23 + $0xc0] sm:$0xff] }
  0x12   : > { %v2005_v8 = vld [vmem:[%s1986_s23 + $0xf0] sm:$0xff]  ;;  %1807 = vmatmul.mubr.msk.f32.vlgmr.msra.gmra.mxu1 %vm191_vm0, %v1999_v6  ;;  %1827 = vmatpush3.msra.mxu0 %v1602_v2  ;;  %v2021_v12 = vld [vmem:[%s1986_s23 + $0x100] sm:$0xff] }
  0x13   : > { %1813 = vmatpush3.msra.mxu1 %v179_v1  ;;  %1803 = vmatprep.mubr.msk.f32.mxu0 %vm191_vm0, %v2002_v7  ;;  %v171_v13 = vld [vmem:[%s1986_s23] sm:$0xff]  ;;  %v2036_v15 = vld [vmem:[%s1986_s23 + $0x10] sm:$0xff] }
  0x14   : > { %1809 = vmatprep.mubr.msk.f32.mxu1 %vm191_vm0, %v2005_v8  ;;  %v450_v14 = vld [vmem:[%s1986_s23 + $0x1] sm:$0xff]  ;;  %1840 = vmatprep.subr.mxu1 %v1619_v9  ;;  %v2039_v16 = vld [vmem:[%s1986_s23 + $0x11] sm:$0xff] }
  0x15   : > { %1854 = vmatprep.subr.mxu0 %v1636_v10  ;;  %1804 = vmatmul.mubr.msk.f32.gmra.mxu0 %vm191_vm0, %v2018_v11  ;;  %v2042_v17 = vld [vmem:[%s1986_s23 + $0x20] sm:$0xff]  ;;  %v2058_v21 = vld [vmem:[%s1986_s23 + $0x30] sm:$0xff] }
  0x16   : > { %1810 = vmatmul.mubr.msk.f32.gmra.mxu1 %vm191_vm0, %v2021_v12  ;;  %1828 = vmatprep.mubr.msk.f32.mxu0 %vm191_vm0, %v450_v14  ;;  %v2045_v18 = vld [vmem:[%s1986_s23 + $0x21] sm:$0xff]  ;;  %v2061_v22 = vld [vmem:[%s1986_s23 + $0x31] sm:$0xff] }
  0x17   : > { %1814 = vmatprep.mubr.msk.f32.mxu1 %vm191_vm0, %v171_v13  ;;  %v2068_v23 = vld [vmem:[%s1986_s23 + $0x40] sm:$0xff]  ;;  %v2082_v25 = vld [vmem:[%s1986_s23 + $0x50] sm:$0xff] }
  0x18   : > { %v2071_v24 = vld [vmem:[%s1986_s23 + $0x41] sm:$0xff]  ;;  %v2085_v26 = vld [vmem:[%s1986_s23 + $0x51] sm:$0xff] }
  0x19   : > { %1829 = vmatmul.mubr.msk.f32.vlgmr.msra.gmra.mxu0 %vm191_vm0, %v2039_v16  ;;  %v2088_v27 = vld [vmem:[%s1986_s23 + $0x60] sm:$0xff]  ;;  %v2102_v29 = vld [vmem:[%s1986_s23 + $0x70] sm:$0xff] }
  0x1a   : > { %1815 = vmatmul.mubr.msk.f32.vlgmr.msra.gmra.mxu1 %vm191_vm0, %v2036_v15  ;;  %1855 = vmatpush3.msra.mxu0 %v1636_v10  ;;  %v2091_v28 = vld [vmem:[%s1986_s23 + $0x61] sm:$0xff]  ;;  %v2105_v30 = vld [vmem:[%s1986_s23 + $0x71] sm:$0xff] }
  0x1b   : > { %1841 = vmatpush3.msra.mxu1 %v1619_v9  ;;  %1817 = vmatprep.mubr.msk.f32.mxu1 %vm191_vm0, %v2042_v17  ;;  %v1611_v31 = vld [vmem:[%s1986_s23 + $0x120] sm:$0xff]  ;;  %v1628_v32 = vld [vmem:[%s1986_s23 + $0x1b0] sm:$0xff] }
  0x1c   : > { %1831 = vmatprep.mubr.msk.f32.mxu0 %vm191_vm0, %v2045_v18  ;;  %1868 = vmatprep.subr.mxu1 %v1653_v19  ;;  %v1612_v33 = vld [vmem:[%s1986_s23 + $0x130] sm:$0xff]  ;;  %v1629_v34 = vld [vmem:[%s1986_s23 + $0x1c0] sm:$0xff] }
  0x1d   : > { %1882 = vmatprep.subr.mxu0 %v1670_v20  ;;  %1832 = vmatmul.mubr.msk.f32.gmra.mxu0 %vm191_vm0, %v2061_v22  ;;  %v1613_v35 = vld [vmem:[%s1986_s23 + $0x140] sm:$0xff]  ;;  %v1630_v36 = vld [vmem:[%s1986_s23 + $0x1d0] sm:$0xff] }
  0x1e   : > { %1818 = vmatmul.mubr.msk.f32.gmra.mxu1 %vm191_vm0, %v2058_v21  ;;  %1834 = vmatprep.mubr.msk.f32.mxu0 %vm191_vm0, %v2071_v24  ;;  %v1614_v39 = vld [vmem:[%s1986_s23 + $0x150] sm:$0xff]  ;;  %v1631_v40 = vld [vmem:[%s1986_s23 + $0x1e0] sm:$0xff] }
  0x1f   : > { %1820 = vmatprep.mubr.msk.f32.mxu1 %vm191_vm0, %v2068_v23  ;;  %v1615_v41 = vld [vmem:[%s1986_s23 + $0x160] sm:$0xff]  ;;  %v1632_v42 = vld [vmem:[%s1986_s23 + $0x1f0] sm:$0xff] }
  0x20   : > { %v1616_v43 = vld [vmem:[%s1986_s23 + $0x170] sm:$0xff]  ;;  %v1633_v44 = vld [vmem:[%s1986_s23 + $0x200] sm:$0xff] }
  0x21   : > { %1835 = vmatmul.mubr.msk.f32.gmra.mxu0 %vm191_vm0, %v2085_v26  ;;  %v1617_v45 = vld [vmem:[%s1986_s23 + $0x180] sm:$0xff]  ;;  %v1634_v46 = vld [vmem:[%s1986_s23 + $0x210] sm:$0xff] }
  0x22   : > { %1821 = vmatmul.mubr.msk.f32.gmra.mxu1 %vm191_vm0, %v2082_v25  ;;  %1837 = vmatprep.mubr.msk.f32.mxu0 %vm191_vm0, %v2091_v28  ;;  %v1618_v47 = vld [vmem:[%s1986_s23 + $0x190] sm:$0xff]  ;;  %v1635_v48 = vld [vmem:[%s1986_s23 + $0x220] sm:$0xff] }
  0x23   : > { %1823 = vmatprep.mubr.msk.f32.mxu1 %vm191_vm0, %v2088_v27  ;;  %v1645_v49 = vld [vmem:[%s1986_s23 + $0x121] sm:$0xff]  ;;  %v1646_v50 = vld [vmem:[%s1986_s23 + $0x131] sm:$0xff] }
  0x24   : > { %v1647_v51 = vld [vmem:[%s1986_s23 + $0x141] sm:$0xff]  ;;  %v1648_v52 = vld [vmem:[%s1986_s23 + $0x151] sm:$0xff] }
  0x25   : > { %1838 = vmatmul.mubr.msk.f32.gmra.mxu0 %vm191_vm0, %v2105_v30  ;;  %v1649_v53 = vld [vmem:[%s1986_s23 + $0x161] sm:$0xff]  ;;  %v1650_v54 = vld [vmem:[%s1986_s23 + $0x171] sm:$0xff] }
  0x26   : > { %1824 = vmatmul.mubr.msk.f32.gmra.mxu1 %vm191_vm0, %v2102_v29  ;;  %1856 = vmatprep.mubr.msk.f32.mxu0 %vm191_vm0, %v1628_v32  ;;  %v1651_v55 = vld [vmem:[%s1986_s23 + $0x181] sm:$0xff]  ;;  %v1652_v56 = vld [vmem:[%s1986_s23 + $0x191] sm:$0xff] }
  0x27   : > { %1842 = vmatprep.mubr.msk.f32.mxu1 %vm191_vm0, %v1611_v31  ;;  %v1669_v57 = vld [vmem:[%s1986_s23 + $0x80] sm:$0xff]  ;;  %v1686_v58 = vld [vmem:[%s1986_s23 + $0x110] sm:$0xff] }
  0x28   : > { %v1703_v59 = vld [vmem:[%s1986_s23 + $0x81] sm:$0xff] }
  0x29   : > { %1857 = vmatmul.mubr.msk.f32.vlgmr.msra.gmra.mxu0 %vm191_vm0, %v1629_v34 }
  0x2a   : > { %1843 = vmatmul.mubr.msk.f32.vlgmr.msra.gmra.mxu1 %vm191_vm0, %v1612_v33  ;;  %1883 = vmatpush3.msra.mxu0 %v1670_v20 }
  0x2b   : > { %1869 = vmatpush3.msra.mxu1 %v1653_v19  ;;  %1845 = vmatprep.mubr.msk.f32.mxu1 %vm191_vm0, %v1613_v35 }
  0x2c   : > { %1859 = vmatprep.mubr.msk.f32.mxu0 %vm191_vm0, %v1630_v36  ;;  %1896 = vmatprep.subr.mxu1 %v1687_v37 }
  0x2d   : > { %1910 = vmatprep.subr.mxu0 %v1704_v38  ;;  %1860 = vmatmul.mubr.msk.f32.gmra.mxu0 %vm191_vm0, %v1631_v40 }
  0x2e   : > { %1846 = vmatmul.mubr.msk.f32.gmra.mxu1 %vm191_vm0, %v1614_v39  ;;  %1862 = vmatprep.mubr.msk.f32.mxu0 %vm191_vm0, %v1632_v42 }
  0x2f   : > { %1848 = vmatprep.mubr.msk.f32.mxu1 %vm191_vm0, %v1615_v41 }
  0x31   : > { %1863 = vmatmul.mubr.msk.f32.gmra.mxu0 %vm191_vm0, %v1633_v44 }
  0x32   : > { %1849 = vmatmul.mubr.msk.f32.gmra.mxu1 %vm191_vm0, %v1616_v43  ;;  %1865 = vmatprep.mubr.msk.f32.mxu0 %vm191_vm0, %v1634_v46 }
  0x33   : > { %1851 = vmatprep.mubr.msk.f32.mxu1 %vm191_vm0, %v1617_v45 }
  0x35   : > { %1866 = vmatmul.mubr.msk.f32.gmra.mxu0 %vm191_vm0, %v1635_v48 }
  0x36   : > { %1852 = vmatmul.mubr.msk.f32.gmra.mxu1 %vm191_vm0, %v1618_v47  ;;  %1884 = vmatprep.mubr.msk.f32.mxu0 %vm191_vm0, %v2036_v15 }
  0x37   : > { %1870 = vmatprep.mubr.msk.f32.mxu1 %vm191_vm0, %v1645_v49 }
  0x39   : > { %1885 = vmatmul.mubr.msk.f32.vlgmr.msra.gmra.mxu0 %vm191_vm0, %v2042_v17 }
  0x3a   : > { %1871 = vmatmul.mubr.msk.f32.vlgmr.msra.gmra.mxu1 %vm191_vm0, %v1646_v50  ;;  %1911 = vmatpush3.msra.mxu0 %v1704_v38 }
  0x3b   : > { %1897 = vmatpush3.msra.mxu1 %v1687_v37  ;;  %1873 = vmatprep.mubr.msk.f32.mxu1 %vm191_vm0, %v1647_v51 }
  0x3c   : > { %1887 = vmatprep.mubr.msk.f32.mxu0 %vm191_vm0, %v2058_v21 }
  0x3d   : > { %1888 = vmatmul.mubr.msk.f32.gmra.mxu0 %vm191_vm0, %v2068_v23 }
  0x3e   : > { %1874 = vmatmul.mubr.msk.f32.gmra.mxu1 %vm191_vm0, %v1648_v52  ;;  %1890 = vmatprep.mubr.msk.f32.mxu0 %vm191_vm0, %v2082_v25 }
  0x3f   : > { %1876 = vmatprep.mubr.msk.f32.mxu1 %vm191_vm0, %v1649_v53 }
  0x41   : > { %1891 = vmatmul.mubr.msk.f32.gmra.mxu0 %vm191_vm0, %v2088_v27 }
  0x42   : > { %1877 = vmatmul.mubr.msk.f32.gmra.mxu1 %vm191_vm0, %v1650_v54  ;;  %1893 = vmatprep.mubr.msk.f32.mxu0 %vm191_vm0, %v2102_v29 }
  0x43   : > { %1879 = vmatprep.mubr.msk.f32.mxu1 %vm191_vm0, %v1651_v55 }
  0x45   : > { %1894 = vmatmul.mubr.msk.f32.gmra.mxu0 %vm191_vm0, %v1669_v57 }
  0x46   : > { %1880 = vmatmul.mubr.msk.f32.gmra.mxu1 %vm191_vm0, %v1652_v56  ;;  %1912 = vmatprep.mubr.msk.f32.mxu0 %vm191_vm0, %v2039_v16 }
  0x47   : > { %1898 = vmatprep.mubr.msk.f32.mxu1 %vm191_vm0, %v1993_v5 }
  0x49   : > { %1913 = vmatmul.mubr.msk.f32.vlgmr.msra.gmra.mxu0 %vm191_vm0, %v2045_v18 }
  0x4a   : > { %1899 = vmatmul.mubr.msk.f32.vlgmr.msra.gmra.mxu1 %vm191_vm0, %v2002_v7  ;;  %1915 = vmatprep.mubr.msk.f32.mxu0 %vm191_vm0, %v2061_v22 }
  0x4b   : > { %1901 = vmatprep.mubr.msk.f32.mxu1 %vm191_vm0, %v2018_v11 }
  0x4d   : > { %1916 = vmatmul.mubr.msk.f32.gmra.mxu0 %vm191_vm0, %v2071_v24 }
  0x4e   : > { %1902 = vmatmul.mubr.msk.f32.gmra.mxu1 %vm191_vm0, %v1990_v4  ;;  %1918 = vmatprep.mubr.msk.f32.mxu0 %vm191_vm0, %v2085_v26 }
  0x4f   : > { %1904 = vmatprep.mubr.msk.f32.mxu1 %vm191_vm0, %v1999_v6 }
  0x51   : > { %1919 = vmatmul.mubr.msk.f32.gmra.mxu0 %vm191_vm0, %v2091_v28 }
  0x52   : > { %1905 = vmatmul.mubr.msk.f32.gmra.mxu1 %vm191_vm0, %v2005_v8  ;;  %1921 = vmatprep.mubr.msk.f32.mxu0 %vm191_vm0, %v2105_v30 }
  0x53   : > { %1907 = vmatprep.mubr.msk.f32.mxu1 %vm191_vm0, %v2021_v12 }
  0x55   : > { %1922 = vmatmul.mubr.msk.f32.gmra.mxu0 %vm191_vm0, %v1703_v59 }
  0x56   : > { %1908 = vmatmul.mubr.msk.f32.gmra.mxu1 %vm191_vm0, %v1686_v58 }
  0xd1   : > { %v1802_v60 = vpop.f32.mrf.mxu0 }
  0xd2   : > { %v1808_v61 = vpop.f32.mrf.mxu1 }
  0xd3   : > { %v282_v62 = vpop.f32.mrf.mxu0 }
  0xd4   : > { %v302_v63 = vpop.f32.mrf.mxu1 }
  0xd5   : > { %v1805_v0 = vpop.f32.mrf.mxu0 }
  0xd6   : > { %v1811_v1 = vpop.f32.mrf.mxu1 }
  0xd7   : > { %v292_v2 = vpop.f32.mrf.mxu0 }
  0xd8   : > { %v2213_v3 = vpop.f32.mrf.mxu1 }
  0xd9   : > { %v1830_v5 = vpop.f32.mrf.mxu0 }
  0xda   : > { %v1816_v4 = vpop.f32.mrf.mxu1 }
  0xdb   : > { %v550_v7 = vpop.f32.mrf.mxu0  ;;  %v417_v36 = vadd.f32 %v1816_v4, %v1802_v60 }
  0xdc   : > { %v411_v6 = vpop.f32.mrf.mxu1 }
  0xdd   : > { %v1833_v9 = vpop.f32.mrf.mxu0  ;;  %v412_v39 = vadd.f32 %v411_v6, %v282_v62  ;;  %v590_v42 = vadd.f32 %v1830_v5, %v417_v36 }
  0xde   : > { %v1819_v8 = vpop.f32.mrf.mxu1 }
  0xdf   : > { %v560_v11 = vpop.f32.mrf.mxu0  ;;  %v427_v43 = vadd.f32 %v1819_v8, %v1805_v0  ;;  %v589_v46 = vadd.f32 %v550_v7, %v412_v39 }
  0xe0   : > { %v421_v10 = vpop.f32.mrf.mxu1 }
  0xe1   : > { %v1836_v13 = vpop.f32.mrf.mxu0  ;;  %v422_v47 = vadd.f32 %v421_v10, %v292_v2  ;;  %v592_v52 = vadd.f32 %v1833_v9, %v427_v43 }
  0xe2   : > { %v1822_v12 = vpop.f32.mrf.mxu1 }
  0xe3   : > { %v570_v15 = vpop.f32.mrf.mxu0  ;;  %v437_v49 = vadd.f32 %v1822_v12, %v1808_v61  ;;  %v591_v57 = vadd.f32 %v560_v11, %v422_v47 }
  0xe4   : > { %v431_v14 = vpop.f32.mrf.mxu1 }
  0xe5   : > { %v1839_v17 = vpop.f32.mrf.mxu0  ;;  %v432_v54 = vadd.f32 %v431_v14, %v302_v63  ;;  %v594_v60 = vadd.f32 %v1836_v13, %v437_v49 }
  0xe6   : > { %v1825_v16 = vpop.f32.mrf.mxu1 }
  0xe7   : > { %v580_v19 = vpop.f32.mrf.mxu0  ;;  %v447_v62 = vadd.f32 %v1825_v16, %v1811_v1  ;;  %v593_v2 = vadd.f32 %v570_v15, %v432_v54 }
  0xe8   : > { %v441_v18 = vpop.f32.mrf.mxu1 }
  0xe9   : > { %v1858_v21 = vpop.f32.mrf.mxu0  ;;  %v442_v61 = vadd.f32 %v441_v18, %v2213_v3  ;;  %v596_v14 = vadd.f32 %v1839_v17, %v447_v62  ;;  %v2223_v17 = vld [vmem:[%s2262_s2] ss:$0 sm:$0xff] }
  0xea   : > { %v1844_v20 = vpop.f32.mrf.mxu1 }
  0xeb   : > { %v846_v23 = vpop.f32.mrf.mxu0  ;;  %v738_v48 = vadd.f32 %v1844_v20, %v590_v42  ;;  %v595_v16 = vadd.f32 %v580_v19, %v442_v61 }
  0xec   : > { %v698_v22 = vpop.f32.mrf.mxu1 }
  0xed   : > { %v1861_v25 = vpop.f32.mrf.mxu0  ;;  %v737_v53 = vadd.f32 %v698_v22, %v589_v46  ;;  %v886_v58 = vadd.f32 %v1858_v21, %v738_v48 }
  0xee   : > { %v1847_v24 = vpop.f32.mrf.mxu1 }
  0xef   : > { %v856_v27 = vpop.f32.mrf.mxu0  ;;  %v740_v59 = vadd.f32 %v1847_v24, %v592_v52  ;;  %v885_v5 = vadd.f32 %v846_v23, %v737_v53 }
  0xf0   : > { %v708_v26 = vpop.f32.mrf.mxu1 }
  0xf1   : > { %v1864_v29 = vpop.f32.mrf.mxu0  ;;  %v739_v6 = vadd.f32 %v708_v26, %v591_v57  ;;  %v888_v12 = vadd.f32 %v1861_v25, %v740_v59 }
  0xf2   : > { %v1850_v28 = vpop.f32.mrf.mxu1 }
  0xf3   : > { %v866_v31 = vpop.f32.mrf.mxu0  ;;  %v742_v8 = vadd.f32 %v1850_v28, %v594_v60  ;;  %v887_v22 = vadd.f32 %v856_v27, %v739_v6 }
  0xf4   : > { %v718_v30 = vpop.f32.mrf.mxu1 }
  0xf5   : > { %v2215_v33 = vpop.f32.mrf.mxu0  ;;  %v741_v20 = vadd.f32 %v718_v30, %v593_v2  ;;  %v890_v23 = vadd.f32 %v1864_v29, %v742_v8 }
  0xf6   : > { %v1853_v32 = vpop.f32.mrf.mxu1 }
  0xf7   : > { %v2217_v35 = vpop.f32.mrf.mxu0  ;;  %v744_v24 = vadd.f32 %v1853_v32, %v596_v14  ;;  %v889_v28 = vadd.f32 %v866_v31, %v741_v20 }
  0xf8   : > { %v728_v34 = vpop.f32.mrf.mxu1 }
  0xf9   : > { %v1886_v38 = vpop.f32.mrf.mxu0  ;;  %v892_v32 = vadd.f32 %v2215_v33, %v744_v24 }
  0xfa   : > { %v1872_v37 = vpop.f32.mrf.mxu1 }
  0xfb   : > { %v1141_v41 = vpop.f32.mrf.mxu0  ;;  %v1033_v7 = vadd.f32 %v1872_v37, %v886_v58  ;;  %v743_v37 = vadd.f32 %v728_v34, %v595_v16 }
  0xfc   : > { %v993_v40 = vpop.f32.mrf.mxu1 }
  0xfd   : > { %v1889_v45 = vpop.f32.mrf.mxu0  ;;  %v1032_v63 = vadd.f32 %v993_v40, %v885_v5  ;;  %v1181_v13 = vadd.f32 %v1886_v38, %v1033_v7 }
  0xfe   : > { %v1875_v44 = vpop.f32.mrf.mxu1 }
  0xff   : > { %v1151_v51 = vpop.f32.mrf.mxu0  ;;  %v1035_v1 = vadd.f32 %v1875_v44, %v888_v12  ;;  %v1180_v36 = vadd.f32 %v1141_v41, %v1032_v63  ;;  %v891_v44 = vadd.f32 %v2217_v35, %v743_v37 }
 0x100   : > { %v1003_v50 = vpop.f32.mrf.mxu1 }
 0x101   : > { %v1892_v56 = vpop.f32.mrf.mxu0  ;;  %v1034_v3 = vadd.f32 %v1003_v50, %v887_v22  ;;  %v1183_v38 = vadd.f32 %v1889_v45, %v1035_v1 }
 0x102   : > { %v1878_v55 = vpop.f32.mrf.mxu1 }
 0x103   : > { %v1161_v0 = vpop.f32.mrf.mxu0  ;;  %v1037_v25 = vadd.f32 %v1878_v55, %v890_v23  ;;  %v1182_v42 = vadd.f32 %v1151_v51, %v1034_v3 }
 0x104   : > { %v1013_v4 = vpop.f32.mrf.mxu1 }
 0x105   : > { %v1895_v9 = vpop.f32.mrf.mxu0  ;;  %v1036_v39 = vadd.f32 %v1013_v4, %v889_v28  ;;  %v1185_v46 = vadd.f32 %v1892_v56, %v1037_v25 }
 0x106   : > { %v1881_v10 = vpop.f32.mrf.mxu1 }
 0x107   : > { %v1171_v21 = vpop.f32.mrf.mxu0  ;;  %v1039_v47 = vadd.f32 %v1881_v10, %v892_v32  ;;  %v1184_v52 = vadd.f32 %v1161_v0, %v1036_v39 }
 0x108   : > { %v1023_v11 = vpop.f32.mrf.mxu1 }
 0x109   : > { %v1914_v15 = vpop.f32.mrf.mxu0  ;;  %v1038_v53 = vadd.f32 %v1023_v11, %v891_v44  ;;  %v1187_v59 = vadd.f32 %v1895_v9, %v1039_v47 }
 0x10a   : > { %v1900_v26 = vpop.f32.mrf.mxu1 }
 0x10b   : > { %v1329_v18 = vadd.f32 %v1900_v26, %v1181_v13  ;;  %v1436_v30 = vpop.f32.mrf.mxu0  ;;  %v1186_v7 = vadd.f32 %v1171_v21, %v1038_v53 }
 0x10c   : > { %v1289_v27 = vpop.f32.mrf.mxu1 }
 0x10d   : > { %v1476_v19 = vadd.f32 %v1914_v15, %v1329_v18  ;;  %v1328_v29 = vadd.f32 %v1289_v27, %v1180_v36  ;;  %v1917_v41 = vpop.f32.mrf.mxu0 }
 0x10e   : > { %v1903_v40 = vpop.f32.mrf.mxu1 }
 0x10f   : > { %v1491_v31 = vadd.f32 %v2223_v17, %v1476_v19  ;;  %v1475_v34 = vadd.f32 %v1436_v30, %v1328_v29  ;;  %v1331_v43 = vadd.f32 %v1903_v40, %v1183_v38  ;;  %v1446_v33 = vpop.f32.mrf.mxu0 }
 0x110   : > { %v1299_v45 = vpop.f32.mrf.mxu1 }
 0x111   : > { %v1499_v48 = vmax.f32 %v1491_v31, 0.0  ;;  %v1490_v49 = vadd.f32 %v2223_v17, %v1475_v34  ;;  %v1478_v50 = vadd.f32 %v1917_v41, %v1331_v43  ;;  %v1330_v51 = vadd.f32 %v1299_v45, %v1182_v42  ;;  %v1920_v35 = vpop.f32.mrf.mxu0 }
 0x112   : > { %v1906_v54 = vpop.f32.mrf.mxu1 }
 0x113   : > { %1507 = vst.msk [vmem:[%s2232_s13 + $0x8] sm:$0xff] %vm191_vm0, %v1499_v48  ;;  %v1498_v55 = vmax.f32 %v1490_v49, 0.0  ;;  %v1493_v56 = vadd.f32 %v2223_v17, %v1478_v50  ;;  %v1477_v57 = vadd.f32 %v1446_v33, %v1330_v51  ;;  %v1333_v58 = vadd.f32 %v1906_v54, %v1185_v46  ;;  %v1456_v62 = vpop.f32.mrf.mxu0 }
 0x114   : > { %v1309_v60 = vpop.f32.mrf.mxu1 }
 0x115   : > { %1506 = vst.msk [vmem:[%s2232_s13] sm:$0xff] %vm191_vm0, %v1498_v55  ;;  %v1501_v4 = vmax.f32 %v1493_v56, 0.0  ;;  %v1492_v0 = vadd.f32 %v2223_v17, %v1477_v57  ;;  %v1480_v5 = vadd.f32 %v1920_v35, %v1333_v58  ;;  %v1332_v6 = vadd.f32 %v1309_v60, %v1184_v52  ;;  %v1923_v61 = vpop.f32.mrf.mxu0 }
 0x116   : > { %v1909_v2 = vpop.f32.mrf.mxu1 }
 0x117   : > { %1509 = vst.msk [vmem:[%s2232_s13 + $0x18] sm:$0xff] %vm191_vm0, %v1501_v4  ;;  %v1500_v8 = vmax.f32 %v1492_v0, 0.0  ;;  %v1495_v10 = vadd.f32 %v2223_v17, %v1480_v5  ;;  %v1479_v9 = vadd.f32 %v1456_v62, %v1332_v6  ;;  %v1335_v12 = vadd.f32 %v1909_v2, %v1187_v59  ;;  %v1466_v22 = vpop.f32.mrf.mxu0 }
 0x118   : > { %v1319_v63 = vpop.f32.mrf.mxu1 }
 0x119   : > { %1508 = vst.msk [vmem:[%s2232_s13 + $0x10] sm:$0xff] %vm191_vm0, %v1500_v8  ;;  %v1503_v14 = vmax.f32 %v1495_v10, 0.0  ;;  %v1494_v20 = vadd.f32 %v2223_v17, %v1479_v9  ;;  %v1482_v11 = vadd.f32 %v1923_v61, %v1335_v12  ;;  %v1334_v21 = vadd.f32 %v1319_v63, %v1186_v7 }
 0x11b   : > { %1511 = vst.msk [vmem:[%s2232_s13 + $0x28] sm:$0xff] %vm191_vm0, %v1503_v14  ;;  %v1502_v13 = vmax.f32 %v1494_v20, 0.0  ;;  %v1497_v1 = vadd.f32 %v2223_v17, %v1482_v11  ;;  %v1481_v16 = vadd.f32 %v1466_v22, %v1334_v21 }
 0x11d   : > { %1510 = vst.msk [vmem:[%s2232_s13 + $0x20] sm:$0xff] %vm191_vm0, %v1502_v13  ;;  %v1505_v23 = vmax.f32 %v1497_v1, 0.0  ;;  %v1496_v24 = vadd.f32 %v2223_v17, %v1481_v16 }
 0x11f   : > { %1513 = vst.msk [vmem:[%s2232_s13 + $0x38] sm:$0xff] %vm191_vm0, %v1505_v23  ;;  %v1504_v26 = vmax.f32 %v1496_v24, 0.0 }
 0x121   : > { %1512 = vst.msk [vmem:[%s2232_s13 + $0x30] sm:$0xff] %vm191_vm0, %v1504_v26 }
 0x122 PF: > { %s13_s12 = sadd.s32 1, %s1941_s12  }
 0x123   : > { %p10_p4 = scmp.ge.s32.totalorder %s13_s12, 4  }
 0x125   :  { %12 = sbr.rel (!%p10_p4) target bundleno = 1 (0x1), region = 75 }

// kernel: forward.23
= control target key start
LH: loop header
LB: loop body
LE: loop exit
PB: predicated region body
PF: predicated region fallthrough
CT: control target
= control target key end

     0   :  { %s657_s24 = smov 0   ;;  %s734_s0 = inlined_call_operand.vmem [shape: f32[2,4,32], index: 0, kind: input, shape index: {}]   ;;  %s735_s1 = inlined_call_operand.vmem [shape: f32[32,64], index: 1, kind: input, shape index: {}]   ;;  %s736_s2 = inlined_call_operand.vmem [shape: f32[1,64], index: 2, kind: input, shape index: {}]   ;;  %s737_s3 = inlined_call_operand.vmem [shape: f32[64,32], index: 3, kind: input, shape index: {}]   ;;  %s738_s4 = inlined_call_operand.vmem [shape: f32[1,32], index: 4, kind: input, shape index: {}]   ;;  %s739_s5 = inlined_call_operand.vmem [shape: f32[1,32], index: 5, kind: input, shape index: {}]   ;;  %s740_s6 = inlined_call_operand.vmem [shape: f32[1,32], index: 6, kind: input, shape index: {}]   ;;  %s741_s7 = inlined_call_operand.vmem [shape: f32[2,4,32], index: 7, kind: output, shape index: {}]  }
   0x1 LB: > { %s536_s25 = sadd.s32 4294967295, %s613_s24   ;;  %p540_p0 = scmp.ge.s32.totalorder %s613_s24, 1  ;;  %s613_s24 = sphi %s657_s24, %s17_s24  }
   0x2   : > { %p236_p1 = scmp.lt.s32.totalorder %s613_s24, 3 }
   0x4   : > { %p237_p2 = pnand %p540_p0, %p236_p1 }
   0x5   : > { %p266_p3 = scmp.lt.s32.totalorder (!%p237_p2), %s536_s25, 1 }
   0x6   : > { %240 = sbr.rel (%p237_p2) target bundleno = 723 (0x2d3), region = 48 }
   0xb   : > { %v278_v0 = vld [vmem:[%s735_s1 + $0x18] sm:$0xff]  ;;  %v615_v1 = vmov 0.0   ;;  %v277_v2 = vld [vmem:[%s735_s1 + $0x10] sm:$0xff]  ;;  %vm616_vm0 = vmmov 0   ;;  %s743_s25 = smov (!%p266_p3, %s536_s25), 1  ;;  %v276_v5 = vld [vmem:[%s735_s1 + $0x8] sm:$0xff] }
   0xc   : > { %565 = vmatprep.subr.mxu0 %v615_v1  ;;  %573 = vmatprep.mubr.msk.f32.mxu0 %vm616_vm0, %v615_v1  ;;  %v368_v3 = vld [vmem:[%s737_s3 + $0x38] sm:$0xff]  ;;  %v367_v4 = vld [vmem:[%s737_s3 + $0x30] sm:$0xff]  ;;  %s541_s13 = sshll.u32 %s743_s25, 2  ;;  %v366_v6 = vld [vmem:[%s737_s3 + $0x28] sm:$0xff]  ;;  %vm286_vm1 = vcmask 261120   ;;  %vm376_vm2 = vcmask 523264  }
   0xd   : > { %566 = vmatpush3.msra.mxu0 %v278_v0  ;;  %576 = vmatprep.subr.mxu1 %v615_v1  ;;  %v275_v7 = vld [vmem:[%s735_s1] sm:$0xff]  ;;  %s269_s20 = scalar_lea.vmem %s734_s0, %s541_s13  ;;  %v364_v10 = vld [vmem:[%s737_s3 + $0x18] sm:$0xff]  ;;  %v363_v11 = vld [vmem:[%s737_s3 + $0x10] sm:$0xff]  ;;  %vm451_vm3 = vcmask 257024   ;;  %s273_s21 = scalar_lea.vmem %s741_s7, %s541_s13 }
   0xe   : > { %567 = vmatprep.subr.mxu0 %v615_v1  ;;  %577 = vmatpush3.msra.mxu1 %v368_v3  ;;  %v274_v8 = vld [vmem:[%s269_s20] sm:$0xf]  ;;  %v362_v12 = vld [vmem:[%s737_s3 + $0x8] sm:$0xff] }
   0xf   : > { %568 = vmatpush3.msra.mxu0 %v277_v2  ;;  %578 = vmatprep.subr.mxu1 %v615_v1  ;;  %v365_v9 = vld [vmem:[%s737_s3 + $0x20] sm:$0xff] }
  0x10   : > { %569 = vmatprep.subr.mxu0 %v615_v1  ;;  %579 = vmatpush3.msra.mxu1 %v367_v4  ;;  %v361_v13 = vld [vmem:[%s737_s3] sm:$0xff] }
  0x11   : > { %570 = vmatpush3.msra.mxu0 %v276_v5  ;;  %580 = vmatprep.subr.mxu1 %v615_v1  ;;  %v543_v14 = vld [vmem:[%s736_s2] ss:$0 sm:$0xff] }
  0x12   : > { %571 = vmatprep.subr.mxu0 %v615_v1  ;;  %581 = vmatpush3.msra.mxu1 %v366_v6  ;;  %v545_v19 = vld [vmem:[%s738_s4] ss:$0 sm:$0xff] }
  0x13   : > { %572 = vmatpush3.msra.mxu0 %v275_v7  ;;  %582 = vmatprep.subr.mxu1 %v615_v1  ;;  %v547_v34 = vld [vmem:[%s739_s5] ss:$0 sm:$0xff] }
  0x14   : > { %574 = vmatmul.mubr.msk.f32.vlgmr.msra.gmra.mxu0 %vm286_vm1, %v274_v8  ;;  %583 = vmatpush3.msra.mxu1 %v365_v9  ;;  %v548_v36 = vld [vmem:[%s740_s6] ss:$0 sm:$0xff] }
  0x15   : > { %584 = vmatprep.subr.mxu1 %v615_v1  ;;  %592 = vmatprep.mubr.msk.f32.mxu1 %vm616_vm0, %v615_v1 }
  0x16   : > { %585 = vmatpush3.msra.mxu1 %v364_v10 }
  0x17   : > { %586 = vmatprep.subr.mxu1 %v615_v1 }
  0x18   : > { %587 = vmatpush3.msra.mxu1 %v363_v11 }
  0x19   : > { %588 = vmatprep.subr.mxu1 %v615_v1 }
  0x1a   : > { %589 = vmatpush3.msra.mxu1 %v362_v12 }
  0x1b   : > { %590 = vmatprep.subr.mxu1 %v615_v1 }
  0x1c   : > { %591 = vmatpush3.msra.mxu1 %v361_v13 }
  0xd4   : > { %v356_v15 = vpop.f32.mrf.mxu0 }
  0xd5   : > { %v357_v16 = vadd.f32 %v543_v14, %v356_v15 }
  0xd6   : > { %v575_v17 = vpop.f32.mrf.mxu0 }
  0xd7   : > { %v360_v18 = vmax.f32 %v357_v16, 0.0 }
  0xd9   : > { %593 = vmatmul.mubr.msk.f32.vlgmr.msra.gmra.mxu1 %vm376_vm2, %v360_v18 }
 0x199   : > { %v446_v20 = vpop.f32.mrf.mxu1 }
 0x19a   : > { %v447_v21 = vadd.f32 %v545_v19, %v446_v20 }
 0x19b   : > { %v594_v22 = vpop.f32.mrf.mxu1 }
 0x19c   : > { %v450_v23 = vadd.f32 %v447_v21, %v274_v8 }
 0x19e   : > { %v452_v24 = vsel %vm451_vm3, %v450_v23, 0.0 }
 0x19f   : > { %453 = vadd.xlane.f32.xlu0 %v452_v24 }
 0x228   : > { %v454_v25 = vpop.xlane.xlu0 %453 }
 0x229   : > { %v456_v26 = vmul.f32 0.03125, %v454_v25 }
 0x22b   : > { %v457_v27 = vsub.f32 %v450_v23, %v456_v26 }
 0x22d   : > { %v458_v28 = vmul.f32 %v457_v27, %v457_v27 }
 0x22f   : > { %v459_v29 = vsel %vm451_vm3, %v458_v28, 0.0 }
 0x230   : > { %460 = vadd.xlane.f32.xlu0 %v459_v29 }
 0x2b9   : > { %v461_v30 = vpop.xlane.xlu0 %460 }
 0x2ba   : > { %v462_v31 = vmul.f32 0.03125, %v461_v30 }
 0x2bc   : > { %v463_v32 = vadd.f32 1e-05, %v462_v31 }
 0x2be   : > { %605 = vrsqrt.f32 %v463_v32 }
 0x2cb   : > { %v606_v33 = vpop.eup %605 }
 0x2cc   : > { %v465_v35 = vmul.f32 %v606_v33, %v457_v27 }
 0x2ce   : > { %v473_v37 = vmul.f32 %v547_v34, %v465_v35 }
 0x2d0   : > { %v481_v38 = vadd.f32 %v548_v36, %v473_v37 }
 0x2d2   : > { %482 = vst.msk [vmem:[%s273_s21] sm:$0xf] %vm451_vm3, %v481_v38 }
 0x2d3 PF: > { %s17_s24 = sadd.s32 1, %s613_s24  }
 0x2d4   : > { %p14_p4 = scmp.ge.s32.totalorder %s17_s24, 4  }
 0x2d6   :  { %16 = sbr.rel (!%p14_p4) target bundleno = 1 (0x1), region = 78 }

// kernel: forward.26
= control target key start
LH: loop header
LB: loop body
LE: loop exit
PB: predicated region body
PF: predicated region fallthrough
CT: control target
= control target key end

     0   :  { %s373_s12 = smov 0   ;;  %s399_s0 = inlined_call_operand.vmem [shape: s32[2,6,1], index: 0, kind: input, shape index: {}]   ;;  %s400_s1 = inlined_call_operand.vmem [shape: f32[16,32], index: 1, kind: input, shape index: {}]   ;;  %s401_s2 = inlined_call_operand.vmem [shape: f32[6,32], index: 2, kind: input, shape index: {}]   ;;  %s402_s3 = inlined_call_operand.vmem [shape: f32[2,6,32], index: 3, kind: output, shape index: {}]  }
   0x1 LB: > { %s309_s13 = sadd.s32 4294967295, %s348_s12   ;;  %p313_p0 = scmp.ge.s32.totalorder %s348_s12, 1  ;;  %s348_s12 = sphi %s373_s12, %s13_s12  }
   0x2   : > { %p136_p1 = scmp.lt.s32.totalorder %s348_s12, 3 }
   0x4   : > { %p137_p2 = pnand %p313_p0, %p136_p1 }
   0x5   : > { %p158_p3 = scmp.lt.s32.totalorder (!%p137_p2), %s309_s13, 1 }
   0x6   : > { %140 = sbr.rel (%p137_p2) target bundleno = 339 (0x153), region = 32 }
   0xb   : > { %v176_v0 = vld [vmem:[%s400_s1 + $0x8] sm:$0xff]  ;;  %v350_v1 = vmov 0   ;;  %v351_v2 = vmov 0.0   ;;  %s404_s13 = smov (!%p158_p3, %s309_s13), 1  ;;  %v175_v3 = vld [vmem:[%s400_s1] sm:$0xff]  ;;  %vm352_vm0 = vmmov 0   ;;  %v167_v5 = vlaneseq }
   0xc   : > { %341 = vset.pattern.permute.xlu0 %v350_v1  ;;  %323 = vmatprep.subr.mxu0 %v351_v2  ;;  %s314_s18 = sshll.u32 %s404_s13, 3  ;;  %vm177_vm1 = vcmask 130048   ;;  %v252_v10 = vld [vmem:[%s401_s2] sm:$0x3f]  ;;  %vm254_vm3 = vcmask 259072  }
   0xd   : > { %324 = vmatpush3.msra.mxu0 %v176_v0  ;;  %327 = vmatprep.mubr.msk.f32.mxu0 %vm352_vm0, %v351_v2  ;;  %s161_s21 = scalar_lea.vmem %s399_s0, %s314_s18  ;;  %v168_v6 = vand.u32 127, %v167_v5  ;;  %s165_s26 = scalar_lea.vmem %s402_s3, %s314_s18 }
   0xe   : > { %325 = vmatprep.subr.mxu0 %v351_v2  ;;  %v166_v4 = vld [vmem:[%s161_s21] sm:$0x3f] }
   0xf   : > { %326 = vmatpush3.msra.mxu0 %v175_v3  ;;  %170 = vperm.xlu0 %341, %v166_v4  }
  0x8a   : > { %v171_v7 = vpop.permute.xlu0 %170 }
  0x8b   : > { %vm172_vm2 = vcmp.eq.s32.totalorder %v168_v6, %v171_v7 }
  0x8c   : > { %v316_v8 = vsel %vm172_vm2, 1.0, %v351_v2 }
  0x8d   : > { %328 = vmatmul.mubr.msk.f32.vlgmr.msra.gmra.mxu0 %vm177_vm1, %v316_v8 }
 0x14d   : > { %v247_v9 = vpop.f32.mrf.mxu0 }
 0x14e   : > { %v251_v11 = vmul.f32 5.656854, %v247_v9 }
 0x14f   : > { %v329_v12 = vpop.f32.mrf.mxu0 }
 0x150   : > { %v253_v13 = vadd.f32 %v252_v10, %v251_v11 }
 0x152   : > { %255 = vst.msk [vmem:[%s165_s26] sm:$0x3f] %vm254_vm3, %v253_v13 }
 0x153 PF: > { %s13_s12 = sadd.s32 1, %s348_s12  }
 0x154   : > { %p10_p4 = scmp.ge.s32.totalorder %s13_s12, 4  }
 0x156   :  { %12 = sbr.rel (!%p10_p4) target bundleno = 1 (0x1), region = 62 }

// kernel: forward.22
= control target key start
LH: loop header
LB: loop body
LE: loop exit
PB: predicated region body
PF: predicated region fallthrough
CT: control target
= control target key end

     0   :  { %s1785_s29 = smov 0   ;;  %s1943_s0 = inlined_call_operand.vmem [shape: f32[2,4,32], index: 0, kind: input, shape index: {}, may-alias: {0,1}]   ;;  %s1944_s1 = inlined_call_operand.vmem [shape: f32[2,4,32], index: 1, kind: input, shape index: {}, may-alias: {0,1}]   ;;  %s1945_s2 = inlined_call_operand.vmem [shape: f32[32,96], index: 2, kind: input, shape index: {}]   ;;  %s1946_s3 = inlined_call_operand.vmem [shape: f32[1,96], index: 3, kind: input, shape index: {}]   ;;  %s1947_s4 = inlined_call_operand.vmem [shape: f32[32,32], index: 4, kind: input, shape index: {}]   ;;  %s1948_s5 = inlined_call_operand.vmem [shape: f32[1,32], index: 5, kind: input, shape index: {}]   ;;  %s1949_s6 = inlined_call_operand.vmem [shape: f32[2,4,4], index: 6, kind: input, shape index: {}]   ;;  %s1950_s7 = inlined_call_operand.vmem [shape: f32[1,32], index: 7, kind: input, shape index: {}]   ;;  %s1951_s8 = inlined_call_operand.vmem [shape: f32[1,32], index: 8, kind: input, shape index: {}]   ;;  %s1952_s9 = inlined_call_operand.vmem [shape: f32[2,4,32], index: 9, kind: output, shape index: {}]  }
   0x1 LB: > { %s1540_s30 = sadd.s32 4294967295, %s1720_s29   ;;  %p1544_p0 = scmp.ge.s32.totalorder %s1720_s29, 1  ;;  %s1720_s29 = sphi %s1785_s29, %s19_s29  }
   0x2   : > { %p304_p1 = scmp.lt.s32.totalorder %s1720_s29, 3 }
   0x4   : > { %p305_p2 = pnand %p1544_p0, %p304_p1 }
   0x5   : > { %p346_p3 = scmp.lt.s32.totalorder (!%p305_p2), %s1540_s30, 1  ;;  %s1724_s24 = smov (!%p305_p2), 120  }
   0x6   : > { %308 = sbr.rel (%p305_p2) target bundleno = 2766 (0xace), region = 56  ;;  %s1725_s25 = smov (!%p305_p2), 96  }
   0x7   : > { %s1726_s26 = smov (!%p305_p2), 88   ;;  %s1728_s10 = smov (!%p305_p2), 64  }
   0x8   : > { %s1729_s11 = smov (!%p305_p2), 80   ;;  %s1730_s12 = smov (!%p305_p2), 112  }
   0x9   : > { %s1731_s18 = smov (!%p305_p2), 72   ;;  %s1732_s19 = smov (!%p305_p2), 104  }
   0xa   : > { %s1733_s20 = smov (!%p305_p2), 48   ;;  %s1734_s23 = smov (!%p305_p2), 40  }
   0xb   : > { %v366_v0 = vld [vmem:[%s1945_s2 + $0x18] sm:$0xff]  ;;  %v1722_v1 = vmov 0.0   ;;  %v365_v2 = vld [vmem:[%s1945_s2 + $0x10] sm:$0xff]  ;;  %vm1723_vm0 = vmmov 0   ;;  %s1954_s30 = smov (!%p346_p3, %s1540_s30), 1  ;;  %v364_v3 = vld [vmem:[%s1945_s2 + $0x8] sm:$0xff] }
   0xc   : > { %1604 = vmatprep.subr.mxu0 %v1722_v1  ;;  %1612 = vmatprep.mubr.msk.f32.mxu0 %vm1723_vm0, %v1722_v1  ;;  %s1809_s16 = sshll.u32 %s1954_s30, 2  ;;  %v363_v4 = vld [vmem:[%s1945_s2] sm:$0xff]  ;;  %vm374_vm1 = vcmask 261120   ;;  %vm456_vm2 = vcmask 64512   ;;  %vm533_vm3 = vcmask 27648   ;;  %s1727_s30 = smov 56  }
   0xd   : > { %1605 = vmatpush3.msra.mxu0 %v366_v0  ;;  %1615 = vmatprep.subr.mxu1 %v1722_v1  ;;  %s349_s21 = scalar_lea.vmem %s1943_s0, %s1809_s16  ;;  %v1548_v6 = vld [vmem:[%s1946_s3] ss:$0 sm:$0xff]  ;;  %s357_s28 = scalar_lea.vmem %s1949_s6, %s1809_s16  ;;  %vm551_vm4 = vcmask 1043456   ;;  %vm547_vm5 = vcmask 31744   ;;  %v450_v43 = vld [vmem:[%s1947_s4 + $0x8] sm:$0xff]  ;;  %vm1431_vm6 = vcmask 257024  }
   0xe   : > { %1606 = vmatprep.subr.mxu0 %v1722_v1  ;;  %1617 = vmatprep.mubr.msk.f32.mxu1 %vm1723_vm0, %v1722_v1  ;;  %v1819_v5 = vld [vmem:[%s349_s21] sm:$0xf]  ;;  %s361_s13 = scalar_lea.vmem %s1952_s9, %s1809_s16 }
   0xf   : > { %1607 = vmatpush3.msra.mxu0 %v365_v2  ;;  %v1849_v14 = vld [vmem:[%s357_s28] sm:$0xf] }
  0x10   : > { %1608 = vmatprep.subr.mxu0 %v1722_v1  ;;  %v449_v42 = vld [vmem:[%s1947_s4] sm:$0xff] }
  0x11   : > { %1609 = vmatpush3.msra.mxu0 %v364_v3 }
  0x12   : > { %1610 = vmatprep.subr.mxu0 %v1722_v1 }
  0x13   : > { %1611 = vmatpush3.msra.mxu0 %v363_v4 }
  0x14   : > { %1613 = vmatmul.mubr.msk.f32.vlgmr.msra.gmra.mxu0 %vm374_vm1, %v1819_v5  ;;  %1625 = vmatprep.subr.mxu0 %v1722_v1 }
  0x15   : > { %1627 = vmatprep.mubr.msk.f32.mxu0 %vm1723_vm0, %v1722_v1 }
  0xd4   : > { %v444_v7 = vpop.f32.mrf.mxu0 }
  0xd5   : > { %v1829_v8 = vadd.f32 %v1548_v6, %v444_v7 }
  0xd6   : > { %v1614_v9 = vpop.f32.mrf.mxu0 }
  0xd7   : > { %624 = vrot.lane.b32.xlu1 %v1829_v8, %s1724_s24  ;;  %454 = vrot.lane.b32.xlu0 %v1829_v8, %s1725_s25 }
  0xdb   : > { %626 = vrot.lane.b32.xlu0 %v1829_v8, %s1726_s26 }
 0x149   : > { %v455_v10 = vpop.permute.xlu0 %454  ;;  %v625_v12 = vpop.permute.xlu1 %624 }
 0x14a   : > { %1616 = vmatpush3.xpose.msk.msra.mxu1 %vm456_vm2, %v455_v10  ;;  %v451_v10 = vld [vmem:[%s1947_s4 + $0x10] sm:$0xff] }
 0x14b   : > { %1620 = vmatprep.subr.mxu1 %v1722_v1 }
 0x14d   : > { %1618 = vmatmul.mubr.msk.f32.vlgmr.msra.gmra.mxu1 %vm456_vm2, %v1829_v8  ;;  %v627_v11 = vpop.permute.xlu0 %626 }
 0x14e   : > { %1626 = vmatpush3.xpose.msk.msra.mxu0 %vm456_vm2, %v627_v11  ;;  %1622 = vmatprep.mubr.msk.f32.mxu1 %vm1723_vm0, %v1722_v1 }
 0x14f   : > { %1635 = vmatprep.subr.mxu0 %v1722_v1 }
 0x151   : > { %1628 = vmatmul.mubr.msk.f32.vlgmr.msra.gmra.mxu0 %vm456_vm2, %v625_v12 }
 0x152   : > { %1637 = vmatprep.mubr.msk.f32.mxu0 %vm1723_vm0, %v1722_v1  ;;  %1636 = vmatpush3.msra.mxu0 %v450_v43 }
 0x153   : > { %1645 = vmatprep.subr.mxu0 %v1722_v1 }
 0x20d   : > { %v527_v13 = vpop.f32.mrf.mxu1 }
 0x20e   : > { %v531_v15 = vmul.f32 0.35355338, %v527_v13 }
 0x20f   : > { %v1619_v16 = vpop.f32.mrf.mxu1 }
 0x210   : > { %v532_v17 = vadd.f32 %v531_v15, %v1849_v14 }
 0x211   : > { %v698_v18 = vpop.f32.mrf.mxu0 }
 0x212   : > { %v702_v19 = vmul.f32 0.35355338, %v698_v18  ;;  %v534_v20 = vsel %vm533_vm3, %v532_v17, -inf }
 0x213   : > { %535 = vmax.xlane.f32.xlu1 %v534_v20  ;;  %v1629_v21 = vpop.f32.mrf.mxu0 }
 0x214   : > { %v703_v22 = vadd.f32 %v702_v19, %v1849_v14 }
 0x216   : > { %v704_v23 = vsel %vm533_vm3, %v703_v22, -inf }
 0x217   : > { %705 = vmax.xlane.f32.xlu0 %v704_v23 }
 0x29c   : > { %v536_v24 = vpop.xlane.xlu1 %535 }
 0x29d   : > { %v537_v25 = vsub.f32 %v532_v17, %v536_v24 }
 0x29f   : > { %v538_v26 = vmul.f32 1.442695, %v537_v25 }
 0x2a0   : > { %v706_v27 = vpop.xlane.xlu0 %705 }
 0x2a1   : > { %1696 = vpow2.f32 %v538_v26  ;;  %v707_v28 = vsub.f32 %v703_v22, %v706_v27 }
 0x2a3   : > { %v708_v29 = vmul.f32 1.442695, %v707_v28 }
 0x2a5   : > { %1698 = vpow2.f32 %v708_v29 }
 0x2ae   : > { %v1697_v30 = vpop.eup %1696 }
 0x2af   : > { %v540_v31 = vsel %vm533_vm3, %v1697_v30, 0.0 }
 0x2b0   : > { %541 = vadd.xlane.f32.xlu0 %v540_v31 }
 0x2b2   : > { %v1699_v32 = vpop.eup %1698 }
 0x2b3   : > { %v710_v33 = vsel %vm533_vm3, %v1699_v32, 0.0 }
 0x2b4   : > { %711 = vadd.xlane.f32.xlu1 %v710_v33 }
 0x2c5   : > { %715 = vrot.lane.b32.xlu1 %v1829_v8, %s1727_s30 }
 0x2c6   : > { %545 = vrot.lane.b32.xlu0 %v1829_v8, %s1728_s10 }
 0x2c9   : > { %940 = vrot.lane.b32.xlu1 %v1829_v8, %s1729_s11 }
 0x2ca   : > { %938 = vrot.lane.b32.xlu0 %v1829_v8, %s1730_s12 }
 0x339   : > { %v542_v34 = vpop.xlane.xlu0 %541 }
 0x33a   : > { %1700 = vrcp.f32 %v542_v34  ;;  %v1570_v34 = vld [vmem:[%s1948_s5] ss:$0 sm:$0xff] }
 0x33d   : > { %v712_v35 = vpop.xlane.xlu1 %711  ;;  %v546_v36 = vpop.permute.xlu0 %545 }
 0x33e   : > { %1702 = vrcp.f32 %v712_v35  ;;  %1621 = vmatpush3.msk.msra.mxu1 %vm551_vm4, %v546_v36 }
 0x33f   : > { %1630 = vmatprep.subr.mxu1 %v1722_v1 }
 0x341   : > { %v716_v39 = vpop.permute.xlu1 %715  ;;  %v939_v49 = vpop.permute.xlu0 %938 }
 0x345   : > { %v941_v47 = vpop.permute.xlu1 %940 }
 0x347   : > { %v1701_v37 = vpop.eup %1700 }
 0x348   : > { %v544_v38 = vmul.f32 %v1701_v37, %v1697_v30 }
 0x34a   : > { %1623 = vmatmul.mubr.msk.f32.vlgmr.msra.gmra.mxu1 %vm547_vm5, %v544_v38 }
 0x34b   : > { %v1703_v40 = vpop.eup %1702  ;;  %1631 = vmatpush3.msk.msra.mxu1 %vm551_vm4, %v716_v39  ;;  %1632 = vmatprep.mubr.msk.f32.mxu1 %vm1723_vm0, %v1722_v1 }
 0x34c   : > { %v714_v41 = vmul.f32 %v1703_v40, %v1699_v32  ;;  %1640 = vmatprep.subr.mxu1 %v1722_v1 }
 0x34e   : > { %1633 = vmatmul.mubr.msk.f32.vlgmr.msra.gmra.mxu1 %vm547_vm5, %v714_v41 }
 0x34f   : > { %1642 = vmatprep.mubr.msk.f32.mxu1 %vm1723_vm0, %v1722_v1  ;;  %1641 = vmatpush3.msra.mxu1 %v449_v42 }
 0x350   : > { %1650 = vmatprep.subr.mxu1 %v1722_v1 }
 0x40a   : > { %v620_v44 = vpop.f32.mrf.mxu1 }
 0x40b   : > { %1643 = vmatmul.mubr.msk.f32.vlgmr.msra.gmra.mxu1 %vm456_vm2, %v620_v44 }
 0x40c   : > { %v1624_v45 = vpop.f32.mrf.mxu1  ;;  %1652 = vmatprep.mubr.msk.f32.mxu1 %vm1723_vm0, %v1722_v1 }
 0x40e   : > { %v788_v46 = vpop.f32.mrf.mxu1 }
 0x40f   : > { %1638 = vmatmul.mubr.msk.f32.vlgmr.msra.gmra.mxu0 %vm456_vm2, %v788_v46 }
 0x410   : > { %1646 = vmatpush3.xpose.msk.msra.mxu0 %vm456_vm2, %v941_v47  ;;  %v1634_v48 = vpop.f32.mrf.mxu1  ;;  %1647 = vmatprep.mubr.msk.f32.mxu0 %vm1723_vm0, %v1722_v1 }
 0x411   : > { %1655 = vmatprep.subr.mxu0 %v1722_v1  ;;  %v1572_v48 = vld [vmem:[%s1951_s8] ss:$0 sm:$0xff] }
 0x413   : > { %1648 = vmatmul.mubr.msk.f32.vlgmr.msra.gmra.mxu0 %vm456_vm2, %v939_v49 }
 0x414   : > { %1657 = vmatprep.mubr.msk.f32.mxu0 %vm1723_vm0, %v1722_v1  ;;  %1656 = vmatpush3.msra.mxu0 %v451_v10 }
 0x415   : > { %1665 = vmatprep.subr.mxu0 %v1722_v1 }
 0x4cb   : > { %v934_v50 = vpop.f32.mrf.mxu1 }
 0x4cd   : > { %v1644_v51 = vpop.f32.mrf.mxu1 }
 0x4cf   : > { %v861_v52 = vpop.f32.mrf.mxu0 }
 0x4d0   : > { %v935_v53 = vadd.f32 %v934_v50, %v861_v52 }
 0x4d1   : > { %v1639_v54 = vpop.f32.mrf.mxu0 }
 0x4d3   : > { %v1012_v55 = vpop.f32.mrf.mxu0 }
 0x4d4   : > { %v1016_v56 = vmul.f32 0.35355338, %v1012_v55 }
 0x4d5   : > { %v1649_v57 = vpop.f32.mrf.mxu0 }
 0x4d6   : > { %v1017_v58 = vadd.f32 %v1016_v56, %v1849_v14 }
 0x4d8   : > { %v1018_v59 = vsel %vm533_vm3, %v1017_v58, -inf }
 0x4d9   : > { %1019 = vmax.xlane.f32.xlu1 %v1018_v59 }
 0x4ea   : > { %1182 = vrot.lane.b32.xlu1 %v1829_v8, %s1731_s18 }
 0x4ee   : > { %1180 = vrot.lane.b32.xlu1 %v1829_v8, %s1732_s19 }
 0x562   : > { %v1020_v60 = vpop.xlane.xlu1 %1019 }
 0x563   : > { %v1021_v61 = vsub.f32 %v1017_v58, %v1020_v60 }
 0x565   : > { %v1022_v62 = vmul.f32 1.442695, %v1021_v61 }
 0x566   : > { %v1183_v6 = vpop.permute.xlu1 %1182 }
 0x567   : > { %1704 = vpow2.f32 %v1022_v62 }
 0x56a   : > { %v1181_v9 = vpop.permute.xlu1 %1180 }
 0x574   : > { %v1705_v63 = vpop.eup %1704 }
 0x575   : > { %v1024_v0 = vsel %vm533_vm3, %v1705_v63, 0.0 }
 0x576   : > { %1025 = vadd.xlane.f32.xlu0 %v1024_v0 }
 0x58c   : > { %1029 = vrot.lane.b32.xlu0 %v1829_v8, %s1733_s20 }
 0x5ff   : > { %v1026_v2 = vpop.xlane.xlu0 %1025 }
 0x600   : > { %1706 = vrcp.f32 %v1026_v2 }
 0x603   : > { %v1030_v3 = vpop.permute.xlu0 %1029 }
 0x604   : > { %1651 = vmatpush3.msk.msra.mxu1 %vm551_vm4, %v1030_v3 }
 0x605   : > { %1660 = vmatprep.subr.mxu1 %v1722_v1 }
 0x60d   : > { %v1707_v4 = vpop.eup %1706 }
 0x60e   : > { %v1028_v7 = vmul.f32 %v1707_v4, %v1705_v63 }
 0x610   : > { %1653 = vmatmul.mubr.msk.f32.vlgmr.msra.gmra.mxu1 %vm547_vm5, %v1028_v7 }
 0x611   : > { %1661 = vmatpush3.xpose.msk.msra.mxu1 %vm456_vm2, %v1183_v6  ;;  %1662 = vmatprep.mubr.msk.f32.mxu1 %vm1723_vm0, %v1722_v1 }
 0x612   : > { %1670 = vmatprep.subr.mxu1 %v1722_v1 }
 0x614   : > { %1663 = vmatmul.mubr.msk.f32.vlgmr.msra.gmra.mxu1 %vm456_vm2, %v1181_v9 }
 0x615   : > { %1672 = vmatprep.mubr.msk.f32.mxu1 %vm1723_vm0, %v1722_v1 }
 0x6d0   : > { %v1102_v11 = vpop.f32.mrf.mxu1 }
 0x6d1   : > { %1658 = vmatmul.mubr.msk.f32.vlgmr.msra.gmra.mxu0 %vm456_vm2, %v1102_v11 }
 0x6d2   : > { %v1654_v12 = vpop.f32.mrf.mxu1  ;;  %1667 = vmatprep.mubr.msk.f32.mxu0 %vm1723_vm0, %v1722_v1 }
 0x6d4   : > { %v1254_v13 = vpop.f32.mrf.mxu1 }
 0x6d5   : > { %v1258_v15 = vmul.f32 0.35355338, %v1254_v13 }
 0x6d6   : > { %v1664_v16 = vpop.f32.mrf.mxu1 }
 0x6d7   : > { %v1259_v17 = vadd.f32 %v1258_v15, %v1849_v14  ;;  %v452_v14 = vld [vmem:[%s1947_s4 + $0x18] sm:$0xff] }
 0x6d8   : > { %1671 = vmatpush3.msra.mxu1 %v452_v14 }
 0x6d9   : > { %v1260_v18 = vsel %vm533_vm3, %v1259_v17, -inf }
 0x6da   : > { %1261 = vmax.xlane.f32.xlu0 %v1260_v18 }
 0x6f0   : > { %1271 = vrot.lane.b32.xlu0 %v1829_v8, %s1734_s23 }
 0x763   : > { %v1262_v19 = vpop.xlane.xlu0 %1261 }
 0x764   : > { %v1263_v20 = vsub.f32 %v1259_v17, %v1262_v19 }
 0x766   : > { %v1264_v21 = vmul.f32 1.442695, %v1263_v20 }
 0x767   : > { %v1272_v22 = vpop.permute.xlu0 %1271 }
 0x768   : > { %1708 = vpow2.f32 %v1264_v21  ;;  %1666 = vmatpush3.msk.msra.mxu0 %vm551_vm4, %v1272_v22 }
 0x775   : > { %v1709_v23 = vpop.eup %1708 }
 0x776   : > { %v1266_v1 = vsel %vm533_vm3, %v1709_v23, 0.0 }
 0x777   : > { %1267 = vadd.xlane.f32.xlu1 %v1266_v1 }
 0x791   : > { %v1175_v24 = vpop.f32.mrf.mxu0 }
 0x792   : > { %v1179_v25 = vadd.f32 %v1175_v24, %v935_v53 }
 0x793   : > { %v1659_v26 = vpop.f32.mrf.mxu0 }
 0x800   : > { %v1268_v8 = vpop.xlane.xlu1 %1267 }
 0x801   : > { %1710 = vrcp.f32 %v1268_v8 }
 0x80e   : > { %v1711_v27 = vpop.eup %1710 }
 0x80f   : > { %v1270_v28 = vmul.f32 %v1711_v27, %v1709_v23 }
 0x811   : > { %1668 = vmatmul.mubr.msk.f32.vlgmr.msra.gmra.mxu0 %vm547_vm5, %v1270_v28 }
 0x8d1   : > { %v1344_v29 = vpop.f32.mrf.mxu0 }
 0x8d2   : > { %1673 = vmatmul.mubr.msk.f32.vlgmr.msra.gmra.mxu1 %vm456_vm2, %v1344_v29 }
 0x8d3   : > { %v1669_v30 = vpop.f32.mrf.mxu0 }
 0x992   : > { %v1417_v31 = vpop.f32.mrf.mxu1 }
 0x993   : > { %v1421_v32 = vadd.f32 %v1417_v31, %v1179_v25 }
 0x994   : > { %v1674_v33 = vpop.f32.mrf.mxu1 }
 0x995   : > { %v1422_v35 = vadd.f32 %v1421_v32, %v1819_v5  ;;  %v1571_v5 = vld [vmem:[%s1950_s7] ss:$0 sm:$0xff] }
 0x997   : > { %v1430_v36 = vadd.f32 %v1570_v34, %v1422_v35 }
 0x999   : > { %v1432_v37 = vsel %vm1431_vm6, %v1430_v36, 0.0 }
 0x99a   : > { %1433 = vadd.xlane.f32.xlu1 %v1432_v37 }
 0xa23   : > { %v1434_v38 = vpop.xlane.xlu1 %1433 }
 0xa24   : > { %v1436_v39 = vmul.f32 0.03125, %v1434_v38 }
 0xa26   : > { %v1437_v40 = vsub.f32 %v1430_v36, %v1436_v39 }
 0xa28   : > { %v1438_v41 = vmul.f32 %v1437_v40, %v1437_v40 }
 0xa2a   : > { %v1439_v42 = vsel %vm1431_vm6, %v1438_v41, 0.0 }
 0xa2b   : > { %1440 = vadd.xlane.f32.xlu1 %v1439_v42 }
 0xab4   : > { %v1441_v43 = vpop.xlane.xlu1 %1440 }
 0xab5   : > { %v1442_v44 = vmul.f32 0.03125, %v1441_v43 }
 0xab7   : > { %v1443_v45 = vadd.f32 1e-05, %v1442_v44 }
 0xab9   : > { %1712 = vrsqrt.f32 %v1443_v45 }
 0xac6   : > { %v1713_v46 = vpop.eup %1712 }
 0xac7   : > { %v1445_v47 = vmul.f32 %v1713_v46, %v1437_v40 }
 0xac9   : > { %v1453_v49 = vmul.f32 %v1571_v5, %v1445_v47 }
 0xacb   : > { %v1461_v50 = vadd.f32 %v1572_v48, %v1453_v49 }
 0xacd   : > { %1462 = vst.msk [vmem:[%s361_s13] sm:$0xf] %vm1431_vm6, %v1461_v50 }
 0xace PF: > { %s19_s29 = sadd.s32 1, %s1720_s29  }
 0xacf   : > { %p16_p4 = scmp.ge.s32.totalorder %s19_s29, 4  }
 0xad1   :  { %18 = sbr.rel (!%p16_p4) target bundleno = 1 (0x1), region = 92 }

// kernel: forward.27
= control target key start
LH: loop header
LB: loop body
LE: loop exit
PB: predicated region body
PF: predicated region fallthrough
CT: control target
= control target key end

     0   :  { %s1785_s29 = smov 0   ;;  %s1943_s0 = inlined_call_operand.vmem [shape: f32[2,6,32], index: 0, kind: input, shape index: {}, may-alias: {0,1}]   ;;  %s1944_s1 = inlined_call_operand.vmem [shape: f32[2,6,32], index: 1, kind: input, shape index: {}, may-alias: {0,1}]   ;;  %s1945_s2 = inlined_call_operand.vmem [shape: f32[32,96], index: 2, kind: input, shape index: {}]   ;;  %s1946_s3 = inlined_call_operand.vmem [shape: f32[1,96], index: 3, kind: input, shape index: {}]   ;;  %s1947_s4 = inlined_call_operand.vmem [shape: f32[32,32], index: 4, kind: input, shape index: {}]   ;;  %s1948_s5 = inlined_call_operand.vmem [shape: f32[1,32], index: 5, kind: input, shape index: {}]   ;;  %s1949_s6 = inlined_call_operand.vmem [shape: f32[2,6,6], index: 6, kind: input, shape index: {}]   ;;  %s1950_s7 = inlined_call_operand.vmem [shape: f32[1,32], index: 7, kind: input, shape index: {}]   ;;  %s1951_s8 = inlined_call_operand.vmem [shape: f32[1,32], index: 8, kind: input, shape index: {}]   ;;  %s1952_s9 = inlined_call_operand.vmem [shape: f32[2,6,32], index: 9, kind: output, shape index: {}]  }
   0x1 LB: > { %s1540_s30 = sadd.s32 4294967295, %s1720_s29   ;;  %p1544_p0 = scmp.ge.s32.totalorder %s1720_s29, 1  ;;  %s1720_s29 = sphi %s1785_s29, %s19_s29  }
   0x2   : > { %p304_p1 = scmp.lt.s32.totalorder %s1720_s29, 3 }
   0x4   : > { %p305_p2 = pnand %p1544_p0, %p304_p1 }
   0x5   : > { %p346_p3 = scmp.lt.s32.totalorder (!%p305_p2), %s1540_s30, 1  ;;  %s1724_s24 = smov (!%p305_p2), 120  }
   0x6   : > { %308 = sbr.rel (%p305_p2) target bundleno = 2766 (0xace), region = 56  ;;  %s1725_s25 = smov (!%p305_p2), 96  }
   0x7   : > { %s1726_s26 = smov (!%p305_p2), 88   ;;  %s1728_s10 = smov (!%p305_p2), 64  }
   0x8   : > { %s1729_s11 = smov (!%p305_p2), 80   ;;  %s1730_s12 = smov (!%p305_p2), 112  }
   0x9   : > { %s1731_s18 = smov (!%p305_p2), 72   ;;  %s1732_s19 = smov (!%p305_p2), 104  }
   0xa   : > { %s1733_s20 = smov (!%p305_p2), 48   ;;  %s1734_s23 = smov (!%p305_p2), 40  }
   0xb   : > { %v366_v0 = vld [vmem:[%s1945_s2 + $0x18] sm:$0xff]  ;;  %v1722_v1 = vmov 0.0   ;;  %v365_v2 = vld [vmem:[%s1945_s2 + $0x10] sm:$0xff]  ;;  %vm1723_vm0 = vmmov 0   ;;  %s1954_s30 = smov (!%p346_p3, %s1540_s30), 1  ;;  %v364_v3 = vld [vmem:[%s1945_s2 + $0x8] sm:$0xff] }
   0xc   : > { %1604 = vmatprep.subr.mxu0 %v1722_v1  ;;  %1612 = vmatprep.mubr.msk.f32.mxu0 %vm1723_vm0, %v1722_v1  ;;  %s1809_s16 = sshll.u32 %s1954_s30, 3  ;;  %v363_v4 = vld [vmem:[%s1945_s2] sm:$0xff]  ;;  %vm374_vm1 = vcmask 261120   ;;  %vm456_vm2 = vcmask 64512   ;;  %vm533_vm3 = vcmask 46080   ;;  %s1727_s30 = smov 56  }
   0xd   : > { %1605 = vmatpush3.msra.mxu0 %v366_v0  ;;  %1615 = vmatprep.subr.mxu1 %v1722_v1  ;;  %s349_s21 = scalar_lea.vmem %s1943_s0, %s1809_s16  ;;  %v1548_v6 = vld [vmem:[%s1946_s3] ss:$0 sm:$0xff]  ;;  %s357_s28 = scalar_lea.vmem %s1949_s6, %s1809_s16  ;;  %vm551_vm4 = vcmask 1045504   ;;  %vm547_vm5 = vcmask 48128   ;;  %v450_v43 = vld [vmem:[%s1947_s4 + $0x8] sm:$0xff]  ;;  %vm1431_vm6 = vcmask 259072  }
   0xe   : > { %1606 = vmatprep.subr.mxu0 %v1722_v1  ;;  %1617 = vmatprep.mubr.msk.f32.mxu1 %vm1723_vm0, %v1722_v1  ;;  %v1819_v5 = vld [vmem:[%s349_s21] sm:$0x3f]  ;;  %s361_s13 = scalar_lea.vmem %s1952_s9, %s1809_s16 }
   0xf   : > { %1607 = vmatpush3.msra.mxu0 %v365_v2  ;;  %v1849_v14 = vld [vmem:[%s357_s28] sm:$0x3f] }
  0x10   : > { %1608 = vmatprep.subr.mxu0 %v1722_v1  ;;  %v449_v42 = vld [vmem:[%s1947_s4] sm:$0xff] }
  0x11   : > { %1609 = vmatpush3.msra.mxu0 %v364_v3 }
  0x12   : > { %1610 = vmatprep.subr.mxu0 %v1722_v1 }
  0x13   : > { %1611 = vmatpush3.msra.mxu0 %v363_v4 }
  0x14   : > { %1613 = vmatmul.mubr.msk.f32.vlgmr.msra.gmra.mxu0 %vm374_vm1, %v1819_v5  ;;  %1625 = vmatprep.subr.mxu0 %v1722_v1 }
  0x15   : > { %1627 = vmatprep.mubr.msk.f32.mxu0 %vm1723_vm0, %v1722_v1 }
  0xd4   : > { %v444_v7 = vpop.f32.mrf.mxu0 }
  0xd5   : > { %v1829_v8 = vadd.f32 %v1548_v6, %v444_v7 }
  0xd6   : > { %v1614_v9 = vpop.f32.mrf.mxu0 }
  0xd7   : > { %624 = vrot.lane.b32.xlu1 %v1829_v8, %s1724_s24  ;;  %454 = vrot.lane.b32.xlu0 %v1829_v8, %s1725_s25 }
  0xdb   : > { %626 = vrot.lane.b32.xlu0 %v1829_v8, %s1726_s26 }
 0x149   : > { %v455_v10 = vpop.permute.xlu0 %454  ;;  %v625_v12 = vpop.permute.xlu1 %624 }
 0x14a   : > { %1616 = vmatpush3.xpose.msk.msra.mxu1 %vm456_vm2, %v455_v10  ;;  %v451_v10 = vld [vmem:[%s1947_s4 + $0x10] sm:$0xff] }
 0x14b   : > { %1620 = vmatprep.subr.mxu1 %v1722_v1 }
 0x14d   : > { %1618 = vmatmul.mubr.msk.f32.vlgmr.msra.gmra.mxu1 %vm456_vm2, %v1829_v8  ;;  %v627_v11 = vpop.permute.xlu0 %626 }
 0x14e   : > { %1626 = vmatpush3.xpose.msk.msra.mxu0 %vm456_vm2, %v627_v11  ;;  %1622 = vmatprep.mubr.msk.f32.mxu1 %vm1723_vm0, %v1722_v1 }
 0x14f   : > { %1635 = vmatprep.subr.mxu0 %v1722_v1 }
 0x151   : > { %1628 = vmatmul.mubr.msk.f32.vlgmr.msra.gmra.mxu0 %vm456_vm2, %v625_v12 }
 0x152   : > { %1637 = vmatprep.mubr.msk.f32.mxu0 %vm1723_vm0, %v1722_v1  ;;  %1636 = vmatpush3.msra.mxu0 %v450_v43 }
 0x153   : > { %1645 = vmatprep.subr.mxu0 %v1722_v1 }
 0x20d   : > { %v527_v13 = vpop.f32.mrf.mxu1 }
 0x20e   : > { %v531_v15 = vmul.f32 0.35355338, %v527_v13 }
 0x20f   : > { %v1619_v16 = vpop.f32.mrf.mxu1 }
 0x210   : > { %v532_v17 = vadd.f32 %v531_v15, %v1849_v14 }
 0x211   : > { %v698_v18 = vpop.f32.mrf.mxu0 }
 0x212   : > { %v702_v19 = vmul.f32 0.35355338, %v698_v18  ;;  %v534_v20 = vsel %vm533_vm3, %v532_v17, -inf }
 0x213   : > { %535 = vmax.xlane.f32.xlu1 %v534_v20  ;;  %v1629_v21 = vpop.f32.mrf.mxu0 }
 0x214   : > { %v703_v22 = vadd.f32 %v702_v19, %v1849_v14 }
 0x216   : > { %v704_v23 = vsel %vm533_vm3, %v703_v22, -inf }
 0x217   : > { %705 = vmax.xlane.f32.xlu0 %v704_v23 }
 0x29c   : > { %v536_v24 = vpop.xlane.xlu1 %535 }
 0x29d   : > { %v537_v25 = vsub.f32 %v532_v17, %v536_v24 }
 0x29f   : > { %v538_v26 = vmul.f32 1.442695, %v537_v25 }
 0x2a0   : > { %v706_v27 = vpop.xlane.xlu0 %705 }
 0x2a1   : > { %1696 = vpow2.f32 %v538_v26  ;;  %v707_v28 = vsub.f32 %v703_v22, %v706_v27 }
 0x2a3   : > { %v708_v29 = vmul.f32 1.442695, %v707_v28 }
 0x2a5   : > { %1698 = vpow2.f32 %v708_v29 }
 0x2ae   : > { %v1697_v30 = vpop.eup %1696 }
 0x2af   : > { %v540_v31 = vsel %vm533_vm3, %v1697_v30, 0.0 }
 0x2b0   : > { %541 = vadd.xlane.f32.xlu0 %v540_v31 }
 0x2b2   : > { %v1699_v32 = vpop.eup %1698 }
 0x2b3   : > { %v710_v33 = vsel %vm533_vm3, %v1699_v32, 0.0 }
 0x2b4   : > { %711 = vadd.xlane.f32.xlu1 %v710_v33 }
 0x2c5   : > { %715 = vrot.lane.b32.xlu1 %v1829_v8, %s1727_s30 }
 0x2c6   : > { %545 = vrot.lane.b32.xlu0 %v1829_v8, %s1728_s10 }
 0x2c9   : > { %940 = vrot.lane.b32.xlu1 %v1829_v8, %s1729_s11 }
 0x2ca   : > { %938 = vrot.lane.b32.xlu0 %v1829_v8, %s1730_s12 }
 0x339   : > { %v542_v34 = vpop.xlane.xlu0 %541 }
 0x33a   : > { %1700 = vrcp.f32 %v542_v34  ;;  %v1570_v34 = vld [vmem:[%s1948_s5] ss:$0 sm:$0xff] }
 0x33d   : > { %v712_v35 = vpop.xlane.xlu1 %711  ;;  %v546_v36 = vpop.permute.xlu0 %545 }
 0x33e   : > { %1702 = vrcp.f32 %v712_v35  ;;  %1621 = vmatpush3.msk.msra.mxu1 %vm551_vm4, %v546_v36 }
 0x33f   : > { %1630 = vmatprep.subr.mxu1 %v1722_v1 }
 0x341   : > { %v716_v39 = vpop.permute.xlu1 %715  ;;  %v939_v49 = vpop.permute.xlu0 %938 }
 0x345   : > { %v941_v47 = vpop.permute.xlu1 %940 }
 0x347   : > { %v1701_v37 = vpop.eup %1700 }
 0x348   : > { %v544_v38 = vmul.f32 %v1701_v37, %v1697_v30 }
 0x34a   : > { %1623 = vmatmul.mubr.msk.f32.vlgmr.msra.gmra.mxu1 %vm547_vm5, %v544_v38 }
 0x34b   : > { %v1703_v40 = vpop.eup %1702  ;;  %1631 = vmatpush3.msk.msra.mxu1 %vm551_vm4, %v716_v39  ;;  %1632 = vmatprep.mubr.msk.f32.mxu1 %vm1723_vm0, %v1722_v1 }
 0x34c   : > { %v714_v41 = vmul.f32 %v1703_v40, %v1699_v32  ;;  %1640 = vmatprep.subr.mxu1 %v1722_v1 }
 0x34e   : > { %1633 = vmatmul.mubr.msk.f32.vlgmr.msra.gmra.mxu1 %vm547_vm5, %v714_v41 }
 0x34f   : > { %1642 = vmatprep.mubr.msk.f32.mxu1 %vm1723_vm0, %v1722_v1  ;;  %1641 = vmatpush3.msra.mxu1 %v449_v42 }
 0x350   : > { %1650 = vmatprep.subr.mxu1 %v1722_v1 }
 0x40a   : > { %v620_v44 = vpop.f32.mrf.mxu1 }
 0x40b   : > { %1643 = vmatmul.mubr.msk.f32.vlgmr.msra.gmra.mxu1 %vm456_vm2, %v620_v44 }
 0x40c   : > { %v1624_v45 = vpop.f32.mrf.mxu1  ;;  %1652 = vmatprep.mubr.msk.f32.mxu1 %vm1723_vm0, %v1722_v1 }
 0x40e   : > { %v788_v46 = vpop.f32.mrf.mxu1 }
 0x40f   : > { %1638 = vmatmul.mubr.msk.f32.vlgmr.msra.gmra.mxu0 %vm456_vm2, %v788_v46 }
 0x410   : > { %1646 = vmatpush3.xpose.msk.msra.mxu0 %vm456_vm2, %v941_v47  ;;  %v1634_v48 = vpop.f32.mrf.mxu1  ;;  %1647 = vmatprep.mubr.msk.f32.mxu0 %vm1723_vm0, %v1722_v1 }
 0x411   : > { %1655 = vmatprep.subr.mxu0 %v1722_v1  ;;  %v1572_v48 = vld [vmem:[%s1951_s8] ss:$0 sm:$0xff] }
 0x413   : > { %1648 = vmatmul.mubr.msk.f32.vlgmr.msra.gmra.mxu0 %vm456_vm2, %v939_v49 }
 0x414   : > { %1657 = vmatprep.mubr.msk.f32.mxu0 %vm1723_vm0, %v1722_v1  ;;  %1656 = vmatpush3.msra.mxu0 %v451_v10 }
 0x415   : > { %1665 = vmatprep.subr.mxu0 %v1722_v1 }
 0x4cb   : > { %v934_v50 = vpop.f32.mrf.mxu1 }
 0x4cd   : > { %v1644_v51 = vpop.f32.mrf.mxu1 }
 0x4cf   : > { %v861_v52 = vpop.f32.mrf.mxu0 }
 0x4d0   : > { %v935_v53 = vadd.f32 %v934_v50, %v861_v52 }
 0x4d1   : > { %v1639_v54 = vpop.f32.mrf.mxu0 }
 0x4d3   : > { %v1012_v55 = vpop.f32.mrf.mxu0 }
 0x4d4   : > { %v1016_v56 = vmul.f32 0.35355338, %v1012_v55 }
 0x4d5   : > { %v1649_v57 = vpop.f32.mrf.mxu0 }
 0x4d6   : > { %v1017_v58 = vadd.f32 %v1016_v56, %v1849_v14 }
 0x4d8   : > { %v1018_v59 = vsel %vm533_vm3, %v1017_v58, -inf }
 0x4d9   : > { %1019 = vmax.xlane.f32.xlu1 %v1018_v59 }
 0x4ea   : > { %1182 = vrot.lane.b32.xlu1 %v1829_v8, %s1731_s18 }
 0x4ee   : > { %1180 = vrot.lane.b32.xlu1 %v1829_v8, %s1732_s19 }
 0x562   : > { %v1020_v60 = vpop.xlane.xlu1 %1019 }
 0x563   : > { %v1021_v61 = vsub.f32 %v1017_v58, %v1020_v60 }
 0x565   : > { %v1022_v62 = vmul.f32 1.442695, %v1021_v61 }
 0x566   : > { %v1183_v6 = vpop.permute.xlu1 %1182 }
 0x567   : > { %1704 = vpow2.f32 %v1022_v62 }
 0x56a   : > { %v1181_v9 = vpop.permute.xlu1 %1180 }
 0x574   : > { %v1705_v63 = vpop.eup %1704 }
 0x575   : > { %v1024_v0 = vsel %vm533_vm3, %v1705_v63, 0.0 }
 0x576   : > { %1025 = vadd.xlane.f32.xlu0 %v1024_v0 }
 0x58c   : > { %1029 = vrot.lane.b32.xlu0 %v1829_v8, %s1733_s20 }
 0x5ff   : > { %v1026_v2 = vpop.xlane.xlu0 %1025 }
 0x600   : > { %1706 = vrcp.f32 %v1026_v2 }
 0x603   : > { %v1030_v3 = vpop.permute.xlu0 %1029 }
 0x604   : > { %1651 = vmatpush3.msk.msra.mxu1 %vm551_vm4, %v1030_v3 }
 0x605   : > { %1660 = vmatprep.subr.mxu1 %v1722_v1 }
 0x60d   : > { %v1707_v4 = vpop.eup %1706 }
 0x60e   : > { %v1028_v7 = vmul.f32 %v1707_v4, %v1705_v63 }
 0x610   : > { %1653 = vmatmul.mubr.msk.f32.vlgmr.msra.gmra.mxu1 %vm547_vm5, %v1028_v7 }
 0x611   : > { %1661 = vmatpush3.xpose.msk.msra.mxu1 %vm456_vm2, %v1183_v6  ;;  %1662 = vmatprep.mubr.msk.f32.mxu1 %vm1723_vm0, %v1722_v1 }
 0x612   : > { %1670 = vmatprep.subr.mxu1 %v1722_v1 }
 0x614   : > { %1663 = vmatmul.mubr.msk.f32.vlgmr.msra.gmra.mxu1 %vm456_vm2, %v1181_v9 }
 0x615   : > { %1672 = vmatprep.mubr.msk.f32.mxu1 %vm1723_vm0, %v1722_v1 }
 0x6d0   : > { %v1102_v11 = vpop.f32.mrf.mxu1 }
 0x6d1   : > { %1658 = vmatmul.mubr.msk.f32.vlgmr.msra.gmra.mxu0 %vm456_vm2, %v1102_v11 }
 0x6d2   : > { %v1654_v12 = vpop.f32.mrf.mxu1  ;;  %1667 = vmatprep.mubr.msk.f32.mxu0 %vm1723_vm0, %v1722_v1 }
 0x6d4   : > { %v1254_v13 = vpop.f32.mrf.mxu1 }
 0x6d5   : > { %v1258_v15 = vmul.f32 0.35355338, %v1254_v13 }
 0x6d6   : > { %v1664_v16 = vpop.f32.mrf.mxu1 }
 0x6d7   : > { %v1259_v17 = vadd.f32 %v1258_v15, %v1849_v14  ;;  %v452_v14 = vld [vmem:[%s1947_s4 + $0x18] sm:$0xff] }
 0x6d8   : > { %1671 = vmatpush3.msra.mxu1 %v452_v14 }
 0x6d9   : > { %v1260_v18 = vsel %vm533_vm3, %v1259_v17, -inf }
 0x6da   : > { %1261 = vmax.xlane.f32.xlu0 %v1260_v18 }
 0x6f0   : > { %1271 = vrot.lane.b32.xlu0 %v1829_v8, %s1734_s23 }
 0x763   : > { %v1262_v19 = vpop.xlane.xlu0 %1261 }
 0x764   : > { %v1263_v20 = vsub.f32 %v1259_v17, %v1262_v19 }
 0x766   : > { %v1264_v21 = vmul.f32 1.442695, %v1263_v20 }
 0x767   : > { %v1272_v22 = vpop.permute.xlu0 %1271 }
 0x768   : > { %1708 = vpow2.f32 %v1264_v21  ;;  %1666 = vmatpush3.msk.msra.mxu0 %vm551_vm4, %v1272_v22 }
 0x775   : > { %v1709_v23 = vpop.eup %1708 }
 0x776   : > { %v1266_v1 = vsel %vm533_vm3, %v1709_v23, 0.0 }
 0x777   : > { %1267 = vadd.xlane.f32.xlu1 %v1266_v1 }
 0x791   : > { %v1175_v24 = vpop.f32.mrf.mxu0 }
 0x792   : > { %v1179_v25 = vadd.f32 %v1175_v24, %v935_v53 }
 0x793   : > { %v1659_v26 = vpop.f32.mrf.mxu0 }
 0x800   : > { %v1268_v8 = vpop.xlane.xlu1 %1267 }
 0x801   : > { %1710 = vrcp.f32 %v1268_v8 }
 0x80e   : > { %v1711_v27 = vpop.eup %1710 }
 0x80f   : > { %v1270_v28 = vmul.f32 %v1711_v27, %v1709_v23 }
 0x811   : > { %1668 = vmatmul.mubr.msk.f32.vlgmr.msra.gmra.mxu0 %vm547_vm5, %v1270_v28 }
 0x8d1   : > { %v1344_v29 = vpop.f32.mrf.mxu0 }
 0x8d2   : > { %1673 = vmatmul.mubr.msk.f32.vlgmr.msra.gmra.mxu1 %vm456_vm2, %v1344_v29 }
 0x8d3   : > { %v1669_v30 = vpop.f32.mrf.mxu0 }
 0x992   : > { %v1417_v31 = vpop.f32.mrf.mxu1 }
 0x993   : > { %v1421_v32 = vadd.f32 %v1417_v31, %v1179_v25 }
 0x994   : > { %v1674_v33 = vpop.f32.mrf.mxu1 }
 0x995   : > { %v1422_v35 = vadd.f32 %v1421_v32, %v1819_v5  ;;  %v1571_v5 = vld [vmem:[%s1950_s7] ss:$0 sm:$0xff] }
 0x997   : > { %v1430_v36 = vadd.f32 %v1570_v34, %v1422_v35 }
 0x999   : > { %v1432_v37 = vsel %vm1431_vm6, %v1430_v36, 0.0 }
 0x99a   : > { %1433 = vadd.xlane.f32.xlu1 %v1432_v37 }
 0xa23   : > { %v1434_v38 = vpop.xlane.xlu1 %1433 }
 0xa24   : > { %v1436_v39 = vmul.f32 0.03125, %v1434_v38 }
 0xa26   : > { %v1437_v40 = vsub.f32 %v1430_v36, %v1436_v39 }
 0xa28   : > { %v1438_v41 = vmul.f32 %v1437_v40, %v1437_v40 }
 0xa2a   : > { %v1439_v42 = vsel %vm1431_vm6, %v1438_v41, 0.0 }
 0xa2b   : > { %1440 = vadd.xlane.f32.xlu1 %v1439_v42 }
 0xab4   : > { %v1441_v43 = vpop.xlane.xlu1 %1440 }
 0xab5   : > { %v1442_v44 = vmul.f32 0.03125, %v1441_v43 }
 0xab7   : > { %v1443_v45 = vadd.f32 1e-05, %v1442_v44 }
 0xab9   : > { %1712 = vrsqrt.f32 %v1443_v45 }
 0xac6   : > { %v1713_v46 = vpop.eup %1712 }
 0xac7   : > { %v1445_v47 = vmul.f32 %v1713_v46, %v1437_v40 }
 0xac9   : > { %v1453_v49 = vmul.f32 %v1571_v5, %v1445_v47 }
 0xacb   : > { %v1461_v50 = vadd.f32 %v1572_v48, %v1453_v49 }
 0xacd   : > { %1462 = vst.msk [vmem:[%s361_s13] sm:$0x3f] %vm1431_vm6, %v1461_v50 }
 0xace PF: > { %s19_s29 = sadd.s32 1, %s1720_s29  }
 0xacf   : > { %p16_p4 = scmp.ge.s32.totalorder %s19_s29, 4  }
 0xad1   :  { %18 = sbr.rel (!%p16_p4) target bundleno = 1 (0x1), region = 92 }

// kernel: forward.33
= control target key start
LH: loop header
LB: loop body
LE: loop exit
PB: predicated region body
PF: predicated region fallthrough
CT: control target
= control target key end

     0   :  { %s374_s12 = smov 0   ;;  %s406_s0 = inlined_call_operand.vmem [shape: f32[2,6,32], index: 0, kind: input, shape index: {}]   ;;  %s407_s1 = inlined_call_operand.vmem [shape: f32[32,16], index: 1, kind: input, shape index: {}]   ;;  %s408_s2 = inlined_call_operand.vmem [shape: f32[1,16], index: 2, kind: input, shape index: {}]   ;;  %s409_s3 = inlined_call_operand.vmem [shape: f32[2,6,16], index: 3, kind: output, shape index: {}]  }
   0x1 LB: > { %s307_s13 = sadd.s32 4294967295, %s350_s12   ;;  %p311_p0 = scmp.ge.s32.totalorder %s350_s12, 1  ;;  %s350_s12 = sphi %s374_s12, %s13_s12  }
   0x2   : > { %p136_p1 = scmp.lt.s32.totalorder %s350_s12, 3 }
   0x4   : > { %p137_p2 = pnand %p311_p0, %p136_p1 }
   0x5   : > { %p158_p3 = scmp.lt.s32.totalorder (!%p137_p2), %s307_s13, 1 }
   0x6   : > { %140 = sbr.rel (%p137_p2) target bundleno = 216 (0xd8), region = 32 }
   0xb   : > { %v170_v0 = vld [vmem:[%s407_s1 + $0x18] sm:$0xff]  ;;  %v352_v1 = vmov 0.0   ;;  %v169_v2 = vld [vmem:[%s407_s1 + $0x10] sm:$0xff]  ;;  %vm353_vm0 = vmmov 0   ;;  %s411_s13 = smov (!%p158_p3, %s307_s13), 1  ;;  %v168_v3 = vld [vmem:[%s407_s1 + $0x8] sm:$0xff] }
   0xc   : > { %323 = vmatprep.subr.mxu0 %v352_v1  ;;  %331 = vmatprep.mubr.msk.f32.mxu0 %vm353_vm0, %v352_v1  ;;  %s312_s20 = sshll.u32 %s411_s13, 3  ;;  %v167_v4 = vld [vmem:[%s407_s1] sm:$0xff]  ;;  %vm178_vm1 = vcmask 261120   ;;  %vm252_vm2 = vcmask 128000  }
   0xd   : > { %324 = vmatpush3.msra.mxu0 %v170_v0  ;;  %s161_s25 = scalar_lea.vmem %s406_s0, %s312_s20  ;;  %v314_v6 = vld [vmem:[%s408_s2] ss:$0 sm:$0xff]  ;;  %s165_s30 = scalar_lea.vmem %s409_s3, %s312_s20 }
   0xe   : > { %325 = vmatprep.subr.mxu0 %v352_v1  ;;  %v166_v5 = vld [vmem:[%s161_s25] sm:$0x3f] }
   0xf   : > { %326 = vmatpush3.msra.mxu0 %v169_v2 }
  0x10   : > { %327 = vmatprep.subr.mxu0 %v352_v1 }
  0x11   : > { %328 = vmatpush3.msra.mxu0 %v168_v3 }
  0x12   : > { %329 = vmatprep.subr.mxu0 %v352_v1 }
  0x13   : > { %330 = vmatpush3.msra.mxu0 %v167_v4 }
  0x14   : > { %332 = vmatmul.mubr.msk.f32.vlgmr.msra.gmra.mxu0 %vm178_vm1, %v166_v5 }
  0xd4   : > { %v248_v7 = vpop.f32.mrf.mxu0 }
  0xd5   : > { %v249_v8 = vadd.f32 %v314_v6, %v248_v7 }
  0xd6   : > { %v333_v9 = vpop.f32.mrf.mxu0 }
  0xd7   : > { %253 = vst.msk [vmem:[%s165_s30] sm:$0x3f] %vm252_vm2, %v249_v8 }
  0xd8 PF: > { %s13_s12 = sadd.s32 1, %s350_s12  }
  0xd9   : > { %p10_p4 = scmp.ge.s32.totalorder %s13_s12, 4  }
  0xdb   :  { %12 = sbr.rel (!%p10_p4) target bundleno = 1 (0x1), region = 62 }

// kernel: forward.28
= control target key start
LH: loop header
LB: loop body
LE: loop exit
PB: predicated region body
PF: predicated region fallthrough
CT: control target
= control target key end

     0   :  { %s1887_s30 = smov 0   ;;  %s2064_s0 = inlined_call_operand.vmem [shape: f32[2,6,32], index: 0, kind: input, shape index: {}]   ;;  %s2065_s1 = inlined_call_operand.vmem [shape: f32[2,4,32], index: 1, kind: input, shape index: {}]   ;;  %s2066_s2 = inlined_call_operand.vmem [shape: f32[32,96], index: 2, kind: input, shape index: {}]   ;;  %s2067_s3 = inlined_call_operand.vmem [shape: f32[1,96], index: 3, kind: input, shape index: {}]   ;;  %s2068_s4 = inlined_call_operand.vmem [shape: f32[32,32], index: 4, kind: input, shape index: {}]   ;;  %s2069_s5 = inlined_call_operand.vmem [shape: f32[1,32], index: 5, kind: input, shape index: {}]   ;;  %s2070_s6 = inlined_call_operand.vmem [shape: f32[2,6,4], index: 6, kind: input, shape index: {}]   ;;  %s2071_s7 = inlined_call_operand.vmem [shape: f32[1,32], index: 7, kind: input, shape index: {}]   ;;  %s2072_s8 = inlined_call_operand.vmem [shape: f32[1,32], index: 8, kind: input, shape index: {}]   ;;  %s2073_s9 = inlined_call_operand.vmem [shape: f32[2,6,32], index: 9, kind: output, shape index: {}]  }
   0x1 LB: > { %s1632_s10 = sadd.s32 4294967295, %s1826_s30   ;;  %p1636_p0 = scmp.ge.s32.totalorder %s1826_s30, 1  ;;  %s1826_s30 = sphi %s1887_s30, %s19_s30  }
   0x2   : > { %p304_p1 = scmp.lt.s32.totalorder %s1826_s30, 3 }
   0x4   : > { %p305_p2 = pnand %p1636_p0, %p304_p1 }
   0x5   : > { %s1828_s15 = smov (!%p305_p2), 96   ;;  %p346_p3 = scmp.lt.s32.totalorder (!%p305_p2), %s1632_s10, 1 }
   0x6   : > { %308 = sbr.rel (%p305_p2) target bundleno = 2878 (0xb3e), region = 56  ;;  %s1832_s14 = smov (!%p305_p2), 112  }
   0x7   : > { %s1833_s16 = smov (!%p305_p2), 88   ;;  %s1834_s21 = smov (!%p305_p2), 104  }
   0x8   : > { %s1835_s22 = smov (!%p305_p2), 80   ;;  %s1836_s25 = smov (!%p305_p2), 72  }
   0xb   : > { %v366_v0 = vld [vmem:[%s2066_s2 + $0x18] sm:$0xff]  ;;  %v364_v1 = vld [vmem:[%s2066_s2 + $0x8] sm:$0xff]  ;;  %v365_v2 = vld [vmem:[%s2066_s2 + $0x10] sm:$0xff]  ;;  %v1829_v4 = vmov 0.0   ;;  %vm1830_vm0 = vmmov 0   ;;  %s2075_s10 = smov (!%p346_p3, %s1632_s10), 1 }
   0xc   : > { %459 = vrot.lane.b32.xlu0 %v366_v0, %s1828_s15  ;;  %455 = vrot.lane.b32.xlu1 %v364_v1, %s1828_s15  ;;  %v363_v3 = vld [vmem:[%s2066_s2] sm:$0xff]  ;;  %s1918_s20 = sshll.u32 %s2075_s10, 3  ;;  %vm375_vm1 = vcmask 261120   ;;  %s1638_s26 = sshll.u32 %s2075_s10, 2  ;;  %vm546_vm2 = vcmask 64512   ;;  %vm625_vm3 = vcmask 29696  }
   0xd   : > { %1714 = vmatprep.subr.mxu1 %v1829_v4  ;;  %1703 = vmatprep.subr.mxu0 %v1829_v4  ;;  %s349_s23 = scalar_lea.vmem %s2064_s0, %s1918_s20  ;;  %v1641_v5 = vld [vmem:[%s2067_s3] ss:$0 sm:$0xff]  ;;  %s353_s29 = scalar_lea.vmem %s2065_s1, %s1638_s26  ;;  %vm643_vm4 = vcmask 1043456   ;;  %vm639_vm5 = vcmask 31744   ;;  %v543_v46 = vld [vmem:[%s2068_s4 + $0x8] sm:$0xff]  ;;  %vm1523_vm6 = vcmask 259072  }
   0xe   : > { %1704 = vmatpush3.msra.mxu0 %v366_v0  ;;  %1722 = vmatprep.mubr.msk.f32.mxu1 %vm1830_vm0, %v1829_v4  ;;  %v1928_v6 = vld [vmem:[%s349_s23] sm:$0x3f]  ;;  %s1831_s10 = smov 120   ;;  %s357_s13 = scalar_lea.vmem %s2070_s6, %s1918_s20 }
   0xf   : > { %1705 = vmatprep.subr.mxu0 %v1829_v4  ;;  %1711 = vmatprep.mubr.msk.f32.mxu0 %vm1830_vm0, %v1829_v4  ;;  %v368_v11 = vld [vmem:[%s353_s29] sm:$0xf] }
  0x10   : > { %457 = vrot.lane.b32.xlu0 %v365_v2, %s1828_s15  ;;  %453 = vrot.lane.b32.xlu1 %v363_v3, %s1828_s15  ;;  %v1969_v22 = vld [vmem:[%s357_s13] sm:$0x3f] }
  0x11   : > { %1706 = vmatpush3.msra.mxu0 %v365_v2  ;;  %v542_v51 = vld [vmem:[%s2068_s4] sm:$0xff] }
  0x12   : > { %1707 = vmatprep.subr.mxu0 %v1829_v4 }
  0x13   : > { %1708 = vmatpush3.msra.mxu0 %v364_v1 }
  0x14   : > { %1709 = vmatprep.subr.mxu0 %v1829_v4  ;;  %465 = vrot.lane.b32.xlu0 %v1641_v5, %s1828_s15 }
  0x15   : > { %1710 = vmatpush3.msra.mxu0 %v363_v3 }
  0x16   : > { %1712 = vmatmul.mubr.msk.f32.vlgmr.msra.gmra.mxu0 %vm375_vm1, %v1928_v6  ;;  %1725 = vmatprep.subr.mxu0 %v1829_v4 }
  0x17   : > { %1727 = vmatprep.mubr.msk.f32.mxu0 %vm1830_vm0, %v1829_v4 }
  0x7e   : > { %v460_v7 = vpop.permute.xlu0 %459  ;;  %v456_v8 = vpop.permute.xlu1 %455 }
  0x7f   : > { %1715 = vmatpush3.msra.mxu1 %v460_v7 }
  0x80   : > { %1716 = vmatprep.subr.mxu1 %v1829_v4 }
  0x82   : > { %v458_v9 = vpop.permute.xlu0 %457  ;;  %v454_v10 = vpop.permute.xlu1 %453 }
  0x83   : > { %1717 = vmatpush3.msra.mxu1 %v458_v9 }
  0x84   : > { %1718 = vmatprep.subr.mxu1 %v1829_v4 }
  0x85   : > { %1719 = vmatpush3.msra.mxu1 %v456_v8 }
  0x86   : > { %1720 = vmatprep.subr.mxu1 %v1829_v4  ;;  %v466_v15 = vpop.permute.xlu0 %465 }
  0x87   : > { %1721 = vmatpush3.msra.mxu1 %v454_v10 }
  0x88   : > { %1723 = vmatmul.mubr.msk.f32.vlgmr.msra.gmra.mxu1 %vm375_vm1, %v368_v11  ;;  %1730 = vmatprep.subr.mxu1 %v1829_v4 }
  0x89   : > { %1732 = vmatprep.mubr.msk.f32.mxu1 %vm1830_vm0, %v1829_v4 }
  0xd6   : > { %v445_v12 = vpop.f32.mrf.mxu0 }
  0xd7   : > { %v1947_v13 = vadd.f32 %v1641_v5, %v445_v12 }
  0xd8   : > { %v1713_v14 = vpop.f32.mrf.mxu0 }
  0xd9   : > { %716 = vrot.lane.b32.xlu0 %v1947_v13, %s1831_s10 }
 0x148   : > { %v537_v16 = vpop.f32.mrf.mxu1 }
 0x149   : > { %v1950_v17 = vadd.f32 %v537_v16, %v466_v15  ;;  %v544_v16 = vld [vmem:[%s2068_s4 + $0x10] sm:$0xff] }
 0x14a   : > { %v1724_v18 = vpop.f32.mrf.mxu1 }
 0x14b   : > { %718 = vrot.lane.b32.xlu1 %v1950_v17, %s1831_s10  ;;  %1726 = vmatpush3.xpose.msk.msra.mxu0 %vm546_vm2, %v1950_v17  ;;  %v717_v20 = vpop.permute.xlu0 %716 }
 0x14c   : > { %1735 = vmatprep.subr.mxu0 %v1829_v4 }
 0x14e   : > { %1728 = vmatmul.mubr.msk.f32.vlgmr.msra.gmra.mxu0 %vm546_vm2, %v1947_v13 }
 0x14f   : > { %1737 = vmatprep.mubr.msk.f32.mxu0 %vm1830_vm0, %v1829_v4 }
 0x1bd   : > { %v719_v19 = vpop.permute.xlu1 %718 }
 0x1be   : > { %1736 = vmatpush3.xpose.msk.msra.mxu0 %vm546_vm2, %v719_v19 }
 0x1bf   : > { %1745 = vmatprep.subr.mxu0 %v1829_v4 }
 0x1c1   : > { %1738 = vmatmul.mubr.msk.f32.vlgmr.msra.gmra.mxu0 %vm546_vm2, %v717_v20 }
 0x1c2   : > { %1747 = vmatprep.mubr.msk.f32.mxu0 %vm1830_vm0, %v1829_v4  ;;  %1746 = vmatpush3.msra.mxu0 %v543_v46 }
 0x1c3   : > { %1755 = vmatprep.subr.mxu0 %v1829_v4 }
 0x20e   : > { %v619_v21 = vpop.f32.mrf.mxu0 }
 0x20f   : > { %v623_v23 = vmul.f32 0.35355338, %v619_v21 }
 0x210   : > { %v1729_v24 = vpop.f32.mrf.mxu0 }
 0x211   : > { %v624_v25 = vadd.f32 %v623_v23, %v1969_v22 }
 0x213   : > { %v626_v26 = vsel %vm625_vm3, %v624_v25, -inf }
 0x214   : > { %627 = vmax.xlane.f32.xlu1 %v626_v26 }
 0x281   : > { %v790_v27 = vpop.f32.mrf.mxu0 }
 0x282   : > { %v794_v28 = vmul.f32 0.35355338, %v790_v27 }
 0x283   : > { %v1739_v29 = vpop.f32.mrf.mxu0 }
 0x284   : > { %v795_v30 = vadd.f32 %v794_v28, %v1969_v22 }
 0x286   : > { %v796_v31 = vsel %vm625_vm3, %v795_v30, -inf }
 0x287   : > { %797 = vmax.xlane.f32.xlu0 %v796_v31 }
 0x29d   : > { %v628_v32 = vpop.xlane.xlu1 %627 }
 0x29e   : > { %v629_v33 = vsub.f32 %v624_v25, %v628_v32 }
 0x2a0   : > { %v630_v34 = vmul.f32 1.442695, %v629_v33 }
 0x2a2   : > { %1802 = vpow2.f32 %v630_v34 }
 0x2af   : > { %v1803_v35 = vpop.eup %1802 }
 0x2b0   : > { %v632_v36 = vsel %vm625_vm3, %v1803_v35, 0.0 }
 0x2b1   : > { %633 = vadd.xlane.f32.xlu0 %v632_v36 }
 0x2c7   : > { %637 = vrot.lane.b32.xlu0 %v1950_v17, %s1828_s15  ;;  %s361_s15 = scalar_lea.vmem %s2073_s9, %s1918_s20 }
 0x2cb   : > { %1030 = vrot.lane.b32.xlu0 %v1947_v13, %s1832_s14 }
 0x310   : > { %v798_v37 = vpop.xlane.xlu0 %797 }
 0x311   : > { %v799_v38 = vsub.f32 %v795_v30, %v798_v37 }
 0x313   : > { %v800_v39 = vmul.f32 1.442695, %v799_v38 }
 0x315   : > { %1804 = vpow2.f32 %v800_v39 }
 0x322   : > { %v1805_v40 = vpop.eup %1804 }
 0x323   : > { %v802_v41 = vsel %vm625_vm3, %v1805_v40, 0.0 }
 0x324   : > { %803 = vadd.xlane.f32.xlu1 %v802_v41 }
 0x335   : > { %807 = vrot.lane.b32.xlu1 %v1950_v17, %s1833_s16 }
 0x339   : > { %1032 = vrot.lane.b32.xlu1 %v1950_v17, %s1832_s14 }
 0x33a   : > { %v634_v42 = vpop.xlane.xlu0 %633 }
 0x33b   : > { %1806 = vrcp.f32 %v634_v42  ;;  %v1664_v42 = vld [vmem:[%s2069_s5] ss:$0 sm:$0xff] }
 0x33e   : > { %v638_v43 = vpop.permute.xlu0 %637 }
 0x33f   : > { %1731 = vmatpush3.msk.msra.mxu1 %vm643_vm4, %v638_v43 }
 0x340   : > { %1740 = vmatprep.subr.mxu1 %v1829_v4 }
 0x342   : > { %v1031_v57 = vpop.permute.xlu0 %1030 }
 0x348   : > { %v1807_v44 = vpop.eup %1806 }
 0x349   : > { %v636_v45 = vmul.f32 %v1807_v44, %v1803_v35 }
 0x34b   : > { %1733 = vmatmul.mubr.msk.f32.vlgmr.msra.gmra.mxu1 %vm639_vm5, %v636_v45 }
 0x34c   : > { %1742 = vmatprep.mubr.msk.f32.mxu1 %vm1830_vm0, %v1829_v4 }
 0x3ad   : > { %v804_v47 = vpop.xlane.xlu1 %803 }
 0x3ae   : > { %1808 = vrcp.f32 %v804_v47 }
 0x3b1   : > { %v808_v48 = vpop.permute.xlu1 %807 }
 0x3b2   : > { %1741 = vmatpush3.msk.msra.mxu1 %vm643_vm4, %v808_v48 }
 0x3b3   : > { %1750 = vmatprep.subr.mxu1 %v1829_v4 }
 0x3b5   : > { %v1033_v55 = vpop.permute.xlu1 %1032 }
 0x3bb   : > { %v1809_v49 = vpop.eup %1808 }
 0x3bc   : > { %v806_v50 = vmul.f32 %v1809_v49, %v1805_v40 }
 0x3be   : > { %1743 = vmatmul.mubr.msk.f32.vlgmr.msra.gmra.mxu1 %vm639_vm5, %v806_v50 }
 0x3bf   : > { %1751 = vmatpush3.msra.mxu1 %v542_v51  ;;  %1752 = vmatprep.mubr.msk.f32.mxu1 %vm1830_vm0, %v1829_v4 }
 0x3c0   : > { %1760 = vmatprep.subr.mxu1 %v1829_v4 }
 0x40b   : > { %v712_v52 = vpop.f32.mrf.mxu1 }
 0x40c   : > { %1753 = vmatmul.mubr.msk.f32.vlgmr.msra.gmra.mxu1 %vm546_vm2, %v712_v52 }
 0x40d   : > { %v1734_v53 = vpop.f32.mrf.mxu1  ;;  %1762 = vmatprep.mubr.msk.f32.mxu1 %vm1830_vm0, %v1829_v4 }
 0x47e   : > { %v880_v54 = vpop.f32.mrf.mxu1 }
 0x47f   : > { %1748 = vmatmul.mubr.msk.f32.vlgmr.msra.gmra.mxu0 %vm546_vm2, %v880_v54 }
 0x480   : > { %1756 = vmatpush3.xpose.msk.msra.mxu0 %vm546_vm2, %v1033_v55  ;;  %v1744_v56 = vpop.f32.mrf.mxu1  ;;  %1757 = vmatprep.mubr.msk.f32.mxu0 %vm1830_vm0, %v1829_v4 }
 0x481   : > { %1765 = vmatprep.subr.mxu0 %v1829_v4  ;;  %v1666_v56 = vld [vmem:[%s2072_s8] ss:$0 sm:$0xff] }
 0x483   : > { %1758 = vmatmul.mubr.msk.f32.vlgmr.msra.gmra.mxu0 %vm546_vm2, %v1031_v57 }
 0x484   : > { %1767 = vmatprep.mubr.msk.f32.mxu0 %vm1830_vm0, %v1829_v4  ;;  %1766 = vmatpush3.msra.mxu0 %v544_v16 }
 0x485   : > { %1775 = vmatprep.subr.mxu0 %v1829_v4 }
 0x4cc   : > { %v1026_v58 = vpop.f32.mrf.mxu1 }
 0x4ce   : > { %v1754_v59 = vpop.f32.mrf.mxu1 }
 0x53f   : > { %v953_v60 = vpop.f32.mrf.mxu0 }
 0x540   : > { %v1027_v31 = vadd.f32 %v1026_v58, %v953_v60 }
 0x541   : > { %v1749_v61 = vpop.f32.mrf.mxu0 }
 0x543   : > { %v1104_v62 = vpop.f32.mrf.mxu0 }
 0x544   : > { %v1108_v63 = vmul.f32 0.35355338, %v1104_v62 }
 0x545   : > { %v1759_v0 = vpop.f32.mrf.mxu0 }
 0x546   : > { %v1109_v1 = vadd.f32 %v1108_v63, %v1969_v22 }
 0x548   : > { %v1110_v2 = vsel %vm625_vm3, %v1109_v1, -inf }
 0x549   : > { %1111 = vmax.xlane.f32.xlu1 %v1110_v2 }
 0x55a   : > { %1274 = vrot.lane.b32.xlu1 %v1950_v17, %s1834_s21 }
 0x55e   : > { %1272 = vrot.lane.b32.xlu1 %v1947_v13, %s1834_s21 }
 0x5d2   : > { %v1112_v3 = vpop.xlane.xlu1 %1111 }
 0x5d3   : > { %v1113_v5 = vsub.f32 %v1109_v1, %v1112_v3 }
 0x5d5   : > { %v1114_v7 = vmul.f32 1.442695, %v1113_v5 }
 0x5d6   : > { %v1275_v13 = vpop.permute.xlu1 %1274 }
 0x5d7   : > { %1810 = vpow2.f32 %v1114_v7 }
 0x5da   : > { %v1273_v15 = vpop.permute.xlu1 %1272 }
 0x5e4   : > { %v1811_v8 = vpop.eup %1810 }
 0x5e5   : > { %v1116_v9 = vsel %vm625_vm3, %v1811_v8, 0.0 }
 0x5e6   : > { %1117 = vadd.xlane.f32.xlu0 %v1116_v9 }
 0x5fc   : > { %1121 = vrot.lane.b32.xlu0 %v1950_v17, %s1835_s22 }
 0x66f   : > { %v1118_v10 = vpop.xlane.xlu0 %1117 }
 0x670   : > { %1812 = vrcp.f32 %v1118_v10 }
 0x673   : > { %v1122_v11 = vpop.permute.xlu0 %1121 }
 0x674   : > { %1761 = vmatpush3.msk.msra.mxu1 %vm643_vm4, %v1122_v11 }
 0x675   : > { %1770 = vmatprep.subr.mxu1 %v1829_v4 }
 0x67d   : > { %v1813_v12 = vpop.eup %1812 }
 0x67e   : > { %v1120_v14 = vmul.f32 %v1813_v12, %v1811_v8 }
 0x680   : > { %1763 = vmatmul.mubr.msk.f32.vlgmr.msra.gmra.mxu1 %vm639_vm5, %v1120_v14 }
 0x681   : > { %1771 = vmatpush3.xpose.msk.msra.mxu1 %vm546_vm2, %v1275_v13  ;;  %1772 = vmatprep.mubr.msk.f32.mxu1 %vm1830_vm0, %v1829_v4 }
 0x682   : > { %1780 = vmatprep.subr.mxu1 %v1829_v4 }
 0x684   : > { %1773 = vmatmul.mubr.msk.f32.vlgmr.msra.gmra.mxu1 %vm546_vm2, %v1273_v15 }
 0x685   : > { %1782 = vmatprep.mubr.msk.f32.mxu1 %vm1830_vm0, %v1829_v4 }
 0x740   : > { %v1194_v18 = vpop.f32.mrf.mxu1 }
 0x741   : > { %1768 = vmatmul.mubr.msk.f32.vlgmr.msra.gmra.mxu0 %vm546_vm2, %v1194_v18 }
 0x742   : > { %v1764_v19 = vpop.f32.mrf.mxu1  ;;  %1777 = vmatprep.mubr.msk.f32.mxu0 %vm1830_vm0, %v1829_v4 }
 0x744   : > { %v1346_v20 = vpop.f32.mrf.mxu1 }
 0x745   : > { %v1350_v21 = vmul.f32 0.35355338, %v1346_v20 }
 0x746   : > { %v1774_v23 = vpop.f32.mrf.mxu1 }
 0x747   : > { %v1351_v24 = vadd.f32 %v1350_v21, %v1969_v22  ;;  %v545_v22 = vld [vmem:[%s2068_s4 + $0x18] sm:$0xff] }
 0x748   : > { %1781 = vmatpush3.msra.mxu1 %v545_v22 }
 0x749   : > { %v1352_v25 = vsel %vm625_vm3, %v1351_v24, -inf }
 0x74a   : > { %1353 = vmax.xlane.f32.xlu0 %v1352_v25 }
 0x760   : > { %1363 = vrot.lane.b32.xlu0 %v1950_v17, %s1836_s25 }
 0x7d3   : > { %v1354_v26 = vpop.xlane.xlu0 %1353 }
 0x7d4   : > { %v1355_v27 = vsub.f32 %v1351_v24, %v1354_v26 }
 0x7d6   : > { %v1356_v28 = vmul.f32 1.442695, %v1355_v27 }
 0x7d7   : > { %v1364_v29 = vpop.permute.xlu0 %1363 }
 0x7d8   : > { %1814 = vpow2.f32 %v1356_v28  ;;  %1776 = vmatpush3.msk.msra.mxu0 %vm643_vm4, %v1364_v29 }
 0x7e5   : > { %v1815_v30 = vpop.eup %1814 }
 0x7e6   : > { %v1358_v4 = vsel %vm625_vm3, %v1815_v30, 0.0 }
 0x7e7   : > { %1359 = vadd.xlane.f32.xlu1 %v1358_v4 }
 0x801   : > { %v1267_v32 = vpop.f32.mrf.mxu0 }
 0x802   : > { %v1271_v33 = vadd.f32 %v1267_v32, %v1027_v31 }
 0x803   : > { %v1769_v17 = vpop.f32.mrf.mxu0 }
 0x870   : > { %v1360_v34 = vpop.xlane.xlu1 %1359 }
 0x871   : > { %1816 = vrcp.f32 %v1360_v34 }
 0x87e   : > { %v1817_v35 = vpop.eup %1816 }
 0x87f   : > { %v1362_v36 = vmul.f32 %v1817_v35, %v1815_v30 }
 0x881   : > { %1778 = vmatmul.mubr.msk.f32.vlgmr.msra.gmra.mxu0 %vm639_vm5, %v1362_v36 }
 0x941   : > { %v1436_v37 = vpop.f32.mrf.mxu0 }
 0x942   : > { %1783 = vmatmul.mubr.msk.f32.vlgmr.msra.gmra.mxu1 %vm546_vm2, %v1436_v37 }
 0x943   : > { %v1779_v38 = vpop.f32.mrf.mxu0 }
 0xa02   : > { %v1509_v39 = vpop.f32.mrf.mxu1 }
 0xa03   : > { %v1513_v40 = vadd.f32 %v1509_v39, %v1271_v33 }
 0xa04   : > { %v1784_v41 = vpop.f32.mrf.mxu1 }
 0xa05   : > { %v1514_v43 = vadd.f32 %v1513_v40, %v1928_v6  ;;  %v1665_v6 = vld [vmem:[%s2071_s7] ss:$0 sm:$0xff] }
 0xa07   : > { %v1522_v44 = vadd.f32 %v1664_v42, %v1514_v43 }
 0xa09   : > { %v1524_v45 = vsel %vm1523_vm6, %v1522_v44, 0.0 }
 0xa0a   : > { %1525 = vadd.xlane.f32.xlu1 %v1524_v45 }
 0xa93   : > { %v1526_v46 = vpop.xlane.xlu1 %1525 }
 0xa94   : > { %v1528_v47 = vmul.f32 0.03125, %v1526_v46 }
 0xa96   : > { %v1529_v48 = vsub.f32 %v1522_v44, %v1528_v47 }
 0xa98   : > { %v1530_v49 = vmul.f32 %v1529_v48, %v1529_v48 }
 0xa9a   : > { %v1531_v50 = vsel %vm1523_vm6, %v1530_v49, 0.0 }
 0xa9b   : > { %1532 = vadd.xlane.f32.xlu1 %v1531_v50 }
 0xb24   : > { %v1533_v51 = vpop.xlane.xlu1 %1532 }
 0xb25   : > { %v1534_v52 = vmul.f32 0.03125, %v1533_v51 }
 0xb27   : > { %v1535_v53 = vadd.f32 1e-05, %v1534_v52 }
 0xb29   : > { %1818 = vrsqrt.f32 %v1535_v53 }
 0xb36   : > { %v1819_v54 = vpop.eup %1818 }
 0xb37   : > { %v1537_v55 = vmul.f32 %v1819_v54, %v1529_v48 }
 0xb39   : > { %v1545_v57 = vmul.f32 %v1665_v6, %v1537_v55 }
 0xb3b   : > { %v1553_v58 = vadd.f32 %v1666_v56, %v1545_v57 }
 0xb3d   : > { %1554 = vst.msk [vmem:[%s361_s15] sm:$0x3f] %vm1523_vm6, %v1553_v58 }
 0xb3e PF: > { %s19_s30 = sadd.s32 1, %s1826_s30  }
 0xb3f   : > { %p16_p4 = scmp.ge.s32.totalorder %s19_s30, 4  }
 0xb41   :  { %18 = sbr.rel (!%p16_p4) target bundleno = 1 (0x1), region = 92 }

// kernel: forward.29
= control target key start
LH: loop header
LB: loop body
LE: loop exit
PB: predicated region body
PF: predicated region fallthrough
CT: control target
= control target key end

     0   :  { %s657_s24 = smov 0   ;;  %s734_s0 = inlined_call_operand.vmem [shape: f32[2,6,32], index: 0, kind: input, shape index: {}]   ;;  %s735_s1 = inlined_call_operand.vmem [shape: f32[32,64], index: 1, kind: input, shape index: {}]   ;;  %s736_s2 = inlined_call_operand.vmem [shape: f32[1,64], index: 2, kind: input, shape index: {}]   ;;  %s737_s3 = inlined_call_operand.vmem [shape: f32[64,32], index: 3, kind: input, shape index: {}]   ;;  %s738_s4 = inlined_call_operand.vmem [shape: f32[1,32], index: 4, kind: input, shape index: {}]   ;;  %s739_s5 = inlined_call_operand.vmem [shape: f32[1,32], index: 5, kind: input, shape index: {}]   ;;  %s740_s6 = inlined_call_operand.vmem [shape: f32[1,32], index: 6, kind: input, shape index: {}]   ;;  %s741_s7 = inlined_call_operand.vmem [shape: f32[2,6,32], index: 7, kind: output, shape index: {}]  }
   0x1 LB: > { %s536_s25 = sadd.s32 4294967295, %s613_s24   ;;  %p540_p0 = scmp.ge.s32.totalorder %s613_s24, 1  ;;  %s613_s24 = sphi %s657_s24, %s17_s24  }
   0x2   : > { %p236_p1 = scmp.lt.s32.totalorder %s613_s24, 3 }
   0x4   : > { %p237_p2 = pnand %p540_p0, %p236_p1 }
   0x5   : > { %p266_p3 = scmp.lt.s32.totalorder (!%p237_p2), %s536_s25, 1 }
   0x6   : > { %240 = sbr.rel (%p237_p2) target bundleno = 723 (0x2d3), region = 48 }
   0xb   : > { %v278_v0 = vld [vmem:[%s735_s1 + $0x18] sm:$0xff]  ;;  %v615_v1 = vmov 0.0   ;;  %v277_v2 = vld [vmem:[%s735_s1 + $0x10] sm:$0xff]  ;;  %vm616_vm0 = vmmov 0   ;;  %s743_s25 = smov (!%p266_p3, %s536_s25), 1  ;;  %v276_v5 = vld [vmem:[%s735_s1 + $0x8] sm:$0xff] }
   0xc   : > { %565 = vmatprep.subr.mxu0 %v615_v1  ;;  %573 = vmatprep.mubr.msk.f32.mxu0 %vm616_vm0, %v615_v1  ;;  %v368_v3 = vld [vmem:[%s737_s3 + $0x38] sm:$0xff]  ;;  %v367_v4 = vld [vmem:[%s737_s3 + $0x30] sm:$0xff]  ;;  %s541_s13 = sshll.u32 %s743_s25, 3  ;;  %v366_v6 = vld [vmem:[%s737_s3 + $0x28] sm:$0xff]  ;;  %vm286_vm1 = vcmask 261120   ;;  %vm376_vm2 = vcmask 523264  }
   0xd   : > { %566 = vmatpush3.msra.mxu0 %v278_v0  ;;  %576 = vmatprep.subr.mxu1 %v615_v1  ;;  %v275_v7 = vld [vmem:[%s735_s1] sm:$0xff]  ;;  %s269_s20 = scalar_lea.vmem %s734_s0, %s541_s13  ;;  %v364_v10 = vld [vmem:[%s737_s3 + $0x18] sm:$0xff]  ;;  %v363_v11 = vld [vmem:[%s737_s3 + $0x10] sm:$0xff]  ;;  %vm451_vm3 = vcmask 259072   ;;  %s273_s21 = scalar_lea.vmem %s741_s7, %s541_s13 }
   0xe   : > { %567 = vmatprep.subr.mxu0 %v615_v1  ;;  %577 = vmatpush3.msra.mxu1 %v368_v3  ;;  %v274_v8 = vld [vmem:[%s269_s20] sm:$0x3f]  ;;  %v362_v12 = vld [vmem:[%s737_s3 + $0x8] sm:$0xff] }
   0xf   : > { %568 = vmatpush3.msra.mxu0 %v277_v2  ;;  %578 = vmatprep.subr.mxu1 %v615_v1  ;;  %v365_v9 = vld [vmem:[%s737_s3 + $0x20] sm:$0xff] }
  0x10   : > { %569 = vmatprep.subr.mxu0 %v615_v1  ;;  %579 = vmatpush3.msra.mxu1 %v367_v4  ;;  %v361_v13 = vld [vmem:[%s737_s3] sm:$0xff] }
  0x11   : > { %570 = vmatpush3.msra.mxu0 %v276_v5  ;;  %580 = vmatprep.subr.mxu1 %v615_v1  ;;  %v543_v14 = vld [vmem:[%s736_s2] ss:$0 sm:$0xff] }
  0x12   : > { %571 = vmatprep.subr.mxu0 %v615_v1  ;;  %581 = vmatpush3.msra.mxu1 %v366_v6  ;;  %v545_v19 = vld [vmem:[%s738_s4] ss:$0 sm:$0xff] }
  0x13   : > { %572 = vmatpush3.msra.mxu0 %v275_v7  ;;  %582 = vmatprep.subr.mxu1 %v615_v1  ;;  %v547_v34 = vld [vmem:[%s739_s5] ss:$0 sm:$0xff] }
  0x14   : > { %574 = vmatmul.mubr.msk.f32.vlgmr.msra.gmra.mxu0 %vm286_vm1, %v274_v8  ;;  %583 = vmatpush3.msra.mxu1 %v365_v9  ;;  %v548_v36 = vld [vmem:[%s740_s6] ss:$0 sm:$0xff] }
  0x15   : > { %584 = vmatprep.subr.mxu1 %v615_v1  ;;  %592 = vmatprep.mubr.msk.f32.mxu1 %vm616_vm0, %v615_v1 }
  0x16   : > { %585 = vmatpush3.msra.mxu1 %v364_v10 }
  0x17   : > { %586 = vmatprep.subr.mxu1 %v615_v1 }
  0x18   : > { %587 = vmatpush3.msra.mxu1 %v363_v11 }
  0x19   : > { %588 = vmatprep.subr.mxu1 %v615_v1 }
  0x1a   : > { %589 = vmatpush3.msra.mxu1 %v362_v12 }
  0x1b   : > { %590 = vmatprep.subr.mxu1 %v615_v1 }
  0x1c   : > { %591 = vmatpush3.msra.mxu1 %v361_v13 }
  0xd4   : > { %v356_v15 = vpop.f32.mrf.mxu0 }
  0xd5   : > { %v357_v16 = vadd.f32 %v543_v14, %v356_v15 }
  0xd6   : > { %v575_v17 = vpop.f32.mrf.mxu0 }
  0xd7   : > { %v360_v18 = vmax.f32 %v357_v16, 0.0 }
  0xd9   : > { %593 = vmatmul.mubr.msk.f32.vlgmr.msra.gmra.mxu1 %vm376_vm2, %v360_v18 }
 0x199   : > { %v446_v20 = vpop.f32.mrf.mxu1 }
 0x19a   : > { %v447_v21 = vadd.f32 %v545_v19, %v446_v20 }
 0x19b   : > { %v594_v22 = vpop.f32.mrf.mxu1 }
 0x19c   : > { %v450_v23 = vadd.f32 %v447_v21, %v274_v8 }
 0x19e   : > { %v452_v24 = vsel %vm451_vm3, %v450_v23, 0.0 }
 0x19f   : > { %453 = vadd.xlane.f32.xlu0 %v452_v24 }
 0x228   : > { %v454_v25 = vpop.xlane.xlu0 %453 }
 0x229   : > { %v456_v26 = vmul.f32 0.03125, %v454_v25 }
 0x22b   : > { %v457_v27 = vsub.f32 %v450_v23, %v456_v26 }
 0x22d   : > { %v458_v28 = vmul.f32 %v457_v27, %v457_v27 }
 0x22f   : > { %v459_v29 = vsel %vm451_vm3, %v458_v28, 0.0 }
 0x230   : > { %460 = vadd.xlane.f32.xlu0 %v459_v29 }
 0x2b9   : > { %v461_v30 = vpop.xlane.xlu0 %460 }
 0x2ba   : > { %v462_v31 = vmul.f32 0.03125, %v461_v30 }
 0x2bc   : > { %v463_v32 = vadd.f32 1e-05, %v462_v31 }
 0x2be   : > { %605 = vrsqrt.f32 %v463_v32 }
 0x2cb   : > { %v606_v33 = vpop.eup %605 }
 0x2cc   : > { %v465_v35 = vmul.f32 %v606_v33, %v457_v27 }
 0x2ce   : > { %v473_v37 = vmul.f32 %v547_v34, %v465_v35 }
 0x2d0   : > { %v481_v38 = vadd.f32 %v548_v36, %v473_v37 }
 0x2d2   : > { %482 = vst.msk [vmem:[%s273_s21] sm:$0x3f] %vm451_vm3, %v481_v38 }
 0x2d3 PF: > { %s17_s24 = sadd.s32 1, %s613_s24  }
 0x2d4   : > { %p14_p4 = scmp.ge.s32.totalorder %s17_s24, 4  }
 0x2d6   :  { %16 = sbr.rel (!%p14_p4) target bundleno = 1 (0x1), region = 78 }

</bundles_post_ra>
